<compile_context>
chip_gen: v6e
topology: v6e:2x2x1
jax: 0.10.0
libtpu: 0.0.40
codegen_flags: <defaults>
</compile_context>

<pallas_src>
import jax
import jax.numpy as jnp
import numpy as np
from jax.experimental import pallas as pl
from jax.experimental.pallas import tpu as pltpu

# ----------------------------------------------------------------------------
# Network geometry (fixed by the torch module).
# ----------------------------------------------------------------------------
H_IN = W_IN = 28
K1, C1 = 5, 20              # conv1: 1 -> 20, 5x5, valid
H1 = W1 = H_IN - K1 + 1     # 24
PH1 = PW1 = H1 // 2         # 12
K2, C2 = 5, 50              # conv2: 20 -> 50, 5x5, valid
H2 = W2 = PH1 - K2 + 1      # 8
PH2 = PW2 = H2 // 2         # 4
FC1_IN, FC1_OUT, N_CLS = 800, 500, 10

# Lane-aligned column-block widths: even / odd output columns live in separate
# 256-lane halves so width pooling is a pair of aligned lane slices.
BLK1 = 256                  # >= PW1 * C1 = 240
BLK2 = 256                  # >= PW2 * C2 = 200

# Row-packed conv1 input layout: each 128-lane group of xp[r] holds image rows
# r..r+3 in four 32-lane slots (28 valid lanes + 4 zero pad each).
GROUPS = 4                  # image rows packed per 128-lane chunk
GW = 32                     # lanes per packed row slot
XPACK = GROUPS * GW         # 128


# ----------------------------------------------------------------------------
# The fused kernel (one invocation = one batch tile of `tb` samples).
# ----------------------------------------------------------------------------
def _mynet_fused_kernel(x_ref, band1_ref, bias1_ref, band2_ref, bias2_ref,
                        wfc1_ref, bfc1_ref, wfc2_ref, bfc2_ref, out_ref):
    f32, bf16 = jnp.float32, jnp.bfloat16
    tb = x_ref.shape[1]                      # batch tile size (multiple of 8)
    x = x_ref[...]                           # (28, tb, 128) f32, row-packed

    # ---- conv1: ONE stacked-K matmul (K = 256, effective 140). --------------
    # chunk0 = xp[i]   -> image rows i..i+3 ; chunk1 = xp[i+4] -> rows i+4..i+7
    # (band rows for the unused rows / pad lanes are zero).
    lhs1 = jnp.concatenate(
        [x[0:H1].reshape(H1 * tb, XPACK),
         x[K1 - 1:K1 - 1 + H1].reshape(H1 * tb, XPACK)],
        axis=-1).astype(bf16)                                   # (H1*tb, 256)
    h = jnp.dot(lhs1, band1_ref[...], preferred_element_type=f32)  # (H1*tb, 512)

    # ---- pool1 (2x2 / stride 2), conv bias added after the max (exact). -----
    h = h.reshape(PH1, 2 * tb, 2 * BLK1)
    h = jnp.maximum(h[:, :tb, :], h[:, tb:, :])            # row (i) pairs
    p1 = jnp.maximum(h[:, :, :BLK1], h[:, :, BLK1:]) + bias1_ref[...]
    # p1: (12, tb, 256) f32 = [y, b, x*20 + oc]

    # ---- conv2: ONE stacked-K matmul (K = 1280, effective 1200). ------------
    lhs2 = jnp.concatenate(
        [p1[di:di + H2].reshape(H2 * tb, BLK1) for di in range(K2)],
        axis=-1).astype(bf16)                                   # (H2*tb, 1280)
    h2 = jnp.dot(lhs2, band2_ref[...], preferred_element_type=f32)  # (H2*tb, 512)

    # ---- pool2 --------------------------------------------------------------
    h2 = h2.reshape(PH2, 2 * tb, 2 * BLK2)
    h2 = jnp.maximum(h2[:, :tb, :], h2[:, tb:, :])
    p2 = jnp.maximum(h2[:, :, :BLK2], h2[:, :, BLK2:]) + bias2_ref[...]
    # p2: (4, tb, 256) f32 = [y2, b, x2*50 + oc2]

    # ---- fc1 + relu: ONE matmul (K = 1024, effective 800). ------------------
    zin = jnp.concatenate([p2[y2] for y2 in range(PH2)], axis=-1).astype(bf16)
    z = jnp.dot(zin, wfc1_ref[...], preferred_element_type=f32) + bfc1_ref[...]
    z = jnp.maximum(z, 0.0)

    # ---- fc2 + log_softmax (fused epilogue, f32 softmax math). --------------
    logits = jnp.dot(z.astype(bf16), wfc2_ref[...],
                     preferred_element_type=f32) + bfc2_ref[...]
    m = jnp.max(logits, axis=-1, keepdims=True)
    s = logits - m
    lse = jnp.log(jnp.sum(jnp.exp(s), axis=-1, keepdims=True))
    out_ref[...] = (s - lse).astype(out_ref.dtype)


# ----------------------------------------------------------------------------
# One-time repack of torch-layout params into the fused kernel's layout.
# Pure permutation / zero padding (+ a bf16 cast of the matmul weights).
# ----------------------------------------------------------------------------
def prepare_params(params):
    w1, b1 = params["conv1_w"], params["conv1_b"]
    w2, b2 = params["conv2_w"], params["conv2_b"]
    wf1, bf1 = params["fc1_w"], params["fc1_b"]
    wf2, bf2 = params["fc2_w"], params["fc2_b"]
    bf16 = jnp.bfloat16

    # conv1 band for the row-packed input:
    #   LHS lane (chunk c, slot q, w)  <->  image row i + 4c + q, width w
    #   band row = 128*c + 32*q + w with w = 2x + jl + dj  (di = 4c + q)
    #   band col = jl*BLK1 + x*C1 + oc
    DI, DJ, JL, X, OC = np.meshgrid(np.arange(K1), np.arange(K1), np.arange(2),
                                    np.arange(PW1), np.arange(C1), indexing="ij")
    row1 = XPACK * (DI // GROUPS) + GW * (DI % GROUPS) + 2 * X + JL + DJ
    col1 = JL * BLK1 + X * C1 + OC
    band1 = jnp.zeros((2 * XPACK, 2 * BLK1), jnp.float32)
    band1 = band1.at[row1, col1].set(w1[OC, 0, DI, DJ]).astype(bf16)
    bias1 = jnp.zeros((1, BLK1), jnp.float32).at[0, :PW1 * C1].set(
        jnp.tile(b1, PW1))

    # conv2 band, stacked along the kernel-row axis -> (5*256, 512).
    DI, DJ, JL, X2, OC, C = np.meshgrid(np.arange(K2), np.arange(K2),
                                        np.arange(2), np.arange(PW2),
                                        np.arange(C2), np.arange(C1),
                                        indexing="ij")
    band2 = jnp.zeros((K2, BLK1, 2 * BLK2), jnp.float32)
    band2 = band2.at[DI, (2 * X2 + JL + DJ) * C1 + C,
                     JL * BLK2 + X2 * C2 + OC].set(w2[OC, C, DI, DJ])
    band2 = band2.reshape(K2 * BLK1, 2 * BLK2).astype(bf16)
    bias2 = jnp.zeros((1, BLK2), jnp.float32).at[0, :PW2 * C2].set(
        jnp.tile(b2, PW2))

    # fc1, permuted to consume the kernel's (y2, x2, c) layout exactly like
    # torch's channel-major reshape(-1, 800); stacked to (4*256, 500).
    Y2, X2, C = np.meshgrid(np.arange(PH2), np.arange(PW2), np.arange(C2),
                            indexing="ij")
    wfc1 = jnp.zeros((PH2, BLK2, FC1_OUT), jnp.float32)
    wfc1 = wfc1.at[Y2, X2 * C2 + C, :].set(
        wf1[C * (PH2 * PW2) + Y2 * PW2 + X2, :])
    wfc1 = wfc1.reshape(PH2 * BLK2, FC1_OUT).astype(bf16)

    return {
        "band1": band1, "bias1": bias1,
        "band2": band2, "bias2": bias2,
        "wfc1": wfc1, "bfc1": bf1.reshape(1, FC1_OUT),
        "wfc2": wf2.astype(bf16), "bfc2": bf2.reshape(1, N_CLS),
    }


# ----------------------------------------------------------------------------
# Forward wrapper: one fused pallas_call, gridded over batch tiles.
# ----------------------------------------------------------------------------
def mynet_forward(kparams, x):
    """x: (B, 1, 28, 28) float32 -> (B, 10) log-probs."""
    B = x.shape[0]
    # Batch tile: 128 makes the fc matmuls MXU-row-full and amortises the
    # per-grid-step overhead; small batches fall back to one rounded-up tile.
    tb = 128 if B >= 128 else -(-B // 8) * 8
    Bp = -(-B // tb) * tb

    xs = x.reshape(B, H_IN, W_IN)
    if Bp != B:
        xs = jnp.pad(xs, ((0, Bp - B), (0, 0), (0, 0)))
    xs = xs.transpose(1, 0, 2)                              # (28, Bp, 28)
    # Row-packed layout: slot q of xp[r] holds image row r+q (28 valid lanes
    # + 4 zero-pad), so conv1's stacked-K LHS is two 128-aligned slabs.
    xs = jnp.pad(xs, ((0, GROUPS - 1), (0, 0), (0, GW - W_IN)))   # (31, Bp, 32)
    xp = jnp.concatenate([xs[q:q + H_IN] for q in range(GROUPS)],
                         axis=-1)                           # (28, Bp, 128)

    out = pl.pallas_call(
        _mynet_fused_kernel,
        out_shape=jax.ShapeDtypeStruct((Bp, N_CLS), jnp.float32),
        grid=(Bp // tb,),
        in_specs=[
            pl.BlockSpec((H_IN, tb, XPACK), lambda i: (0, i, 0)),     # packed x
            pl.BlockSpec((2 * XPACK, 2 * BLK1), lambda i: (0, 0)),    # conv1 band
            pl.BlockSpec((1, BLK1), lambda i: (0, 0)),                # conv1 bias
            pl.BlockSpec((K2 * BLK1, 2 * BLK2), lambda i: (0, 0)),    # conv2 band
            pl.BlockSpec((1, BLK2), lambda i: (0, 0)),                # conv2 bias
            pl.BlockSpec((PH2 * BLK2, FC1_OUT), lambda i: (0, 0)),    # fc1 (perm)
            pl.BlockSpec((1, FC1_OUT), lambda i: (0, 0)),             # fc1 bias
            pl.BlockSpec((FC1_OUT, N_CLS), lambda i: (0, 0)),         # fc2
            pl.BlockSpec((1, N_CLS), lambda i: (0, 0)),               # fc2 bias
        ],
        out_specs=pl.BlockSpec((tb, N_CLS), lambda i: (i, 0)),
        compiler_params=pltpu.CompilerParams(
            dimension_semantics=("parallel",),
            vmem_limit_bytes=48 * 1024 * 1024,
        ),
    )(xp, kparams["band1"], kparams["bias1"], kparams["band2"],
      kparams["bias2"], kparams["wfc1"], kparams["bfc1"],
      kparams["wfc2"], kparams["bfc2"])
    return out[:B]


# ----------------------------------------------------------------------------
# Torch-layout init + pure-JAX reference (for the correctness check).
# ----------------------------------------------------------------------------
def init_params(key):
    ks = jax.random.split(key, 8)

    def u(k, shape, fan_in):
        bound = 1.0 / float(fan_in) ** 0.5
        return jax.random.uniform(k, shape, jnp.float32, -bound, bound)

    return {
        "conv1_w": u(ks[0], (20, 1, 5, 5), 1 * 5 * 5),
        "conv1_b": u(ks[1], (20,), 1 * 5 * 5),
        "conv2_w": u(ks[2], (50, 20, 5, 5), 20 * 5 * 5),
        "conv2_b": u(ks[3], (50,), 20 * 5 * 5),
        "fc1_w":   u(ks[4], (800, 500), 800),   # stored (in, out): x @ w
        "fc1_b":   u(ks[5], (500,), 800),
        "fc2_w":   u(ks[6], (500, 10), 500),
        "fc2_b":   u(ks[7], (10,), 500),
    }


def mynet_reference(params, x):
    dn = ("NCHW", "OIHW", "NCHW")
    h = jax.lax.conv_general_dilated(x, params["conv1_w"], (1, 1), "VALID",
                                     dimension_numbers=dn)
    h = h + params["conv1_b"][None, :, None, None]
    B, C, Hh, Ww = h.shape
    h = h.reshape(B, C, Hh // 2, 2, Ww // 2, 2).max(axis=(3, 5))
    h = jax.lax.conv_general_dilated(h, params["conv2_w"], (1, 1), "VALID",
                                     dimension_numbers=dn)
    h = h + params["conv2_b"][None, :, None, None]
    B, C, Hh, Ww = h.shape
    h = h.reshape(B, C, Hh // 2, 2, Ww // 2, 2).max(axis=(3, 5))
    h = h.reshape(B, -1)
    h = jnp.maximum(h @ params["fc1_w"] + params["fc1_b"], 0.0)
    h = h @ params["fc2_w"] + params["fc2_b"]
    return jax.nn.log_softmax(h, axis=-1)


if __name__ == "__main__":
    key = jax.random.PRNGKey(0)
    k_params, k_x = jax.random.split(key)
    params = init_params(k_params)
    kparams = prepare_params(params)           # one-time weight repack
    fwd = jax.jit(mynet_forward)
    ref_fn = jax.jit(mynet_reference)

    # Small-batch check (B=2 -> tb=8, single grid step).
    x_small = jax.random.normal(k_x, (2, 1, 28, 28), dtype=jnp.float32)
    out_small = jax.block_until_ready(fwd(kparams, x_small))
    assert out_small.shape == (2, 10), out_small.shape
    row_sums = jnp.sum(jnp.exp(out_small), axis=1)
    assert bool(jnp.all(jnp.abs(row_sums - 1.0) < 1e-4)), row_sums
    ref_small = ref_fn(params, x_small)
    err_small = float(jnp.max(jnp.abs(out_small - ref_small)))
    assert err_small < 5e-2, f"max |pallas - reference| = {err_small}"

    # Larger batch: exercises tb=128, the Bp != B padding path and a
    # multi-step "parallel" grid (both v7x TensorCores).
    x_big = jax.random.normal(jax.random.PRNGKey(1), (200, 1, 28, 28),
                              dtype=jnp.float32)
    out_big = jax.block_until_ready(fwd(kparams, x_big))
    assert out_big.shape == (200, 10), out_big.shape
    ref_big = ref_fn(params, x_big)
    err_big = float(jnp.max(jnp.abs(out_big - ref_big)))
    assert err_big < 5e-2, f"max |pallas - reference| = {err_big}"

    print("KERNEL_OK")
</pallas_src>

<mosaic_0001>
module attributes {stable_mosaic.version = 11 : i64} {
  func.func @_mynet_fused_kernel(%arg0: i32, %arg1: memref<28x8x128xf32, #tpu.memory_space<vmem>>, %arg2: memref<256x512xbf16, #tpu.memory_space<vmem>>, %arg3: memref<1x256xf32, #tpu.memory_space<vmem>>, %arg4: memref<1280x512xbf16, #tpu.memory_space<vmem>>, %arg5: memref<1x256xf32, #tpu.memory_space<vmem>>, %arg6: memref<1024x500xbf16, #tpu.memory_space<vmem>>, %arg7: memref<1x500xf32, #tpu.memory_space<vmem>>, %arg8: memref<500x10xbf16, #tpu.memory_space<vmem>>, %arg9: memref<1x10xf32, #tpu.memory_space<vmem>>, %arg10: memref<8x10xf32, #tpu.memory_space<vmem>>) attributes {dimension_semantics = [#tpu.dimension_semantics<parallel>], iteration_bounds = array<i64: 1>, scalar_prefetch = 0 : i64, scratch_operands = 0 : i64, tpu.core_type = #tpu.core_type<tc>, window_params = [{transform_indices = @transform_0, window_bounds = array<i64: 28, 8, 128>}, {pipeline_mode = #tpu.pipeline_mode<synchronous>, transform_indices = @transform_1, window_bounds = array<i64: 256, 512>}, {pipeline_mode = #tpu.pipeline_mode<synchronous>, transform_indices = @transform_2, window_bounds = array<i64: 1, 256>}, {pipeline_mode = #tpu.pipeline_mode<synchronous>, transform_indices = @transform_3, window_bounds = array<i64: 1280, 512>}, {pipeline_mode = #tpu.pipeline_mode<synchronous>, transform_indices = @transform_4, window_bounds = array<i64: 1, 256>}, {pipeline_mode = #tpu.pipeline_mode<synchronous>, transform_indices = @transform_5, window_bounds = array<i64: 1024, 500>}, {pipeline_mode = #tpu.pipeline_mode<synchronous>, transform_indices = @transform_6, window_bounds = array<i64: 1, 500>}, {pipeline_mode = #tpu.pipeline_mode<synchronous>, transform_indices = @transform_7, window_bounds = array<i64: 500, 10>}, {pipeline_mode = #tpu.pipeline_mode<synchronous>, transform_indices = @transform_8, window_bounds = array<i64: 1, 10>}, {transform_indices = @transform_9, window_bounds = array<i64: 8, 10>}]} {
    %c0 = arith.constant 0 : index
    %c0_0 = arith.constant 0 : index
    %c0_1 = arith.constant 0 : index
    %0 = vector.load %arg1[%c0, %c0_0, %c0_1] : memref<28x8x128xf32, #tpu.memory_space<vmem>>, vector<28x8x128xf32>
    %1 = vector.extract_strided_slice %0 {offsets = [0, 0, 0], sizes = [24, 8, 128], strides = [1, 1, 1]} : vector<28x8x128xf32> to vector<24x8x128xf32>
    %2 = vector.shape_cast %1 : vector<24x8x128xf32> to vector<192x128xf32>
    %3 = vector.extract_strided_slice %0 {offsets = [4, 0, 0], sizes = [24, 8, 128], strides = [1, 1, 1]} : vector<28x8x128xf32> to vector<24x8x128xf32>
    %4 = vector.shape_cast %3 : vector<24x8x128xf32> to vector<192x128xf32>
    %5 = tpu.concatenate %2, %4 in 1 : vector<192x128xf32>, vector<192x128xf32> -> vector<192x256xf32>
    %6 = arith.truncf %5 : vector<192x256xf32> to vector<192x256xbf16>
    %c0_2 = arith.constant 0 : index
    %c0_3 = arith.constant 0 : index
    %7 = vector.load %arg2[%c0_2, %c0_3] : memref<256x512xbf16, #tpu.memory_space<vmem>>, vector<256x512xbf16>
    %cst = arith.constant dense<0.000000e+00> : vector<192x512xf32>
    %8 = tpu.matmul %6, %7, %cst {dimension_numbers = #tpu.dot_dimension_numbers<[1], [0], [0], [1], [0, 0, 1, 1], [], []>} : vector<192x256xbf16>, vector<256x512xbf16>, vector<192x512xf32> -> vector<192x512xf32>
    %9 = vector.shape_cast %8 : vector<192x512xf32> to vector<12x16x512xf32>
    %10 = vector.extract_strided_slice %9 {offsets = [0, 0, 0], sizes = [12, 8, 512], strides = [1, 1, 1]} : vector<12x16x512xf32> to vector<12x8x512xf32>
    %11 = vector.extract_strided_slice %9 {offsets = [0, 8, 0], sizes = [12, 8, 512], strides = [1, 1, 1]} : vector<12x16x512xf32> to vector<12x8x512xf32>
    %12 = arith.maximumf %10, %11 : vector<12x8x512xf32>
    %13 = vector.extract_strided_slice %12 {offsets = [0, 0, 0], sizes = [12, 8, 256], strides = [1, 1, 1]} : vector<12x8x512xf32> to vector<12x8x256xf32>
    %14 = vector.extract_strided_slice %12 {offsets = [0, 0, 256], sizes = [12, 8, 256], strides = [1, 1, 1]} : vector<12x8x512xf32> to vector<12x8x256xf32>
    %15 = arith.maximumf %13, %14 : vector<12x8x256xf32>
    %c0_4 = arith.constant 0 : index
    %c0_5 = arith.constant 0 : index
    %16 = vector.load %arg3[%c0_4, %c0_5] : memref<1x256xf32, #tpu.memory_space<vmem>>, vector<1x256xf32>
    %17 = vector.shape_cast %16 : vector<1x256xf32> to vector<1x1x256xf32>
    %18 = vector.broadcast %17 : vector<1x1x256xf32> to vector<12x8x256xf32>
    %19 = arith.addf %15, %18 : vector<12x8x256xf32>
    %20 = vector.extract_strided_slice %19 {offsets = [0, 0, 0], sizes = [8, 8, 256], strides = [1, 1, 1]} : vector<12x8x256xf32> to vector<8x8x256xf32>
    %21 = vector.shape_cast %20 : vector<8x8x256xf32> to vector<64x256xf32>
    %22 = vector.extract_strided_slice %19 {offsets = [1, 0, 0], sizes = [8, 8, 256], strides = [1, 1, 1]} : vector<12x8x256xf32> to vector<8x8x256xf32>
    %23 = vector.shape_cast %22 : vector<8x8x256xf32> to vector<64x256xf32>
    %24 = vector.extract_strided_slice %19 {offsets = [2, 0, 0], sizes = [8, 8, 256], strides = [1, 1, 1]} : vector<12x8x256xf32> to vector<8x8x256xf32>
    %25 = vector.shape_cast %24 : vector<8x8x256xf32> to vector<64x256xf32>
    %26 = vector.extract_strided_slice %19 {offsets = [3, 0, 0], sizes = [8, 8, 256], strides = [1, 1, 1]} : vector<12x8x256xf32> to vector<8x8x256xf32>
    %27 = vector.shape_cast %26 : vector<8x8x256xf32> to vector<64x256xf32>
    %28 = vector.extract_strided_slice %19 {offsets = [4, 0, 0], sizes = [8, 8, 256], strides = [1, 1, 1]} : vector<12x8x256xf32> to vector<8x8x256xf32>
    %29 = vector.shape_cast %28 : vector<8x8x256xf32> to vector<64x256xf32>
    %30 = tpu.concatenate %21, %23, %25, %27, %29 in 1 : vector<64x256xf32>, vector<64x256xf32>, vector<64x256xf32>, vector<64x256xf32>, vector<64x256xf32> -> vector<64x1280xf32>
    %31 = arith.truncf %30 : vector<64x1280xf32> to vector<64x1280xbf16>
    %c0_6 = arith.constant 0 : index
    %c0_7 = arith.constant 0 : index
    %32 = vector.load %arg4[%c0_6, %c0_7] : memref<1280x512xbf16, #tpu.memory_space<vmem>>, vector<1280x512xbf16>
    %cst_8 = arith.constant dense<0.000000e+00> : vector<64x512xf32>
    %33 = tpu.matmul %31, %32, %cst_8 {dimension_numbers = #tpu.dot_dimension_numbers<[1], [0], [0], [1], [0, 0, 1, 1], [], []>} : vector<64x1280xbf16>, vector<1280x512xbf16>, vector<64x512xf32> -> vector<64x512xf32>
    %34 = vector.shape_cast %33 : vector<64x512xf32> to vector<4x16x512xf32>
    %35 = vector.extract_strided_slice %34 {offsets = [0, 0, 0], sizes = [4, 8, 512], strides = [1, 1, 1]} : vector<4x16x512xf32> to vector<4x8x512xf32>
    %36 = vector.extract_strided_slice %34 {offsets = [0, 8, 0], sizes = [4, 8, 512], strides = [1, 1, 1]} : vector<4x16x512xf32> to vector<4x8x512xf32>
    %37 = arith.maximumf %35, %36 : vector<4x8x512xf32>
    %38 = vector.extract_strided_slice %37 {offsets = [0, 0, 0], sizes = [4, 8, 256], strides = [1, 1, 1]} : vector<4x8x512xf32> to vector<4x8x256xf32>
    %39 = vector.extract_strided_slice %37 {offsets = [0, 0, 256], sizes = [4, 8, 256], strides = [1, 1, 1]} : vector<4x8x512xf32> to vector<4x8x256xf32>
    %40 = arith.maximumf %38, %39 : vector<4x8x256xf32>
    %c0_9 = arith.constant 0 : index
    %c0_10 = arith.constant 0 : index
    %41 = vector.load %arg5[%c0_9, %c0_10] : memref<1x256xf32, #tpu.memory_space<vmem>>, vector<1x256xf32>
    %42 = vector.shape_cast %41 : vector<1x256xf32> to vector<1x1x256xf32>
    %43 = vector.broadcast %42 : vector<1x1x256xf32> to vector<4x8x256xf32>
    %44 = arith.addf %40, %43 : vector<4x8x256xf32>
    %45 = vector.extract_strided_slice %44 {offsets = [0, 0, 0], sizes = [1, 8, 256], strides = [1, 1, 1]} : vector<4x8x256xf32> to vector<1x8x256xf32>
    %46 = vector.shape_cast %45 : vector<1x8x256xf32> to vector<8x256xf32>
    %47 = vector.extract_strided_slice %44 {offsets = [1, 0, 0], sizes = [1, 8, 256], strides = [1, 1, 1]} : vector<4x8x256xf32> to vector<1x8x256xf32>
    %48 = vector.shape_cast %47 : vector<1x8x256xf32> to vector<8x256xf32>
    %49 = vector.extract_strided_slice %44 {offsets = [2, 0, 0], sizes = [1, 8, 256], strides = [1, 1, 1]} : vector<4x8x256xf32> to vector<1x8x256xf32>
    %50 = vector.shape_cast %49 : vector<1x8x256xf32> to vector<8x256xf32>
    %51 = vector.extract_strided_slice %44 {offsets = [3, 0, 0], sizes = [1, 8, 256], strides = [1, 1, 1]} : vector<4x8x256xf32> to vector<1x8x256xf32>
    %52 = vector.shape_cast %51 : vector<1x8x256xf32> to vector<8x256xf32>
    %53 = tpu.concatenate %46, %48, %50, %52 in 1 : vector<8x256xf32>, vector<8x256xf32>, vector<8x256xf32>, vector<8x256xf32> -> vector<8x1024xf32>
    %54 = arith.truncf %53 : vector<8x1024xf32> to vector<8x1024xbf16>
    %c0_11 = arith.constant 0 : index
    %c0_12 = arith.constant 0 : index
    %55 = vector.load %arg6[%c0_11, %c0_12] : memref<1024x500xbf16, #tpu.memory_space<vmem>>, vector<1024x500xbf16>
    %cst_13 = arith.constant dense<0.000000e+00> : vector<8x500xf32>
    %56 = tpu.matmul %54, %55, %cst_13 {dimension_numbers = #tpu.dot_dimension_numbers<[1], [0], [0], [1], [0, 0, 1, 1], [], []>} : vector<8x1024xbf16>, vector<1024x500xbf16>, vector<8x500xf32> -> vector<8x500xf32>
    %c0_14 = arith.constant 0 : index
    %c0_15 = arith.constant 0 : index
    %57 = vector.load %arg7[%c0_14, %c0_15] : memref<1x500xf32, #tpu.memory_space<vmem>>, vector<1x500xf32>
    %58 = vector.broadcast %57 : vector<1x500xf32> to vector<8x500xf32>
    %59 = arith.addf %56, %58 : vector<8x500xf32>
    %cst_16 = arith.constant 0.000000e+00 : f32
    %60 = vector.broadcast %cst_16 : f32 to vector<8x500xf32>
    %61 = arith.maximumf %59, %60 : vector<8x500xf32>
    %62 = arith.truncf %61 : vector<8x500xf32> to vector<8x500xbf16>
    %c0_17 = arith.constant 0 : index
    %c0_18 = arith.constant 0 : index
    %63 = vector.load %arg8[%c0_17, %c0_18] : memref<500x10xbf16, #tpu.memory_space<vmem>>, vector<500x10xbf16>
    %cst_19 = arith.constant dense<0.000000e+00> : vector<8x10xf32>
    %64 = tpu.matmul %62, %63, %cst_19 {dimension_numbers = #tpu.dot_dimension_numbers<[1], [0], [0], [1], [0, 0, 1, 1], [], []>} : vector<8x500xbf16>, vector<500x10xbf16>, vector<8x10xf32> -> vector<8x10xf32>
    %c0_20 = arith.constant 0 : index
    %c0_21 = arith.constant 0 : index
    %65 = vector.load %arg9[%c0_20, %c0_21] : memref<1x10xf32, #tpu.memory_space<vmem>>, vector<1x10xf32>
    %66 = vector.broadcast %65 : vector<1x10xf32> to vector<8x10xf32>
    %67 = arith.addf %64, %66 : vector<8x10xf32>
    %cst_22 = arith.constant dense<0xFF800000> : vector<8xf32>
    %68 = vector.multi_reduction <maximumf>, %67, %cst_22 [1] : vector<8x10xf32> to vector<8xf32>
    %69 = vector.shape_cast %68 : vector<8xf32> to vector<8x1xf32>
    %70 = vector.broadcast %69 : vector<8x1xf32> to vector<8x10xf32>
    %71 = arith.subf %67, %70 : vector<8x10xf32>
    %72 = math.exp %71 : vector<8x10xf32>
    %cst_23 = arith.constant dense<0.000000e+00> : vector<8xf32>
    %73 = vector.multi_reduction <add>, %72, %cst_23 [1] : vector<8x10xf32> to vector<8xf32>
    %74 = vector.shape_cast %73 : vector<8xf32> to vector<8x1xf32>
    %75 = math.log %74 : vector<8x1xf32>
    %76 = vector.broadcast %75 : vector<8x1xf32> to vector<8x10xf32>
    %77 = arith.subf %71, %76 : vector<8x10xf32>
    %c0_24 = arith.constant 0 : index
    %c0_25 = arith.constant 0 : index
    %78 = vector.load %arg10[%c0_24, %c0_25] : memref<8x10xf32, #tpu.memory_space<vmem>>, vector<8x10xf32>
    tpu.vector_store %arg10[%c0_24, %c0_25], %77 {strides = array<i32>} : memref<8x10xf32, #tpu.memory_space<vmem>>, vector<8x10xf32>,
    return
  }
  func.func @transform_0(%arg0: i32) -> (i32, i32, i32) {
    %c0_i32 = arith.constant 0 : i32
    %c0_i32_0 = arith.constant 0 : i32
    %c0_i32_1 = arith.constant 0 : i32
    return %c0_i32, %arg0, %c0_i32_0 : i32, i32, i32
  }
  func.func @transform_1(%arg0: i32) -> (i32, i32) {
    %c0_i32 = arith.constant 0 : i32
    %c0_i32_0 = arith.constant 0 : i32
    %c0_i32_1 = arith.constant 0 : i32
    return %c0_i32, %c0_i32_0 : i32, i32
  }
  func.func @transform_2(%arg0: i32) -> (i32, i32) {
    %c0_i32 = arith.constant 0 : i32
    %c0_i32_0 = arith.constant 0 : i32
    %c0_i32_1 = arith.constant 0 : i32
    return %c0_i32, %c0_i32_0 : i32, i32
  }
  func.func @transform_3(%arg0: i32) -> (i32, i32) {
    %c0_i32 = arith.constant 0 : i32
    %c0_i32_0 = arith.constant 0 : i32
    %c0_i32_1 = arith.constant 0 : i32
    return %c0_i32, %c0_i32_0 : i32, i32
  }
  func.func @transform_4(%arg0: i32) -> (i32, i32) {
    %c0_i32 = arith.constant 0 : i32
    %c0_i32_0 = arith.constant 0 : i32
    %c0_i32_1 = arith.constant 0 : i32
    return %c0_i32, %c0_i32_0 : i32, i32
  }
  func.func @transform_5(%arg0: i32) -> (i32, i32) {
    %c0_i32 = arith.constant 0 : i32
    %c0_i32_0 = arith.constant 0 : i32
    %c0_i32_1 = arith.constant 0 : i32
    return %c0_i32, %c0_i32_0 : i32, i32
  }
  func.func @transform_6(%arg0: i32) -> (i32, i32) {
    %c0_i32 = arith.constant 0 : i32
    %c0_i32_0 = arith.constant 0 : i32
    %c0_i32_1 = arith.constant 0 : i32
    return %c0_i32, %c0_i32_0 : i32, i32
  }
  func.func @transform_7(%arg0: i32) -> (i32, i32) {
    %c0_i32 = arith.constant 0 : i32
    %c0_i32_0 = arith.constant 0 : i32
    %c0_i32_1 = arith.constant 0 : i32
    return %c0_i32, %c0_i32_0 : i32, i32
  }
  func.func @transform_8(%arg0: i32) -> (i32, i32) {
    %c0_i32 = arith.constant 0 : i32
    %c0_i32_0 = arith.constant 0 : i32
    %c0_i32_1 = arith.constant 0 : i32
    return %c0_i32, %c0_i32_0 : i32, i32
  }
  func.func @transform_9(%arg0: i32) -> (i32, i32) {
    %c0_i32 = arith.constant 0 : i32
    %c0_i32_0 = arith.constant 0 : i32
    return %arg0, %c0_i32 : i32, i32
  }
}

</mosaic_0001>

<bundles_post_ra>
// kernel: mynet_forward.1
= control target key start
LH: loop header
LB: loop body
LE: loop exit
PB: predicated region body
PF: predicated region fallthrough
CT: control target
= control target key end

     0   :  { %vm5754_vm0 = vcmask 1041408   ;;  %vm5750_vm1 = vcmask 949248   ;;  %vm5838_vm2 = vcmask 80896   ;;  %s10296_s1 = inlined_call_operand.vmem [shape: bf16[256,512], index: 1, kind: input, shape index: {}]   ;;  %s10297_s0 = inlined_call_operand.vmem [shape: f32[28,8,128], index: 0, kind: input, shape index: {}]   ;;  %s10298_s3 = inlined_call_operand.vmem [shape: bf16[1280,512], index: 3, kind: input, shape index: {}]   ;;  %s10299_s2 = inlined_call_operand.vmem [shape: f32[1,256], index: 2, kind: input, shape index: {}]   ;;  %s10300_s5 = inlined_call_operand.vmem [shape: bf16[1024,500], index: 5, kind: input, shape index: {}]   ;;  %s10301_s4 = inlined_call_operand.vmem [shape: f32[1,256], index: 4, kind: input, shape index: {}]   ;;  %s10302_s7 = inlined_call_operand.vmem [shape: bf16[500,10], index: 7, kind: input, shape index: {}]   ;;  %s10303_s6 = inlined_call_operand.vmem [shape: f32[1,500], index: 6, kind: input, shape index: {}]   ;;  %s10304_s8 = inlined_call_operand.vmem [shape: f32[1,10], index: 8, kind: input, shape index: {}]   ;;  %s10305_s9 = inlined_call_operand.vmem [shape: f32[8,10], index: 9, kind: output, shape index: {}]  }
   0x1   :  { %v6575_v0 = vld [vmem:[%s10296_s1 + $0xe4] ss:$16 sps:$4 sm:$0xff]   ;;  %v6577_v1 = vld [vmem:[%s10296_s1 + $0xec] ss:$16 sps:$4 sm:$0xff]   ;;  %v6579_v2 = vld [vmem:[%s10296_s1 + $0xe0] ss:$16 sps:$4 sm:$0xff]  }
   0x2   :  { %459 = vmatprep.subr.bf16.mxu0 %v6575_v0  ;;  %v6580_v3 = vld [vmem:[%s10296_s1 + $0xe8] ss:$16 sps:$4 sm:$0xff]   ;;  %612 = vmatprep.subr.bf16.mxu1 %v6577_v1  ;;  %v6581_v4 = vld [vmem:[%s10296_s1 + $0xc4] ss:$16 sps:$4 sm:$0xff]   ;;  %v6583_v5 = vld [vmem:[%s10296_s1 + $0xcc] ss:$16 sps:$4 sm:$0xff]  }
   0x3   :  { %460 = vmatpush1.bf16.msra.mxu0 %v6579_v2  ;;  %613 = vmatpush1.bf16.msra.mxu1 %v6580_v3  ;;  %v6585_v6 = vld [vmem:[%s10296_s1 + $0xc0] ss:$16 sps:$4 sm:$0xff]   ;;  %v6586_v7 = vld [vmem:[%s10296_s1 + $0xc8] ss:$16 sps:$4 sm:$0xff]   ;;  %v6587_v8 = vld [vmem:[%s10296_s1 + $0xa4] ss:$16 sps:$4 sm:$0xff]  }
   0x4   :  { %461 = vmatprep.subr.bf16.mxu0 %v6581_v4  ;;  %614 = vmatprep.subr.bf16.mxu1 %v6583_v5  ;;  %v6589_v9 = vld [vmem:[%s10296_s1 + $0xac] ss:$16 sps:$4 sm:$0xff]   ;;  %v6591_v10 = vld [vmem:[%s10296_s1 + $0xa0] ss:$16 sps:$4 sm:$0xff]   ;;  %v6592_v11 = vld [vmem:[%s10296_s1 + $0xa8] ss:$16 sps:$4 sm:$0xff]  }
   0x5   :  { %v6593_v12 = vld [vmem:[%s10296_s1 + $0x84] ss:$16 sps:$4 sm:$0xff]   ;;  %v6595_v13 = vld [vmem:[%s10296_s1 + $0x8c] ss:$16 sps:$4 sm:$0xff]   ;;  %v6597_v14 = vld [vmem:[%s10296_s1 + $0x80] ss:$16 sps:$4 sm:$0xff]  }
   0x6   :  { %v6598_v15 = vld [vmem:[%s10296_s1 + $0x88] ss:$16 sps:$4 sm:$0xff]   ;;  %v6599_v16 = vld [vmem:[%s10296_s1 + $0x64] ss:$16 sps:$4 sm:$0xff]   ;;  %v6601_v17 = vld [vmem:[%s10296_s1 + $0x6c] ss:$16 sps:$4 sm:$0xff]  }
   0x7   :  { %462 = vmatpush1.bf16.msra.mxu0 %v6585_v6  ;;  %615 = vmatpush1.bf16.msra.mxu1 %v6586_v7  ;;  %v6603_v18 = vld [vmem:[%s10296_s1 + $0x60] ss:$16 sps:$4 sm:$0xff]   ;;  %v6604_v19 = vld [vmem:[%s10296_s1 + $0x68] ss:$16 sps:$4 sm:$0xff]   ;;  %v6605_v20 = vld [vmem:[%s10296_s1 + $0x44] ss:$16 sps:$4 sm:$0xff]  }
   0x8   :  { %463 = vmatprep.subr.bf16.mxu0 %v6587_v8  ;;  %616 = vmatprep.subr.bf16.mxu1 %v6589_v9  ;;  %v6607_v21 = vld [vmem:[%s10296_s1 + $0x4c] ss:$16 sps:$4 sm:$0xff]   ;;  %v6609_v22 = vld [vmem:[%s10296_s1 + $0x40] ss:$16 sps:$4 sm:$0xff]   ;;  %v6610_v23 = vld [vmem:[%s10296_s1 + $0x48] ss:$16 sps:$4 sm:$0xff]  }
   0x9   :  { %v6611_v24 = vld [vmem:[%s10296_s1 + $0x24] ss:$16 sps:$4 sm:$0xff]   ;;  %v6613_v25 = vld [vmem:[%s10296_s1 + $0x2c] ss:$16 sps:$4 sm:$0xff]   ;;  %v6615_v26 = vld [vmem:[%s10296_s1 + $0x20] ss:$16 sps:$4 sm:$0xff]  }
   0xa   :  { %v6616_v27 = vld [vmem:[%s10296_s1 + $0x28] ss:$16 sps:$4 sm:$0xff]   ;;  %v6617_v28 = vld [vmem:[%s10296_s1 + $0x4] ss:$16 sps:$4 sm:$0xff]   ;;  %v6619_v29 = vld [vmem:[%s10296_s1 + $0xc] ss:$16 sps:$4 sm:$0xff]  }
   0xb   :  { %464 = vmatpush1.bf16.msra.mxu0 %v6591_v10  ;;  %617 = vmatpush1.bf16.msra.mxu1 %v6592_v11  ;;  %v6621_v30 = vld [vmem:[%s10296_s1] ss:$16 sps:$4 sm:$0xff]   ;;  %v6622_v31 = vld [vmem:[%s10296_s1 + $0x8] ss:$16 sps:$4 sm:$0xff]   ;;  %v6623_v32 = vld [vmem:[%s10296_s1 + $0x1e4] ss:$16 sps:$4 sm:$0xff]  }
   0xc   :  { %465 = vmatprep.subr.bf16.mxu0 %v6593_v12  ;;  %618 = vmatprep.subr.bf16.mxu1 %v6595_v13  ;;  %v6625_v33 = vld [vmem:[%s10296_s1 + $0x1ec] ss:$16 sps:$4 sm:$0xff]   ;;  %v6627_v34 = vld [vmem:[%s10296_s1 + $0x1e0] ss:$16 sps:$4 sm:$0xff]   ;;  %v6628_v35 = vld [vmem:[%s10296_s1 + $0x1e8] ss:$16 sps:$4 sm:$0xff]  }
   0xd   :  { %v6629_v36 = vld [vmem:[%s10296_s1 + $0x1c4] ss:$16 sps:$4 sm:$0xff]   ;;  %v6631_v37 = vld [vmem:[%s10296_s1 + $0x1cc] ss:$16 sps:$4 sm:$0xff]   ;;  %v6633_v38 = vld [vmem:[%s10296_s1 + $0x1c0] ss:$16 sps:$4 sm:$0xff]  }
   0xe   :  { %v6634_v39 = vld [vmem:[%s10296_s1 + $0x1c8] ss:$16 sps:$4 sm:$0xff]   ;;  %v6635_v40 = vld [vmem:[%s10296_s1 + $0x1a4] ss:$16 sps:$4 sm:$0xff]   ;;  %v6637_v41 = vld [vmem:[%s10296_s1 + $0x1ac] ss:$16 sps:$4 sm:$0xff]  }
   0xf   :  { %466 = vmatpush1.bf16.msra.mxu0 %v6597_v14  ;;  %619 = vmatpush1.bf16.msra.mxu1 %v6598_v15  ;;  %v6639_v42 = vld [vmem:[%s10296_s1 + $0x1a0] ss:$16 sps:$4 sm:$0xff]   ;;  %v6640_v43 = vld [vmem:[%s10296_s1 + $0x1a8] ss:$16 sps:$4 sm:$0xff]   ;;  %v6641_v44 = vld [vmem:[%s10296_s1 + $0x184] ss:$16 sps:$4 sm:$0xff]  }
  0x10   :  { %467 = vmatprep.subr.bf16.mxu0 %v6599_v16  ;;  %620 = vmatprep.subr.bf16.mxu1 %v6601_v17  ;;  %v6643_v45 = vld [vmem:[%s10296_s1 + $0x18c] ss:$16 sps:$4 sm:$0xff]   ;;  %v37_v46 = vld [vmem:[%s10297_s0 + $0x20] sm:$0xff]  ;;  %v6646_v49 = vld [vmem:[%s10296_s1 + $0x188] ss:$16 sps:$4 sm:$0xff]  }
  0x11   :  { %v38_v47 = vld [vmem:[%s10297_s0 + $0x28] sm:$0xff]  ;;  %v6645_v48 = vld [vmem:[%s10296_s1 + $0x180] ss:$16 sps:$4 sm:$0xff]   ;;  %v6647_v51 = vld [vmem:[%s10296_s1 + $0x164] ss:$16 sps:$4 sm:$0xff]  }
  0x12   :  { %v7771_v50 = vpack.c.bf16 %v38_v47, %v37_v46  ;;  %v6649_v52 = vld [vmem:[%s10296_s1 + $0x16c] ss:$16 sps:$4 sm:$0xff]   ;;  %v6651_v53 = vld [vmem:[%s10296_s1 + $0x160] ss:$16 sps:$4 sm:$0xff]   ;;  %v6652_v54 = vld [vmem:[%s10296_s1 + $0x168] ss:$16 sps:$4 sm:$0xff]  }
  0x13   :  { %468 = vmatpush1.bf16.msra.mxu0 %v6603_v18  ;;  %621 = vmatpush1.bf16.msra.mxu1 %v6604_v19  ;;  %v6653_v55 = vld [vmem:[%s10296_s1 + $0x144] ss:$16 sps:$4 sm:$0xff]   ;;  %v6655_v56 = vld [vmem:[%s10296_s1 + $0x14c] ss:$16 sps:$4 sm:$0xff]   ;;  %v6657_v57 = vld [vmem:[%s10296_s1 + $0x140] ss:$16 sps:$4 sm:$0xff]  }
  0x14   :  { %469 = vmatprep.subr.bf16.mxu0 %v6605_v20  ;;  %622 = vmatprep.subr.bf16.mxu1 %v6607_v21  ;;  %v6658_v58 = vld [vmem:[%s10296_s1 + $0x148] ss:$16 sps:$4 sm:$0xff]   ;;  %v6659_v59 = vld [vmem:[%s10296_s1 + $0x124] ss:$16 sps:$4 sm:$0xff]   ;;  %v6661_v60 = vld [vmem:[%s10296_s1 + $0x12c] ss:$16 sps:$4 sm:$0xff]  }
  0x15   :  { %491 = vmatprep.mubr.bf16.mxu0 %v7771_v50  ;;  %644 = vmatprep.mubr.bf16.mxu1 %v7771_v50  ;;  %v6663_v61 = vld [vmem:[%s10296_s1 + $0x120] ss:$16 sps:$4 sm:$0xff]   ;;  %v6664_v62 = vld [vmem:[%s10296_s1 + $0x128] ss:$16 sps:$4 sm:$0xff]   ;;  %v6665_v63 = vld [vmem:[%s10296_s1 + $0x104] ss:$16 sps:$4 sm:$0xff]  }
  0x16   :  { %v6667_v0 = vld [vmem:[%s10296_s1 + $0x10c] ss:$16 sps:$4 sm:$0xff]   ;;  %v6669_v1 = vld [vmem:[%s10296_s1 + $0x100] ss:$16 sps:$4 sm:$0xff]   ;;  %v6670_v2 = vld [vmem:[%s10296_s1 + $0x108] ss:$16 sps:$4 sm:$0xff]  }
  0x17   :  { %470 = vmatpush1.bf16.msra.mxu0 %v6609_v22  ;;  %623 = vmatpush1.bf16.msra.mxu1 %v6610_v23  ;;  %v33_v3 = vld [vmem:[%s10297_s0] sm:$0xff]  ;;  %v34_v4 = vld [vmem:[%s10297_s0 + $0x8] sm:$0xff]  ;;  %v39_v5 = vld [vmem:[%s10297_s0 + $0x30] sm:$0xff] }
  0x18   :  { %471 = vmatprep.subr.bf16.mxu0 %v6611_v24  ;;  %624 = vmatprep.subr.bf16.mxu1 %v6613_v25  ;;  %v40_v6 = vld [vmem:[%s10297_s0 + $0x38] sm:$0xff]  ;;  %v6673_v7 = vld [vmem:[%s10298_s3 + $0xe4] ss:$16 sps:$4 sm:$0xff]   ;;  %v61_v9 = vpack.c.bf16 %v34_v4, %v33_v3  ;;  %v6671_v11 = vld [vmem:[%s10298_s3 + $0xe0] ss:$16 sps:$4 sm:$0xff]  }
  0x19   :  { %v6676_v8 = vld [vmem:[%s10298_s3 + $0x2e4] ss:$16 sps:$4 sm:$0xff]   ;;  %v7841_v10 = vpack.c.bf16 %v40_v6, %v39_v5  ;;  %v6674_v12 = vld [vmem:[%s10298_s3 + $0x2e0] ss:$16 sps:$4 sm:$0xff]   ;;  %v36_v14 = vld [vmem:[%s10297_s0 + $0x18] sm:$0xff] }
  0x1a   :  { %v35_v13 = vld [vmem:[%s10297_s0 + $0x10] sm:$0xff]  ;;  %v41_v17 = vld [vmem:[%s10297_s0 + $0x40] sm:$0xff]  ;;  %v42_v18 = vld [vmem:[%s10297_s0 + $0x48] sm:$0xff] }
  0x1b   :  { %472 = vmatpush1.bf16.msra.mxu0 %v6615_v26  ;;  %625 = vmatpush1.bf16.msra.mxu1 %v6616_v27  ;;  %v6679_v15 = vld [vmem:[%s10298_s3 + $0xc4] ss:$16 sps:$4 sm:$0xff]   ;;  %v6677_v19 = vld [vmem:[%s10298_s3 + $0xc0] ss:$16 sps:$4 sm:$0xff]   ;;  %v63_v23 = vpack.c.bf16 %v36_v14, %v35_v13  ;;  %v7881_v24 = vpack.c.bf16 %v42_v18, %v41_v17  ;;  %v54_v13 = vld [vmem:[%s10297_s0 + $0xa8] sm:$0xff] }
  0x1c   :  { %473 = vmatprep.subr.bf16.mxu0 %v6617_v28  ;;  %626 = vmatprep.subr.bf16.mxu1 %v6619_v29  ;;  %v6682_v16 = vld [vmem:[%s10298_s3 + $0x2c4] ss:$16 sps:$4 sm:$0xff]   ;;  %v6680_v20 = vld [vmem:[%s10298_s3 + $0x2c0] ss:$16 sps:$4 sm:$0xff]  }
  0x1d   :  { %v6685_v21 = vld [vmem:[%s10298_s3 + $0xa4] ss:$16 sps:$4 sm:$0xff]   ;;  %v6683_v25 = vld [vmem:[%s10298_s3 + $0xa0] ss:$16 sps:$4 sm:$0xff]  }
  0x1e   :  { %v6688_v22 = vld [vmem:[%s10298_s3 + $0x2a4] ss:$16 sps:$4 sm:$0xff]   ;;  %v6686_v26 = vld [vmem:[%s10298_s3 + $0x2a0] ss:$16 sps:$4 sm:$0xff]  }
  0x1f   :  { %474 = vmatpush1.bf16.msra.mxu0 %v6621_v30  ;;  %627 = vmatpush1.bf16.msra.mxu1 %v6622_v31  ;;  %v6691_v27 = vld [vmem:[%s10298_s3 + $0x84] ss:$16 sps:$4 sm:$0xff]   ;;  %v44_v30 = vld [vmem:[%s10297_s0 + $0x58] sm:$0xff]  ;;  %v6689_v31 = vld [vmem:[%s10298_s3 + $0x80] ss:$16 sps:$4 sm:$0xff]  }
  0x20   :  { %475 = vmatprep.subr.bf16.mxu0 %v6623_v32  ;;  %628 = vmatprep.subr.bf16.mxu1 %v6625_v33  ;;  %v6694_v28 = vld [vmem:[%s10298_s3 + $0x284] ss:$16 sps:$4 sm:$0xff]   ;;  %v6692_v32 = vld [vmem:[%s10298_s3 + $0x280] ss:$16 sps:$4 sm:$0xff]  }
  0x21   :  { %v43_v29 = vld [vmem:[%s10297_s0 + $0x50] sm:$0xff]  ;;  %v57_v18 = vld [vmem:[%s10297_s0 + $0xc0] sm:$0xff] }
  0x22   :  { %v6697_v33 = vld [vmem:[%s10298_s3 + $0x64] ss:$16 sps:$4 sm:$0xff]   ;;  %v6707_v46 = vld [vmem:[%s10298_s3 + $0x20] ss:$16 sps:$4 sm:$0xff]  }
  0x23   :  { %476 = vmatpush2.bf16.msra.mxu0 %v6627_v34  ;;  %629 = vmatpush2.bf16.msra.mxu1 %v6628_v35  ;;  %v6700_v34 = vld [vmem:[%s10298_s3 + $0x264] ss:$16 sps:$4 sm:$0xff]   ;;  %v7915_v35 = vpack.c.bf16 %v44_v30, %v43_v29  ;;  %v6710_v47 = vld [vmem:[%s10298_s3 + $0x220] ss:$16 sps:$4 sm:$0xff]  }
  0x24   :  { %477 = vmatprep.subr.bf16.mxu0 %v6629_v36  ;;  %630 = vmatprep.subr.bf16.mxu1 %v6631_v37  ;;  %v6695_v36 = vld [vmem:[%s10298_s3 + $0x60] ss:$16 sps:$4 sm:$0xff]   ;;  %v6736_v3 = vld [vmem:[%s10298_s3 + $0x3a4] ss:$16 sps:$4 sm:$0xff]  }
  0x25   :  { %v6698_v37 = vld [vmem:[%s10298_s3 + $0x260] ss:$16 sps:$4 sm:$0xff]   ;;  %v6748_v30 = vld [vmem:[%s10298_s3 + $0x364] ss:$16 sps:$4 sm:$0xff]  }
  0x26   :  { %v6731_v4 = vld [vmem:[%s10298_s3 + $0x1a0] ss:$16 sps:$4 sm:$0xff]  }
  0x27   :  { %478 = vmatpush2.bf16.msra.mxu0 %v6633_v38  ;;  %631 = vmatpush2.bf16.msra.mxu1 %v6634_v39  ;;  %v6703_v38 = vld [vmem:[%s10298_s3 + $0x44] ss:$16 sps:$4 sm:$0xff]   ;;  %v6734_v5 = vld [vmem:[%s10298_s3 + $0x3a0] ss:$16 sps:$4 sm:$0xff]  }
  0x28   :  { %479 = vmatprep.subr.bf16.mxu0 %v6635_v40  ;;  %632 = vmatprep.subr.bf16.mxu1 %v6637_v41  ;;  %v6706_v39 = vld [vmem:[%s10298_s3 + $0x244] ss:$16 sps:$4 sm:$0xff]   ;;  %v46_v41 = vld [vmem:[%s10297_s0 + $0x68] sm:$0xff]  ;;  %v6746_v29 = vld [vmem:[%s10298_s3 + $0x360] ss:$16 sps:$4 sm:$0xff]  }
  0x29   :  { %v45_v40 = vld [vmem:[%s10297_s0 + $0x60] sm:$0xff] }
  0x2b   :  { %480 = vmatpush2.bf16.msra.mxu0 %v6639_v42  ;;  %633 = vmatpush2.bf16.msra.mxu1 %v6640_v43  ;;  %v6701_v42 = vld [vmem:[%s10298_s3 + $0x40] ss:$16 sps:$4 sm:$0xff]  }
  0x2c   :  { %481 = vmatprep.subr.bf16.mxu0 %v6641_v44  ;;  %634 = vmatprep.subr.bf16.mxu1 %v6643_v45  ;;  %v6704_v43 = vld [vmem:[%s10298_s3 + $0x240] ss:$16 sps:$4 sm:$0xff]   ;;  %v6709_v44 = vld [vmem:[%s10298_s3 + $0x24] ss:$16 sps:$4 sm:$0xff]  }
  0x2d   :  { %v6712_v45 = vld [vmem:[%s10298_s3 + $0x224] ss:$16 sps:$4 sm:$0xff]  }
  0x2f   :  { %482 = vmatpush2.bf16.msra.mxu0 %v6645_v48  ;;  %635 = vmatpush2.bf16.msra.mxu1 %v6646_v49  ;;  %v7957_v48 = vpack.c.bf16 %v46_v41, %v45_v40  ;;  %v6715_v49 = vld [vmem:[%s10298_s3 + $0x4] ss:$16 sps:$4 sm:$0xff]  }
  0x30   :  { %483 = vmatprep.subr.bf16.mxu0 %v6647_v51  ;;  %636 = vmatprep.subr.bf16.mxu1 %v6649_v52  ;;  %v47_v51 = vld [vmem:[%s10297_s0 + $0x70] sm:$0xff]  ;;  %v48_v52 = vld [vmem:[%s10297_s0 + $0x78] sm:$0xff] }
  0x31   :  { %v6766_v40 = vld [vmem:[%s10298_s3 + $0x4e4] ss:$16 sps:$4 sm:$0xff]  }
  0x32   :  { %v6769_v41 = vld [vmem:[%s10298_s3 + $0x304] ss:$16 sps:$4 sm:$0xff]  }
  0x33   :  { %484 = vmatpush2.bf16.msra.mxu0 %v6651_v53  ;;  %637 = vmatpush2.bf16.msra.mxu1 %v6652_v54  ;;  %v6713_v53 = vld [vmem:[%s10298_s3] ss:$16 sps:$4 sm:$0xff]  }
  0x34   :  { %485 = vmatprep.subr.bf16.mxu0 %v6653_v55  ;;  %638 = vmatprep.subr.bf16.mxu1 %v6655_v56  ;;  %v6716_v54 = vld [vmem:[%s10298_s3 + $0x200] ss:$16 sps:$4 sm:$0xff]   ;;  %v6721_v55 = vld [vmem:[%s10298_s3 + $0x1e4] ss:$16 sps:$4 sm:$0xff]  }
  0x35   :  { %v6724_v56 = vld [vmem:[%s10298_s3 + $0x3e4] ss:$16 sps:$4 sm:$0xff]  }
  0x37   :  { %486 = vmatpush2.bf16.msra.mxu0 %v6657_v57  ;;  %639 = vmatpush2.bf16.msra.mxu1 %v6658_v58  ;;  %v6719_v57 = vld [vmem:[%s10298_s3 + $0x1e0] ss:$16 sps:$4 sm:$0xff]  }
  0x38   :  { %487 = vmatprep.subr.bf16.mxu0 %v6659_v59  ;;  %640 = vmatprep.subr.bf16.mxu1 %v6661_v60  ;;  %v6722_v58 = vld [vmem:[%s10298_s3 + $0x3e0] ss:$16 sps:$4 sm:$0xff]   ;;  %v68_v59 = vpack.c.bf16 %v48_v52, %v47_v51  ;;  %v6727_v60 = vld [vmem:[%s10298_s3 + $0x1c4] ss:$16 sps:$4 sm:$0xff]  }
  0x3b   :  { %488 = vmatpush2.bf16.msra.mxu0 %v6663_v61  ;;  %641 = vmatpush2.bf16.msra.mxu1 %v6664_v62  ;;  %v6730_v61 = vld [vmem:[%s10298_s3 + $0x3c4] ss:$16 sps:$4 sm:$0xff]  }
  0x3c   :  { %489 = vmatprep.subr.bf16.mxu0 %v6665_v63  ;;  %642 = vmatprep.subr.bf16.mxu1 %v6667_v0  ;;  %v49_v62 = vld [vmem:[%s10297_s0 + $0x80] sm:$0xff]  ;;  %v50_v63 = vld [vmem:[%s10297_s0 + $0x88] sm:$0xff] }
  0x3d   :  { %v6725_v0 = vld [vmem:[%s10298_s3 + $0x1c0] ss:$16 sps:$4 sm:$0xff]   ;;  %v69_v6 = vpack.c.bf16 %v50_v63, %v49_v62 }
  0x3f   :  { %490 = vmatpush2.bf16.msra.mxu0 %v6669_v1  ;;  %643 = vmatpush2.bf16.msra.mxu1 %v6670_v2  ;;  %v6728_v1 = vld [vmem:[%s10298_s3 + $0x3c0] ss:$16 sps:$4 sm:$0xff]   ;;  %v6733_v2 = vld [vmem:[%s10298_s3 + $0x1a4] ss:$16 sps:$4 sm:$0xff]  }
  0x40   :  { %2815 = vmatprep.subr.bf16.mxu0 %v6673_v7  ;;  %2888 = vmatprep.subr.bf16.mxu1 %v6676_v8  ;;  %v6739_v7 = vld [vmem:[%s10298_s3 + $0x184] ss:$16 sps:$4 sm:$0xff]  }
  0x41   :  { %v51_v8 = vld [vmem:[%s10297_s0 + $0x90] sm:$0xff] }
  0x42   :  { %492 = vmatmul.mubr.bf16.vlgmr.msra.gmra.mxu0 %v61_v9  ;;  %645 = vmatmul.mubr.bf16.vlgmr.msra.gmra.mxu1 %v61_v9  ;;  %v52_v9 = vld [vmem:[%s10297_s0 + $0x98] sm:$0xff] }
  0x43   :  { %501 = vmatprep.mubr.bf16.mxu0 %v7841_v10  ;;  %654 = vmatprep.mubr.bf16.mxu1 %v7841_v10 }
  0x44   :  { %2816 = vmatpush1.bf16.msra.mxu0 %v6671_v11  ;;  %2889 = vmatpush1.bf16.msra.mxu1 %v6674_v12  ;;  %v70_v11 = vpack.c.bf16 %v52_v9, %v51_v8  ;;  %v53_v12 = vld [vmem:[%s10297_s0 + $0xa0] sm:$0xff] }
  0x45   :  { %2817 = vmatprep.subr.bf16.mxu0 %v6679_v15  ;;  %2890 = vmatprep.subr.bf16.mxu1 %v6682_v16  ;;  %v71_v14 = vpack.c.bf16 %v54_v13, %v53_v12  ;;  %v55_v15 = vld [vmem:[%s10297_s0 + $0xb0] sm:$0xff]  ;;  %v56_v16 = vld [vmem:[%s10297_s0 + $0xb8] sm:$0xff] }
  0x46   :  { %v72_v17 = vpack.c.bf16 %v56_v16, %v55_v15 }
  0x48   :  { %2818 = vmatpush1.bf16.msra.mxu0 %v6677_v19  ;;  %2891 = vmatpush1.bf16.msra.mxu1 %v6680_v20  ;;  %v58_v19 = vld [vmem:[%s10297_s0 + $0xc8] sm:$0xff]  ;;  %v6740_v20 = vld [vmem:[%s10298_s3 + $0x380] ss:$16 sps:$4 sm:$0xff]  }
  0x49   :  { %2819 = vmatprep.subr.bf16.mxu0 %v6685_v21  ;;  %2892 = vmatprep.subr.bf16.mxu1 %v6688_v22  ;;  %v6742_v21 = vld [vmem:[%s10298_s3 + $0x384] ss:$16 sps:$4 sm:$0xff]   ;;  %v73_v22 = vpack.c.bf16 %v58_v19, %v57_v18 }
  0x4a   :  { %502 = vmatmul.mubr.bf16.gmra.mxu0 %v63_v23  ;;  %655 = vmatmul.mubr.bf16.gmra.mxu1 %v63_v23  ;;  %v6745_v23 = vld [vmem:[%s10298_s3 + $0x164] ss:$16 sps:$4 sm:$0xff]  }
  0x4b   :  { %511 = vmatprep.mubr.bf16.mxu0 %v7881_v24  ;;  %664 = vmatprep.mubr.bf16.mxu1 %v7881_v24 }
  0x4c   :  { %2820 = vmatpush1.bf16.msra.mxu0 %v6683_v25  ;;  %2893 = vmatpush1.bf16.msra.mxu1 %v6686_v26  ;;  %v59_v25 = vld [vmem:[%s10297_s0 + $0xd0] sm:$0xff]  ;;  %v60_v26 = vld [vmem:[%s10297_s0 + $0xd8] sm:$0xff] }
  0x4d   :  { %2821 = vmatprep.subr.bf16.mxu0 %v6691_v27  ;;  %2894 = vmatprep.subr.bf16.mxu1 %v6694_v28  ;;  %v6751_v27 = vld [vmem:[%s10298_s3 + $0x144] ss:$16 sps:$4 sm:$0xff]   ;;  %v6749_v28 = vld [vmem:[%s10298_s3 + $0x140] ss:$16 sps:$4 sm:$0xff]  }
  0x50   :  { %2822 = vmatpush1.bf16.msra.mxu0 %v6689_v31  ;;  %2895 = vmatpush1.bf16.msra.mxu1 %v6692_v32  ;;  %v74_v31 = vpack.c.bf16 %v60_v26, %v59_v25  ;;  %v6757_v32 = vld [vmem:[%s10298_s3 + $0x124] ss:$16 sps:$4 sm:$0xff]  }
  0x51   :  { %2823 = vmatprep.subr.bf16.mxu0 %v6697_v33  ;;  %2896 = vmatprep.subr.bf16.mxu1 %v6700_v34  ;;  %v6755_v33 = vld [vmem:[%s10298_s3 + $0x120] ss:$16 sps:$4 sm:$0xff]   ;;  %v6754_v34 = vld [vmem:[%s10298_s3 + $0x344] ss:$16 sps:$4 sm:$0xff]  }
  0x52   :  { %512 = vmatmul.mubr.bf16.gmra.mxu0 %v7771_v50  ;;  %665 = vmatmul.mubr.bf16.gmra.mxu1 %v7771_v50  ;;  %v6718_v50 = vld [vmem:[%s10298_s3 + $0x204] ss:$16 sps:$4 sm:$0xff]  }
  0x53   :  { %521 = vmatprep.mubr.bf16.mxu0 %v7915_v35  ;;  %674 = vmatprep.mubr.bf16.mxu1 %v7915_v35 }
  0x54   :  { %2824 = vmatpush1.bf16.msra.mxu0 %v6695_v36  ;;  %2897 = vmatpush1.bf16.msra.mxu1 %v6698_v37  ;;  %v6752_v36 = vld [vmem:[%s10298_s3 + $0x340] ss:$16 sps:$4 sm:$0xff]  }
  0x55   :  { %2825 = vmatprep.subr.bf16.mxu0 %v6703_v38  ;;  %2898 = vmatprep.subr.bf16.mxu1 %v6706_v39  ;;  %v6758_v37 = vld [vmem:[%s10298_s3 + $0x100] ss:$16 sps:$4 sm:$0xff]   ;;  %v6763_v39 = vld [vmem:[%s10298_s3 + $0x324] ss:$16 sps:$4 sm:$0xff]  }
  0x56   :  { %v6761_v38 = vld [vmem:[%s10298_s3 + $0x320] ss:$16 sps:$4 sm:$0xff]  }
  0x58   :  { %2826 = vmatpush1.bf16.msra.mxu0 %v6701_v42  ;;  %2899 = vmatpush1.bf16.msra.mxu1 %v6704_v43  ;;  %v6767_v42 = vld [vmem:[%s10298_s3 + $0x300] ss:$16 sps:$4 sm:$0xff]   ;;  %v6778_v43 = vld [vmem:[%s10298_s3 + $0x6e4] ss:$16 sps:$4 sm:$0xff]  }
  0x59   :  { %2827 = vmatprep.subr.bf16.mxu0 %v6709_v44  ;;  %2900 = vmatprep.subr.bf16.mxu1 %v6712_v45 }
  0x5a   :  { %522 = vmatmul.mubr.bf16.gmra.mxu0 %v7841_v10  ;;  %675 = vmatmul.mubr.bf16.gmra.mxu1 %v7841_v10  ;;  %v6737_v10 = vld [vmem:[%s10298_s3 + $0x180] ss:$16 sps:$4 sm:$0xff]  }
  0x5b   :  { %531 = vmatprep.mubr.bf16.mxu0 %v7957_v48  ;;  %684 = vmatprep.mubr.bf16.mxu1 %v7957_v48 }
  0x5c   :  { %2828 = vmatpush1.bf16.msra.mxu0 %v6707_v46  ;;  %2901 = vmatpush1.bf16.msra.mxu1 %v6710_v47 }
  0x5d   :  { %2829 = vmatprep.subr.bf16.mxu0 %v6715_v49  ;;  %2902 = vmatprep.subr.bf16.mxu1 %v6718_v50  ;;  %v839_v50 = vlaneseq }
  0x60   :  { %2830 = vmatpush1.bf16.msra.mxu0 %v6713_v53  ;;  %2903 = vmatpush1.bf16.msra.mxu1 %v6716_v54  ;;  %v8125_v53 = vshrl.u32 %v839_v50, 7  ;;  %v6773_v50 = vld [vmem:[%s10298_s3 + $0x4a0] ss:$16 sps:$4 sm:$0xff]  }
  0x61   :  { %2831 = vmatprep.subr.bf16.mxu0 %v6721_v55  ;;  %2904 = vmatprep.subr.bf16.mxu1 %v6724_v56 }
  0x62   :  { %532 = vmatmul.mubr.bf16.gmra.mxu0 %v7881_v24  ;;  %685 = vmatmul.mubr.bf16.gmra.mxu1 %v7881_v24  ;;  %v6743_v24 = vld [vmem:[%s10298_s3 + $0x160] ss:$16 sps:$4 sm:$0xff]   ;;  %10316 = vst [vmem:[#allocation2_spill] sm:$0xff] %v8125_v53  ;;  %v8128_v56 = vsub.s32 1, %v8125_v53  ;;  %v8131_v63 = vsub.s32 0, %v8125_v53 }
  0x63   :  { %541 = vmatprep.mubr.bf16.mxu0 %v68_v59  ;;  %694 = vmatprep.mubr.bf16.mxu1 %v68_v59 }
  0x64   :  { %2832 = vmatpush2.bf16.msra.mxu0 %v6719_v57  ;;  %2905 = vmatpush2.bf16.msra.mxu1 %v6722_v58 }
  0x65   :  { %2833 = vmatprep.subr.bf16.mxu0 %v6727_v60  ;;  %2906 = vmatprep.subr.bf16.mxu1 %v6730_v61 }
  0x68   :  { %2834 = vmatpush2.bf16.msra.mxu0 %v6725_v0  ;;  %2907 = vmatpush2.bf16.msra.mxu1 %v6728_v1 }
  0x69   :  { %2835 = vmatprep.subr.bf16.mxu0 %v6733_v2  ;;  %2908 = vmatprep.subr.bf16.mxu1 %v6736_v3  ;;  %v837_v2 = vld [vmem:[%s10299_s2] sm:$0x3] }
  0x6a   :  { %542 = vmatmul.mubr.bf16.gmra.mxu0 %v7915_v35  ;;  %695 = vmatmul.mubr.bf16.gmra.mxu1 %v7915_v35  ;;  %v6760_v35 = vld [vmem:[%s10298_s3 + $0x104] ss:$16 sps:$4 sm:$0xff]   ;;  %v8140_v13 = vrot.slane %v837_v2, %v8131_v63 }
  0x6b   :  { %551 = vmatprep.mubr.bf16.mxu0 %v69_v6  ;;  %704 = vmatprep.mubr.bf16.mxu1 %v69_v6 }
  0x6c   :  { %2836 = vmatpush2.bf16.msra.mxu0 %v6731_v4  ;;  %2909 = vmatpush2.bf16.msra.mxu1 %v6734_v5  ;;  %v8137_v5 = vrot.slane %v837_v2, %v8128_v56  ;;  %v6779_v2 = vld [vmem:[%s10298_s3 + $0x480] ss:$16 sps:$4 sm:$0xff]  }
  0x6d   :  { %2837 = vmatprep.subr.bf16.mxu0 %v6739_v7  ;;  %2910 = vmatprep.subr.bf16.mxu1 %v6742_v21 }
  0x70   :  { %2838 = vmatpush2.bf16.msra.mxu0 %v6737_v10  ;;  %2911 = vmatpush2.bf16.msra.mxu1 %v6740_v20 }
  0x71   :  { %2839 = vmatprep.subr.bf16.mxu0 %v6745_v23  ;;  %2912 = vmatprep.subr.bf16.mxu1 %v6748_v30 }
  0x72   :  { %552 = vmatmul.mubr.bf16.gmra.mxu0 %v7957_v48  ;;  %705 = vmatmul.mubr.bf16.gmra.mxu1 %v7957_v48 }
  0x73   :  { %561 = vmatprep.mubr.bf16.mxu0 %v70_v11  ;;  %714 = vmatprep.mubr.bf16.mxu1 %v70_v11 }
  0x74   :  { %2840 = vmatpush2.bf16.msra.mxu0 %v6743_v24  ;;  %2913 = vmatpush2.bf16.msra.mxu1 %v6746_v29 }
  0x75   :  { %2841 = vmatprep.subr.bf16.mxu0 %v6751_v27  ;;  %2914 = vmatprep.subr.bf16.mxu1 %v6754_v34 }
  0x78   :  { %2842 = vmatpush2.bf16.msra.mxu0 %v6749_v28  ;;  %2915 = vmatpush2.bf16.msra.mxu1 %v6752_v36  ;;  %v6764_v28 = vld [vmem:[%s10298_s3 + $0x4e0] ss:$16 sps:$4 sm:$0xff]  }
  0x79   :  { %2843 = vmatprep.subr.bf16.mxu0 %v6757_v32  ;;  %2916 = vmatprep.subr.bf16.mxu1 %v6763_v39  ;;  %v6772_v32 = vld [vmem:[%s10298_s3 + $0x4c4] ss:$16 sps:$4 sm:$0xff]   ;;  %v6770_v39 = vld [vmem:[%s10298_s3 + $0x4c0] ss:$16 sps:$4 sm:$0xff]  }
  0x7a   :  { %562 = vmatmul.mubr.bf16.gmra.mxu0 %v68_v59  ;;  %715 = vmatmul.mubr.bf16.gmra.mxu1 %v68_v59 }
  0x7b   :  { %571 = vmatprep.mubr.bf16.mxu0 %v71_v14  ;;  %724 = vmatprep.mubr.bf16.mxu1 %v71_v14 }
  0x7c   :  { %2844 = vmatpush2.bf16.msra.mxu0 %v6755_v33  ;;  %2917 = vmatpush2.bf16.msra.mxu1 %v6761_v38 }
  0x7d   :  { %2845 = vmatprep.subr.bf16.mxu0 %v6760_v35  ;;  %2918 = vmatprep.subr.bf16.mxu1 %v6769_v41 }
  0x80   :  { %2846 = vmatpush2.bf16.msra.mxu0 %v6758_v37  ;;  %2919 = vmatpush2.bf16.msra.mxu1 %v6767_v42 }
  0x81   :  { %2961 = vmatprep.subr.bf16.mxu0 %v6766_v40  ;;  %3034 = vmatprep.subr.bf16.mxu1 %v6778_v43  ;;  %v6775_v43 = vld [vmem:[%s10298_s3 + $0x4a4] ss:$16 sps:$4 sm:$0xff]  }
  0x82   :  { %572 = vmatmul.mubr.bf16.gmra.mxu0 %v69_v6  ;;  %725 = vmatmul.mubr.bf16.gmra.mxu1 %v69_v6 }
  0x83   :  { %581 = vmatprep.mubr.bf16.mxu0 %v72_v17  ;;  %734 = vmatprep.mubr.bf16.mxu1 %v72_v17 }
  0x8a   :  { %582 = vmatmul.mubr.bf16.gmra.mxu0 %v70_v11  ;;  %735 = vmatmul.mubr.bf16.gmra.mxu1 %v70_v11 }
  0x8b   :  { %591 = vmatprep.mubr.bf16.mxu0 %v73_v22  ;;  %744 = vmatprep.mubr.bf16.mxu1 %v73_v22 }
  0x92   :  { %592 = vmatmul.mubr.bf16.gmra.mxu0 %v71_v14  ;;  %745 = vmatmul.mubr.bf16.gmra.mxu1 %v71_v14 }
  0x93   :  { %601 = vmatprep.mubr.bf16.mxu0 %v74_v31  ;;  %754 = vmatprep.mubr.bf16.mxu1 %v74_v31 }
  0x9a   :  { %602 = vmatmul.mubr.bf16.gmra.mxu0 %v72_v17  ;;  %755 = vmatmul.mubr.bf16.gmra.mxu1 %v72_v17 }
 0x102   :  { %v493_v44 = vpop.f32.mrf.mxu0  ;;  %v646_v45 = vpop.f32.mrf.mxu1 }
 0x104   :  { %v495_v46 = vpop.f32.mrf.mxu0  ;;  %v648_v47 = vpop.f32.mrf.mxu1 }
 0x106   :  { %v497_v48 = vpop.f32.mrf.mxu0  ;;  %v650_v49 = vpop.f32.mrf.mxu1 }
 0x107   :  { %v765_v61 = vmax.f32 %v493_v44, %v497_v48  ;;  %v767_v62 = vmax.f32 %v646_v45, %v650_v49 }
 0x108   :  { %v499_v51 = vpop.f32.mrf.mxu0  ;;  %v652_v52 = vpop.f32.mrf.mxu1 }
 0x109   :  { %v766_v59 = vmax.f32 %v495_v46, %v499_v51  ;;  %v768_v60 = vmax.f32 %v648_v47, %v652_v52  ;;  %v813_v12 = vmax.f32 %v765_v61, %v767_v62  ;;  %v6776_v51 = vld [vmem:[%s10298_s3 + $0x6e0] ss:$16 sps:$4 sm:$0xff]  }
 0x10a   :  { %v503_v54 = vpop.f32.mrf.mxu0  ;;  %v656_v55 = vpop.f32.mrf.mxu1 }
 0x10b   :  { %v814_v8 = vmax.f32 %v766_v59, %v768_v60  ;;  %v849_v22 = vadd.f32 %v8140_v13, %v813_v12 }
 0x10c   :  { %v505_v57 = vpop.f32.mrf.mxu0  ;;  %v658_v58 = vpop.f32.mrf.mxu1 }
 0x10d   :  { %v850_v20 = vadd.f32 %v8137_v5, %v814_v8  ;;  %v6787_v8 = vld [vmem:[%s10298_s3 + $0x464] ss:$16 sps:$4 sm:$0xff]  }
 0x10e   :  { %v507_v0 = vpop.f32.mrf.mxu0  ;;  %v660_v1 = vpop.f32.mrf.mxu1 }
 0x10f   :  { %v769_v3 = vmax.f32 %v503_v54, %v507_v0  ;;  %v771_v4 = vmax.f32 %v656_v55, %v660_v1 }
 0x110   :  { %v509_v6 = vpop.f32.mrf.mxu0  ;;  %v662_v7 = vpop.f32.mrf.mxu1 }
 0x111   :  { %v815_v9 = vmax.f32 %v769_v3, %v771_v4  ;;  %v770_v10 = vmax.f32 %v505_v57, %v509_v6  ;;  %v772_v11 = vmax.f32 %v658_v58, %v662_v7  ;;  %v6781_v57 = vld [vmem:[%s10298_s3 + $0x484] ss:$16 sps:$4 sm:$0xff]   ;;  %v6782_v3 = vld [vmem:[%s10298_s3 + $0x6c0] ss:$16 sps:$4 sm:$0xff]  }
 0x112   :  { %v513_v14 = vpop.f32.mrf.mxu0  ;;  %v666_v15 = vpop.f32.mrf.mxu1  ;;  %v6784_v58 = vld [vmem:[%s10298_s3 + $0x6c4] ss:$16 sps:$4 sm:$0xff]  }
 0x113   :  { %v816_v16 = vmax.f32 %v770_v10, %v772_v11  ;;  %v851_v17 = vadd.f32 %v8140_v13, %v815_v9  ;;  %v6790_v9 = vld [vmem:[%s10298_s3 + $0x6a4] ss:$16 sps:$4 sm:$0xff]  }
 0x114   :  { %v515_v18 = vpop.f32.mrf.mxu0  ;;  %v668_v19 = vpop.f32.mrf.mxu1 }
 0x115   :  { %v852_v21 = vadd.f32 %v8137_v5, %v816_v16  ;;  %v8151_v29 = vpack.c.bf16 %v851_v17, %v849_v22  ;;  %v6793_v22 = vld [vmem:[%s10298_s3 + $0x444] ss:$16 sps:$4 sm:$0xff]  }
 0x116   :  { %v517_v23 = vpop.f32.mrf.mxu0  ;;  %v670_v24 = vpop.f32.mrf.mxu1 }
 0x117   :  { %v773_v25 = vmax.f32 %v513_v14, %v517_v23  ;;  %v775_v26 = vmax.f32 %v666_v15, %v670_v24  ;;  %v8146_v27 = vpack.c.bf16 %v852_v21, %v850_v20  ;;  %v6796_v23 = vld [vmem:[%s10298_s3 + $0x684] ss:$16 sps:$4 sm:$0xff]  }
 0x118   :  { %v519_v30 = vpop.f32.mrf.mxu0  ;;  %v672_v31 = vpop.f32.mrf.mxu1 }
 0x119   :  { %v817_v33 = vmax.f32 %v773_v25, %v775_v26  ;;  %v774_v34 = vmax.f32 %v515_v18, %v519_v30  ;;  %v776_v35 = vmax.f32 %v668_v19, %v672_v31  ;;  %2847 = vmatprep.mubr.bf16.mxu0 %v8146_v27  ;;  %v6788_v18 = vld [vmem:[%s10298_s3 + $0x6a0] ss:$16 sps:$4 sm:$0xff]  }
 0x11a   :  { %v523_v36 = vpop.f32.mrf.mxu0  ;;  %v676_v37 = vpop.f32.mrf.mxu1  ;;  %2848 = vmatmul.mubr.bf16.vlgmr.msra.gmra.mxu0 %v8151_v29 }
 0x11b   :  { %v818_v38 = vmax.f32 %v774_v34, %v776_v35  ;;  %2962 = vmatpush1.bf16.msra.mxu0 %v6764_v28  ;;  %v853_v40 = vadd.f32 %v8140_v13, %v817_v33  ;;  %v6794_v33 = vld [vmem:[%s10298_s3 + $0x680] ss:$16 sps:$4 sm:$0xff]  }
 0x11c   :  { %v525_v41 = vpop.f32.mrf.mxu0  ;;  %v678_v42 = vpop.f32.mrf.mxu1  ;;  %2963 = vmatprep.subr.bf16.mxu0 %v6772_v32  ;;  %v6791_v32 = vld [vmem:[%s10298_s3 + $0x440] ss:$16 sps:$4 sm:$0xff]  }
 0x11d   :  { %v854_v44 = vadd.f32 %v8137_v5, %v818_v38  ;;  %v8174_v52 = vpack.c.bf16 %v853_v40, %v851_v17  ;;  %v6785_v17 = vld [vmem:[%s10298_s3 + $0x460] ss:$16 sps:$4 sm:$0xff]   ;;  %v6802_v38 = vld [vmem:[%s10298_s3 + $0x664] ss:$16 sps:$4 sm:$0xff]  }
 0x11e   :  { %v527_v45 = vpop.f32.mrf.mxu0  ;;  %v680_v46 = vpop.f32.mrf.mxu1 }
 0x11f   :  { %v777_v47 = vmax.f32 %v523_v36, %v527_v45  ;;  %v779_v48 = vmax.f32 %v676_v37, %v680_v46  ;;  %2964 = vmatpush1.bf16.msra.mxu0 %v6770_v39  ;;  %v8166_v49 = vpack.c.bf16 %v854_v44, %v852_v21  ;;  %v6799_v37 = vld [vmem:[%s10298_s3 + $0x424] ss:$16 sps:$4 sm:$0xff]   ;;  %v6797_v45 = vld [vmem:[%s10298_s3 + $0x420] ss:$16 sps:$4 sm:$0xff]  }
 0x120   :  { %v529_v54 = vpop.f32.mrf.mxu0  ;;  %v682_v55 = vpop.f32.mrf.mxu1  ;;  %2965 = vmatprep.subr.bf16.mxu0 %v6775_v43  ;;  %v6800_v46 = vld [vmem:[%s10298_s3 + $0x660] ss:$16 sps:$4 sm:$0xff]  }
 0x121   :  { %v819_v59 = vmax.f32 %v777_v47, %v779_v48  ;;  %v778_v60 = vmax.f32 %v525_v41, %v529_v54  ;;  %v780_v61 = vmax.f32 %v678_v42, %v682_v55  ;;  %2920 = vmatprep.mubr.bf16.mxu1 %v8166_v49  ;;  %v6808_v54 = vld [vmem:[%s10298_s3 + $0x644] ss:$16 sps:$4 sm:$0xff]  }
 0x122   :  { %v533_v62 = vpop.f32.mrf.mxu0  ;;  %v686_v0 = vpop.f32.mrf.mxu1  ;;  %2921 = vmatmul.mubr.bf16.vlgmr.msra.gmra.mxu1 %v8174_v52 }
 0x123   :  { %v820_v1 = vmax.f32 %v778_v60, %v780_v61  ;;  %2966 = vmatpush1.bf16.msra.mxu0 %v6773_v50  ;;  %3035 = vmatpush1.bf16.msra.mxu1 %v6776_v51  ;;  %v855_v4 = vadd.f32 %v8140_v13, %v819_v59  ;;  %v6805_v51 = vld [vmem:[%s10298_s3 + $0x404] ss:$16 sps:$4 sm:$0xff]  }
 0x124   :  { %v535_v6 = vpop.f32.mrf.mxu0  ;;  %v688_v7 = vpop.f32.mrf.mxu1  ;;  %2967 = vmatprep.subr.bf16.mxu0 %v6781_v57  ;;  %3036 = vmatprep.subr.bf16.mxu1 %v6784_v58 }
 0x125   :  { %v856_v10 = vadd.f32 %v8137_v5, %v820_v1  ;;  %v8206_v19 = vpack.c.bf16 %v855_v4, %v853_v40 }
 0x126   :  { %v537_v11 = vpop.f32.mrf.mxu0  ;;  %v690_v12 = vpop.f32.mrf.mxu1 }
 0x127   :  { %v781_v14 = vmax.f32 %v533_v62, %v537_v11  ;;  %v783_v15 = vmax.f32 %v686_v0, %v690_v12  ;;  %2968 = vmatpush1.bf16.msra.mxu0 %v6779_v2  ;;  %3037 = vmatpush1.bf16.msra.mxu1 %v6782_v3  ;;  %v8198_v16 = vpack.c.bf16 %v856_v10, %v854_v44  ;;  %v6803_v62 = vld [vmem:[%s10298_s3 + $0x400] ss:$16 sps:$4 sm:$0xff]  }
 0x128   :  { %v539_v20 = vpop.f32.mrf.mxu0  ;;  %v692_v21 = vpop.f32.mrf.mxu1  ;;  %2969 = vmatprep.subr.bf16.mxu0 %v6787_v8  ;;  %3038 = vmatprep.subr.bf16.mxu1 %v6790_v9  ;;  %v6806_v0 = vld [vmem:[%s10298_s3 + $0x640] ss:$16 sps:$4 sm:$0xff]  }
 0x129   :  { %v821_v24 = vmax.f32 %v781_v14, %v783_v15  ;;  %v782_v25 = vmax.f32 %v535_v6, %v539_v20  ;;  %v784_v26 = vmax.f32 %v688_v7, %v692_v21  ;;  %2857 = vmatprep.mubr.bf16.mxu0 %v8198_v16  ;;  %v6814_v6 = vld [vmem:[%s10298_s3 + $0x624] ss:$16 sps:$4 sm:$0xff]   ;;  %v6809_v14 = vld [vmem:[%s10298_s3 + $0x5e0] ss:$16 sps:$4 sm:$0xff]  }
 0x12a   :  { %v543_v28 = vpop.f32.mrf.mxu0  ;;  %v696_v30 = vpop.f32.mrf.mxu1  ;;  %2858 = vmatmul.mubr.bf16.gmra.mxu0 %v8206_v19  ;;  %v6812_v15 = vld [vmem:[%s10298_s3 + $0x620] ss:$16 sps:$4 sm:$0xff]   ;;  %v6817_v21 = vld [vmem:[%s10298_s3 + $0x5c4] ss:$16 sps:$4 sm:$0xff]  }
 0x12b   :  { %v822_v31 = vmax.f32 %v782_v25, %v784_v26  ;;  %2970 = vmatpush1.bf16.msra.mxu0 %v6785_v17  ;;  %3039 = vmatpush1.bf16.msra.mxu1 %v6788_v18  ;;  %v857_v34 = vadd.f32 %v8140_v13, %v821_v24 }
 0x12c   :  { %v545_v35 = vpop.f32.mrf.mxu0  ;;  %v698_v36 = vpop.f32.mrf.mxu1  ;;  %2971 = vmatprep.subr.bf16.mxu0 %v6793_v22  ;;  %3040 = vmatprep.subr.bf16.mxu1 %v6796_v23  ;;  %v6820_v22 = vld [vmem:[%s10298_s3 + $0x604] ss:$16 sps:$4 sm:$0xff]  }
 0x12d   :  { %v858_v39 = vadd.f32 %v8137_v5, %v822_v31  ;;  %v8238_v47 = vpack.c.bf16 %v857_v34, %v855_v4  ;;  %v6811_v4 = vld [vmem:[%s10298_s3 + $0x5e4] ss:$16 sps:$4 sm:$0xff]   ;;  %v6815_v31 = vld [vmem:[%s10298_s3 + $0x5c0] ss:$16 sps:$4 sm:$0xff]  }
 0x12e   :  { %v547_v40 = vpop.f32.mrf.mxu0  ;;  %v700_v41 = vpop.f32.mrf.mxu1 }
 0x12f   :  { %v785_v42 = vmax.f32 %v543_v28, %v547_v40  ;;  %v787_v43 = vmax.f32 %v696_v30, %v700_v41  ;;  %2972 = vmatpush1.bf16.msra.mxu0 %v6791_v32  ;;  %3041 = vmatpush1.bf16.msra.mxu1 %v6794_v33  ;;  %v8230_v44 = vpack.c.bf16 %v858_v39, %v856_v10  ;;  %v6818_v32 = vld [vmem:[%s10298_s3 + $0x600] ss:$16 sps:$4 sm:$0xff]  }
 0x130   :  { %v549_v48 = vpop.f32.mrf.mxu0  ;;  %v702_v50 = vpop.f32.mrf.mxu1  ;;  %2973 = vmatprep.subr.bf16.mxu0 %v6799_v37  ;;  %3042 = vmatprep.subr.bf16.mxu1 %v6802_v38  ;;  %v6826_v37 = vld [vmem:[%s10298_s3 + $0x7e4] ss:$16 sps:$4 sm:$0xff]  }
 0x131   :  { %v823_v55 = vmax.f32 %v785_v42, %v787_v43  ;;  %v786_v57 = vmax.f32 %v545_v35, %v549_v48  ;;  %v788_v58 = vmax.f32 %v698_v36, %v702_v50  ;;  %2930 = vmatprep.mubr.bf16.mxu1 %v8230_v44  ;;  %v6823_v36 = vld [vmem:[%s10298_s3 + $0x5a4] ss:$16 sps:$4 sm:$0xff]  }
 0x132   :  { %v553_v59 = vpop.f32.mrf.mxu0  ;;  %v706_v60 = vpop.f32.mrf.mxu1  ;;  %2931 = vmatmul.mubr.bf16.gmra.mxu1 %v8238_v47 }
 0x133   :  { %v824_v61 = vmax.f32 %v786_v57, %v788_v58  ;;  %2974 = vmatpush1.bf16.msra.mxu0 %v6797_v45  ;;  %3043 = vmatpush1.bf16.msra.mxu1 %v6800_v46  ;;  %v859_v1 = vadd.f32 %v8140_v13, %v823_v55  ;;  %v6821_v45 = vld [vmem:[%s10298_s3 + $0x5a0] ss:$16 sps:$4 sm:$0xff]   ;;  %v6832_v55 = vld [vmem:[%s10298_s3 + $0x7c4] ss:$16 sps:$4 sm:$0xff]  }
 0x134   :  { %v555_v2 = vpop.f32.mrf.mxu0  ;;  %v708_v3 = vpop.f32.mrf.mxu1  ;;  %2975 = vmatprep.subr.bf16.mxu0 %v6805_v51  ;;  %3044 = vmatprep.subr.bf16.mxu1 %v6808_v54  ;;  %v6824_v46 = vld [vmem:[%s10298_s3 + $0x7e0] ss:$16 sps:$4 sm:$0xff]   ;;  %v6829_v54 = vld [vmem:[%s10298_s3 + $0x584] ss:$16 sps:$4 sm:$0xff]  }
 0x135   :  { %v860_v7 = vadd.f32 %v8137_v5, %v824_v61  ;;  %v8270_v17 = vpack.c.bf16 %v859_v1, %v857_v34 }
 0x136   :  { %v557_v8 = vpop.f32.mrf.mxu0  ;;  %v710_v9 = vpop.f32.mrf.mxu1 }
 0x137   :  { %v8262_v10 = vpack.c.bf16 %v860_v7, %v858_v39  ;;  %v789_v11 = vmax.f32 %v553_v59, %v557_v8  ;;  %v791_v12 = vmax.f32 %v706_v60, %v710_v9  ;;  %2976 = vmatpush1.bf16.msra.mxu0 %v6803_v62  ;;  %3045 = vmatpush1.bf16.msra.mxu1 %v6806_v0  ;;  %v6827_v0 = vld [vmem:[%s10298_s3 + $0x580] ss:$16 sps:$4 sm:$0xff]  }
 0x138   :  { %v559_v18 = vpop.f32.mrf.mxu0  ;;  %v712_v20 = vpop.f32.mrf.mxu1  ;;  %2977 = vmatprep.subr.bf16.mxu0 %v6811_v4  ;;  %3046 = vmatprep.subr.bf16.mxu1 %v6814_v6  ;;  %v6835_v6 = vld [vmem:[%s10298_s3 + $0x564] ss:$16 sps:$4 sm:$0xff]  }
 0x139   :  { %v825_v23 = vmax.f32 %v789_v11, %v791_v12  ;;  %v790_v24 = vmax.f32 %v555_v2, %v559_v18  ;;  %v792_v25 = vmax.f32 %v708_v3, %v712_v20  ;;  %2867 = vmatprep.mubr.bf16.mxu0 %v8262_v10  ;;  %v6833_v18 = vld [vmem:[%s10298_s3 + $0x560] ss:$16 sps:$4 sm:$0xff]  }
 0x13a   :  { %v563_v26 = vpop.f32.mrf.mxu0  ;;  %v716_v28 = vpop.f32.mrf.mxu1  ;;  %2868 = vmatmul.mubr.bf16.gmra.mxu0 %v8270_v17  ;;  %v6836_v20 = vld [vmem:[%s10298_s3 + $0x7a0] ss:$16 sps:$4 sm:$0xff]  }
 0x13b   :  { %v826_v30 = vmax.f32 %v790_v24, %v792_v25  ;;  %2978 = vmatpush2.bf16.msra.mxu0 %v6809_v14  ;;  %3047 = vmatpush1.bf16.msra.mxu1 %v6812_v15  ;;  %v861_v33 = vadd.f32 %v8140_v13, %v825_v23  ;;  %v6841_v24 = vld [vmem:[%s10298_s3 + $0x544] ss:$16 sps:$4 sm:$0xff]  }
 0x13c   :  { %v565_v34 = vpop.f32.mrf.mxu0  ;;  %v718_v35 = vpop.f32.mrf.mxu1  ;;  %2979 = vmatprep.subr.bf16.mxu0 %v6817_v21  ;;  %3048 = vmatprep.subr.bf16.mxu1 %v6820_v22 }
 0x13d   :  { %v862_v38 = vadd.f32 %v8137_v5, %v826_v30  ;;  %v8302_v48 = vpack.c.bf16 %v861_v33, %v859_v1  ;;  %v6830_v1 = vld [vmem:[%s10298_s3 + $0x7c0] ss:$16 sps:$4 sm:$0xff]   ;;  %v6844_v30 = vld [vmem:[%s10298_s3 + $0x784] ss:$16 sps:$4 sm:$0xff]  }
 0x13e   :  { %v567_v39 = vpop.f32.mrf.mxu0  ;;  %v720_v40 = vpop.f32.mrf.mxu1 }
 0x13f   :  { %v793_v41 = vmax.f32 %v563_v26, %v567_v39  ;;  %v795_v42 = vmax.f32 %v716_v28, %v720_v40  ;;  %2980 = vmatpush2.bf16.msra.mxu0 %v6815_v31  ;;  %3049 = vmatpush1.bf16.msra.mxu1 %v6818_v32  ;;  %v8294_v43 = vpack.c.bf16 %v862_v38, %v860_v7  ;;  %v6838_v7 = vld [vmem:[%s10298_s3 + $0x7a4] ss:$16 sps:$4 sm:$0xff]  }
 0x140   :  { %v569_v50 = vpop.f32.mrf.mxu0  ;;  %v722_v51 = vpop.f32.mrf.mxu1  ;;  %2981 = vmatprep.subr.bf16.mxu0 %v6823_v36  ;;  %3050 = vmatprep.subr.bf16.mxu1 %v6826_v37  ;;  %v6847_v39 = vld [vmem:[%s10298_s3 + $0x524] ss:$16 sps:$4 sm:$0xff]  }
 0x141   :  { %v827_v57 = vmax.f32 %v793_v41, %v795_v42  ;;  %v794_v58 = vmax.f32 %v565_v34, %v569_v50  ;;  %v796_v59 = vmax.f32 %v718_v35, %v722_v51  ;;  %2940 = vmatprep.mubr.bf16.mxu1 %v8294_v43  ;;  %v6839_v34 = vld [vmem:[%s10298_s3 + $0x540] ss:$16 sps:$4 sm:$0xff]   ;;  %v6850_v40 = vld [vmem:[%s10298_s3 + $0x764] ss:$16 sps:$4 sm:$0xff]  }
 0x142   :  { %v573_v60 = vpop.f32.mrf.mxu0  ;;  %v726_v61 = vpop.f32.mrf.mxu1  ;;  %2941 = vmatmul.mubr.bf16.gmra.mxu1 %v8302_v48  ;;  %v6842_v35 = vld [vmem:[%s10298_s3 + $0x780] ss:$16 sps:$4 sm:$0xff]  }
 0x143   :  { %v828_v62 = vmax.f32 %v794_v58, %v796_v59  ;;  %2982 = vmatpush2.bf16.msra.mxu0 %v6821_v45  ;;  %3051 = vmatpush2.bf16.msra.mxu1 %v6824_v46  ;;  %v863_v2 = vadd.f32 %v8140_v13, %v827_v57  ;;  %v6845_v50 = vld [vmem:[%s10298_s3 + $0x520] ss:$16 sps:$4 sm:$0xff]   ;;  %v6856_v57 = vld [vmem:[%s10298_s3 + $0x744] ss:$16 sps:$4 sm:$0xff]  }
 0x144   :  { %v575_v3 = vpop.f32.mrf.mxu0  ;;  %v728_v4 = vpop.f32.mrf.mxu1  ;;  %2983 = vmatprep.subr.bf16.mxu0 %v6829_v54  ;;  %3052 = vmatprep.subr.bf16.mxu1 %v6832_v55  ;;  %v6848_v51 = vld [vmem:[%s10298_s3 + $0x760] ss:$16 sps:$4 sm:$0xff]   ;;  %v6853_v55 = vld [vmem:[%s10298_s3 + $0x504] ss:$16 sps:$4 sm:$0xff]  }
 0x145   :  { %v864_v8 = vadd.f32 %v8137_v5, %v828_v62  ;;  %v8334_v21 = vpack.c.bf16 %v863_v2, %v861_v33  ;;  %v6859_v62 = vld [vmem:[%s10298_s3 + $0x724] ss:$16 sps:$4 sm:$0xff]  }
 0x146   :  { %v577_v9 = vpop.f32.mrf.mxu0  ;;  %v730_v11 = vpop.f32.mrf.mxu1 }
 0x147   :  { %v8326_v12 = vpack.c.bf16 %v864_v8, %v862_v38  ;;  %v797_v14 = vmax.f32 %v573_v60, %v577_v9  ;;  %v799_v15 = vmax.f32 %v726_v61, %v730_v11  ;;  %2984 = vmatpush2.bf16.msra.mxu0 %v6827_v0  ;;  %3053 = vmatpush2.bf16.msra.mxu1 %v6830_v1  ;;  %v6851_v60 = vld [vmem:[%s10298_s3 + $0x500] ss:$16 sps:$4 sm:$0xff]   ;;  %v6862_v0 = vld [vmem:[%s10298_s3 + $0x8e4] ss:$16 sps:$4 sm:$0xff]  }
 0x148   :  { %v579_v22 = vpop.f32.mrf.mxu0  ;;  %v732_v23 = vpop.f32.mrf.mxu1  ;;  %2985 = vmatprep.subr.bf16.mxu0 %v6835_v6  ;;  %3054 = vmatprep.subr.bf16.mxu1 %v6838_v7  ;;  %v6854_v61 = vld [vmem:[%s10298_s3 + $0x740] ss:$16 sps:$4 sm:$0xff]   ;;  %v6865_v6 = vld [vmem:[%s10298_s3 + $0x704] ss:$16 sps:$4 sm:$0xff]  }
 0x149   :  { %v829_v25 = vmax.f32 %v797_v14, %v799_v15  ;;  %v798_v26 = vmax.f32 %v575_v3, %v579_v22  ;;  %v800_v28 = vmax.f32 %v728_v4, %v732_v23  ;;  %2877 = vmatprep.mubr.bf16.mxu0 %v8326_v12  ;;  %v6857_v3 = vld [vmem:[%s10298_s3 + $0x720] ss:$16 sps:$4 sm:$0xff]   ;;  %v6868_v9 = vld [vmem:[%s10298_s3 + $0x8c4] ss:$16 sps:$4 sm:$0xff]   ;;  %v6874_v15 = vld [vmem:[%s10298_s3 + $0xec] ss:$16 sps:$4 sm:$0xff]  }
 0x14a   :  { %v8343_v31 = vpop.f32.mrf.mxu0  ;;  %v8345_v32 = vpop.f32.mrf.mxu1  ;;  %2878 = vmatmul.mubr.bf16.gmra.mxu0 %v8334_v21  ;;  %v6860_v4 = vld [vmem:[%s10298_s3 + $0x8e0] ss:$16 sps:$4 sm:$0xff]  }
 0x14b   :  { %v830_v33 = vmax.f32 %v798_v26, %v800_v28  ;;  %2986 = vmatpush2.bf16.msra.mxu0 %v6833_v18  ;;  %3055 = vmatpush2.bf16.msra.mxu1 %v6836_v20  ;;  %v8355_v36 = vadd.f32 %v8140_v13, %v829_v25  ;;  %v6863_v11 = vld [vmem:[%s10298_s3 + $0x700] ss:$16 sps:$4 sm:$0xff]   ;;  %v6872_v26 = vld [vmem:[%s10298_s3 + $0xe8] ss:$16 sps:$4 sm:$0xff]  }
 0x14c   :  { %2993 = vmatprep.mubr.bf16.mxu0 %v8198_v16  ;;  %v8358_v37 = vpop.f32.mrf.mxu0  ;;  %v8360_v38 = vpop.f32.mrf.mxu1  ;;  %2987 = vmatprep.subr.bf16.mxu0 %v6841_v24  ;;  %v6866_v14 = vld [vmem:[%s10298_s3 + $0x8c0] ss:$16 sps:$4 sm:$0xff]   ;;  %v6871_v24 = vld [vmem:[%s10298_s3 + $0x8a4] ss:$16 sps:$4 sm:$0xff]  }
 0x14d   :  { %v8369_v41 = vadd.f32 %v8137_v5, %v830_v33  ;;  %3056 = vmatprep.subr.bf16.mxu1 %v6844_v30  ;;  %v8385_v54 = vpack.c.bf16 %v8355_v36, %v863_v2  ;;  %v6869_v25 = vld [vmem:[%s10298_s3 + $0x8a0] ss:$16 sps:$4 sm:$0xff]  }
 0x14e   :  { %v8371_v42 = vpop.f32.mrf.mxu0  ;;  %v8373_v45 = vpop.f32.mrf.mxu1 }
 0x14f   :  { %2988 = vmatpush2.bf16.msra.mxu0 %v6839_v34  ;;  %3057 = vmatpush2.bf16.msra.mxu1 %v6842_v35  ;;  %v8376_v46 = vpack.c.bf16 %v8369_v41, %v864_v8  ;;  %v6877_v34 = vld [vmem:[%s10298_s3 + $0x884] ss:$16 sps:$4 sm:$0xff]   ;;  %v6880_v35 = vld [vmem:[%s10298_s3 + $0xcc] ss:$16 sps:$4 sm:$0xff]  }
 0x150   :  { %2989 = vmatprep.subr.bf16.mxu0 %v6847_v39  ;;  %3058 = vmatprep.subr.bf16.mxu1 %v6850_v40  ;;  %v589_v58 = vpop.f32.mrf.mxu0  ;;  %v742_v59 = vpop.f32.mrf.mxu1  ;;  %v801_v39 = vmax.f32 %v8343_v31, %v8371_v42  ;;  %v803_v40 = vmax.f32 %v8345_v32, %v8373_v45  ;;  %v6883_v31 = vld [vmem:[%s10298_s3 + $0x864] ss:$16 sps:$4 sm:$0xff]   ;;  %v6886_v32 = vld [vmem:[%s10298_s3 + $0xac] ss:$16 sps:$4 sm:$0xff]  }
 0x151   :  { %2950 = vmatprep.mubr.bf16.mxu1 %v8376_v46  ;;  %v802_v22 = vmax.f32 %v8358_v37, %v589_v58  ;;  %v804_v23 = vmax.f32 %v8360_v38, %v742_v59  ;;  %v6884_v58 = vld [vmem:[%s10298_s3 + $0xa8] ss:$16 sps:$4 sm:$0xff]  }
 0x152   :  { %2951 = vmatmul.mubr.bf16.gmra.mxu1 %v8385_v54  ;;  %v8408_v1 = vpop.f32.mrf.mxu0  ;;  %v8410_v2 = vpop.f32.mrf.mxu1  ;;  %v831_v45 = vmax.f32 %v801_v39, %v803_v40  ;;  %v6920_v39 = vld [vmem:[%s10298_s3 + $0x1e8] ss:$16 sps:$4 sm:$0xff]   ;;  %v6925_v40 = vld [vmem:[%s10298_s3 + $0x984] ss:$16 sps:$4 sm:$0xff]  }
 0x153   :  { %2990 = vmatpush2.bf16.msra.mxu0 %v6845_v50  ;;  %3059 = vmatpush2.bf16.msra.mxu1 %v6848_v51  ;;  %v832_v33 = vmax.f32 %v802_v22, %v804_v23  ;;  %v6875_v50 = vld [vmem:[%s10298_s3 + $0x880] ss:$16 sps:$4 sm:$0xff]   ;;  %v6878_v51 = vld [vmem:[%s10298_s3 + $0xc8] ss:$16 sps:$4 sm:$0xff]   ;;  %v6907_v23 = vld [vmem:[%s10298_s3 + $0x9e4] ss:$16 sps:$4 sm:$0xff]  }
 0x154   :  { %3066 = vmatprep.mubr.bf16.mxu1 %v8230_v44  ;;  %2991 = vmatprep.subr.bf16.mxu0 %v6853_v55  ;;  %v595_v7 = vpop.f32.mrf.mxu0  ;;  %v748_v8 = vpop.f32.mrf.mxu1  ;;  %v6902_v22 = vld [vmem:[%s10298_s3 + $0x48] ss:$16 sps:$4 sm:$0xff]  }
 0x155   :  { %3060 = vmatprep.subr.bf16.mxu1 %v6856_v57  ;;  %v868_v55 = vadd.f32 %v8137_v5, %v832_v33  ;;  %v6881_v57 = vld [vmem:[%s10298_s3 + $0x860] ss:$16 sps:$4 sm:$0xff]   ;;  %v6916_v33 = vld [vmem:[%s10298_s3 + $0xc] ss:$16 sps:$4 sm:$0xff]  }
 0x156   :  { %v597_v18 = vpop.f32.mrf.mxu0  ;;  %v750_v20 = vpop.f32.mrf.mxu1 }
 0x157   :  { %2992 = vmatpush2.bf16.msra.mxu0 %v6851_v60  ;;  %3061 = vmatpush2.bf16.msra.mxu1 %v6854_v61  ;;  %v8480_v59 = vpack.c.bf16 %v868_v55, %v8369_v41  ;;  %v6889_v60 = vld [vmem:[%s10298_s3 + $0x844] ss:$16 sps:$4 sm:$0xff]   ;;  %v6892_v61 = vld [vmem:[%s10298_s3 + $0x8c] ss:$16 sps:$4 sm:$0xff]  }
 0x158   :  { %3062 = vmatprep.subr.bf16.mxu1 %v6859_v62  ;;  %3107 = vmatprep.subr.bf16.mxu0 %v6862_v0  ;;  %v599_v28 = vpop.f32.mrf.mxu0  ;;  %v752_v30 = vpop.f32.mrf.mxu1  ;;  %v805_v62 = vmax.f32 %v8408_v1, %v597_v18  ;;  %v807_v0 = vmax.f32 %v8410_v2, %v750_v20  ;;  %v6890_v1 = vld [vmem:[%s10298_s3 + $0x88] ss:$16 sps:$4 sm:$0xff]   ;;  %v6895_v2 = vld [vmem:[%s10298_s3 + $0x824] ss:$16 sps:$4 sm:$0xff]   ;;  %v6899_v20 = vld [vmem:[%s10298_s3 + $0x800] ss:$16 sps:$4 sm:$0xff]  }
 0x159   :  { %v806_v37 = vmax.f32 %v595_v7, %v599_v28  ;;  %v808_v38 = vmax.f32 %v748_v8, %v752_v30  ;;  %v6908_v28 = vld [vmem:[%s10298_s3 + $0x28] ss:$16 sps:$4 sm:$0xff]   ;;  %v6913_v30 = vld [vmem:[%s10298_s3 + $0x9c4] ss:$16 sps:$4 sm:$0xff]  }
 0x15a   :  { %2994 = vmatmul.mubr.bf16.vlgmr.msra.gmra.mxu0 %v8206_v19  ;;  %v833_v7 = vmax.f32 %v805_v62, %v807_v0  ;;  %v6943_v62 = vld [vmem:[%s10298_s3 + $0x924] ss:$16 sps:$4 sm:$0xff]   ;;  %v6946_v0 = vld [vmem:[%s10298_s3 + $0x16c] ss:$16 sps:$4 sm:$0xff]  }
 0x15b   :  { %3003 = vmatprep.mubr.bf16.mxu0 %v8262_v10  ;;  %3063 = vmatpush2.bf16.msra.mxu1 %v6857_v3  ;;  %v834_v42 = vmax.f32 %v806_v37, %v808_v38  ;;  %v867_v3 = vadd.f32 %v8140_v13, %v831_v45  ;;  %v6919_v37 = vld [vmem:[%s10298_s3 + $0x9a4] ss:$16 sps:$4 sm:$0xff]   ;;  %v6917_v38 = vld [vmem:[%s10298_s3 + $0x9a0] ss:$16 sps:$4 sm:$0xff]   ;;  %v6932_v45 = vld [vmem:[%s10298_s3 + $0x1a8] ss:$16 sps:$4 sm:$0xff]  }
 0x15c   :  { %3108 = vmatpush1.bf16.msra.mxu0 %v6860_v4  ;;  %3064 = vmatprep.subr.bf16.mxu1 %v6865_v6  ;;  %v6887_v4 = vld [vmem:[%s10298_s3 + $0x840] ss:$16 sps:$4 sm:$0xff]   ;;  %v6898_v6 = vld [vmem:[%s10298_s3 + $0x6c] ss:$16 sps:$4 sm:$0xff]   ;;  %v8529_v18 = vadd.f32 %v8140_v13, %v833_v7 }
 0x15d   :  { %3109 = vmatprep.subr.bf16.mxu0 %v6868_v9  ;;  %v8495_v41 = vadd.f32 %v8137_v5, %v834_v42  ;;  %v8514_v9 = vpack.c.bf16 %v867_v3, %v8355_v36  ;;  %v6904_v36 = vld [vmem:[%s10298_s3 + $0x4c] ss:$16 sps:$4 sm:$0xff]   ;;  %v6929_v42 = vld [vmem:[%s10298_s3 + $0x960] ss:$16 sps:$4 sm:$0xff]  }
 0x15e   :  { %v6952_v7 = vld [vmem:[%s10298_s3 + $0x14c] ss:$16 sps:$4 sm:$0xff]  }
 0x15f   :  { %3065 = vmatpush2.bf16.msra.mxu1 %v6863_v11  ;;  %v8511_v8 = vpack.c.bf16 %v8495_v41, %v868_v55  ;;  %v6893_v11 = vld [vmem:[%s10298_s3 + $0x820] ss:$16 sps:$4 sm:$0xff]   ;;  %v6926_v55 = vld [vmem:[%s10298_s3 + $0x1c8] ss:$16 sps:$4 sm:$0xff]  }
 0x160   :  { %3110 = vmatpush1.bf16.msra.mxu0 %v6866_v14  ;;  %3180 = vmatprep.subr.bf16.mxu1 %v6874_v15  ;;  %v6896_v14 = vld [vmem:[%s10298_s3 + $0x68] ss:$16 sps:$4 sm:$0xff]   ;;  %v6901_v15 = vld [vmem:[%s10298_s3 + $0x804] ss:$16 sps:$4 sm:$0xff]  }
 0x161   :  { %3111 = vmatprep.subr.bf16.mxu0 %v6871_v24  ;;  %v6910_v24 = vld [vmem:[%s10298_s3 + $0x2c] ss:$16 sps:$4 sm:$0xff]  }
 0x162   :  { %3004 = vmatmul.mubr.bf16.gmra.mxu0 %v8270_v17  ;;  %3067 = vmatmul.mubr.bf16.vlgmr.msra.gmra.mxu1 %v8238_v47 }
 0x163   :  { %3013 = vmatprep.mubr.bf16.mxu0 %v8326_v12  ;;  %3076 = vmatprep.mubr.bf16.mxu1 %v8294_v43 }
 0x164   :  { %3112 = vmatpush1.bf16.msra.mxu0 %v6869_v25  ;;  %3181 = vmatpush1.bf16.msra.mxu1 %v6872_v26  ;;  %v8548_v25 = vpack.c.bf16 %v8529_v18, %v867_v3  ;;  %v6905_v26 = vld [vmem:[%s10298_s3 + $0x9e0] ss:$16 sps:$4 sm:$0xff]   ;;  %v8624_v3 = vpop.f32.mrf.mxu0 }
 0x165   :  { %3113 = vmatprep.subr.bf16.mxu0 %v6877_v34  ;;  %3182 = vmatprep.subr.bf16.mxu1 %v6880_v35  ;;  %v6911_v34 = vld [vmem:[%s10298_s3 + $0x9c0] ss:$16 sps:$4 sm:$0xff]   ;;  %v6914_v35 = vld [vmem:[%s10298_s3 + $0x8] ss:$16 sps:$4 sm:$0xff]  }
 0x168   :  { %3114 = vmatpush1.bf16.msra.mxu0 %v6875_v50  ;;  %3183 = vmatpush1.bf16.msra.mxu1 %v6878_v51  ;;  %v6928_v50 = vld [vmem:[%s10298_s3 + $0x1cc] ss:$16 sps:$4 sm:$0xff]   ;;  %v6923_v51 = vld [vmem:[%s10298_s3 + $0x980] ss:$16 sps:$4 sm:$0xff]  }
 0x169   :  { %3115 = vmatprep.subr.bf16.mxu0 %v6883_v31  ;;  %3184 = vmatprep.subr.bf16.mxu1 %v6886_v32  ;;  %v6931_v31 = vld [vmem:[%s10298_s3 + $0x964] ss:$16 sps:$4 sm:$0xff]   ;;  %v6934_v32 = vld [vmem:[%s10298_s3 + $0x1ac] ss:$16 sps:$4 sm:$0xff]  }
 0x16a   :  { %3014 = vmatmul.mubr.bf16.gmra.mxu0 %v8334_v21  ;;  %3077 = vmatmul.mubr.bf16.gmra.mxu1 %v8302_v48 }
 0x16b   :  { %3023 = vmatprep.mubr.bf16.mxu0 %v8480_v59  ;;  %3086 = vmatprep.mubr.bf16.mxu1 %v8376_v46 }
 0x16c   :  { %3116 = vmatpush1.bf16.msra.mxu0 %v6881_v57  ;;  %3185 = vmatpush1.bf16.msra.mxu1 %v6884_v58  ;;  %v6937_v57 = vld [vmem:[%s10298_s3 + $0x944] ss:$16 sps:$4 sm:$0xff]   ;;  %v6940_v58 = vld [vmem:[%s10298_s3 + $0x18c] ss:$16 sps:$4 sm:$0xff]  }
 0x16d   :  { %3117 = vmatprep.subr.bf16.mxu0 %v6889_v60  ;;  %3186 = vmatprep.subr.bf16.mxu1 %v6892_v61  ;;  %v6935_v60 = vld [vmem:[%s10298_s3 + $0x940] ss:$16 sps:$4 sm:$0xff]   ;;  %v6938_v61 = vld [vmem:[%s10298_s3 + $0x188] ss:$16 sps:$4 sm:$0xff]  }
 0x170   :  { %3118 = vmatpush1.bf16.msra.mxu0 %v6887_v4  ;;  %3187 = vmatpush1.bf16.msra.mxu1 %v6890_v1  ;;  %v8626_v4 = vpop.f32.mrf.mxu1  ;;  %v6941_v1 = vld [vmem:[%s10298_s3 + $0x920] ss:$16 sps:$4 sm:$0xff]  }
 0x171   :  { %3119 = vmatprep.subr.bf16.mxu0 %v6895_v2  ;;  %3188 = vmatprep.subr.bf16.mxu1 %v6898_v6  ;;  %v6944_v2 = vld [vmem:[%s10298_s3 + $0x168] ss:$16 sps:$4 sm:$0xff]   ;;  %v6949_v6 = vld [vmem:[%s10298_s3 + $0x904] ss:$16 sps:$4 sm:$0xff]  }
 0x172   :  { %3024 = vmatmul.mubr.bf16.gmra.mxu0 %v8514_v9  ;;  %3087 = vmatmul.mubr.bf16.gmra.mxu1 %v8385_v54 }
 0x173   :  { %3139 = vmatprep.mubr.bf16.mxu0 %v8262_v10  ;;  %3096 = vmatprep.mubr.bf16.mxu1 %v8511_v8 }
 0x174   :  { %3120 = vmatpush1.bf16.msra.mxu0 %v6893_v11  ;;  %3189 = vmatpush1.bf16.msra.mxu1 %v6896_v14  ;;  %v605_v11 = vpop.f32.mrf.mxu0  ;;  %v758_v14 = vpop.f32.mrf.mxu1 }
 0x175   :  { %3121 = vmatprep.subr.bf16.mxu0 %v6901_v15  ;;  %3190 = vmatprep.subr.bf16.mxu1 %v6904_v36  ;;  %v6947_v15 = vld [vmem:[%s10298_s3 + $0x900] ss:$16 sps:$4 sm:$0xff]   ;;  %v6950_v36 = vld [vmem:[%s10298_s3 + $0x148] ss:$16 sps:$4 sm:$0xff]  }
 0x178   :  { %3122 = vmatpush1.bf16.msra.mxu0 %v6899_v20  ;;  %3191 = vmatpush1.bf16.msra.mxu1 %v6902_v22  ;;  %v6955_v20 = vld [vmem:[%s10298_s3 + $0x12c] ss:$16 sps:$4 sm:$0xff]  }
 0x179   :  { %3123 = vmatprep.subr.bf16.mxu0 %v6907_v23  ;;  %3192 = vmatprep.subr.bf16.mxu1 %v6910_v24  ;;  %v6958_v22 = vld [vmem:[%s10298_s3 + $0x2ec] ss:$16 sps:$4 sm:$0xff]   ;;  %v607_v23 = vpop.f32.mrf.mxu0  ;;  %v760_v24 = vpop.f32.mrf.mxu1 }
 0x17a   :  { %3097 = vmatmul.mubr.bf16.gmra.mxu1 %v8548_v25 }
 0x17b   :  { %3212 = vmatprep.mubr.bf16.mxu1 %v8146_v27  ;;  %v6922_v27 = vld [vmem:[%s10298_s3 + $0x1ec] ss:$16 sps:$4 sm:$0xff]  }
 0x17c   :  { %3124 = vmatpush2.bf16.msra.mxu0 %v6905_v26  ;;  %3193 = vmatpush1.bf16.msra.mxu1 %v6908_v28  ;;  %v6953_v26 = vld [vmem:[%s10298_s3 + $0x128] ss:$16 sps:$4 sm:$0xff]  }
 0x17d   :  { %3125 = vmatprep.subr.bf16.mxu0 %v6913_v30  ;;  %3194 = vmatprep.subr.bf16.mxu1 %v6916_v33  ;;  %v6956_v28 = vld [vmem:[%s10298_s3 + $0x2e8] ss:$16 sps:$4 sm:$0xff]   ;;  %v6961_v30 = vld [vmem:[%s10298_s3 + $0x10c] ss:$16 sps:$4 sm:$0xff]  }
 0x17e   :  { %v6964_v33 = vld [vmem:[%s10298_s3 + $0x2cc] ss:$16 sps:$4 sm:$0xff]  }
 0x180   :  { %3126 = vmatpush2.bf16.msra.mxu0 %v6911_v34  ;;  %3195 = vmatpush1.bf16.msra.mxu1 %v6914_v35  ;;  %v609_v34 = vpop.f32.mrf.mxu0  ;;  %v762_v35 = vpop.f32.mrf.mxu1 }
 0x181   :  { %3127 = vmatprep.subr.bf16.mxu0 %v6919_v37  ;;  %3196 = vmatprep.subr.bf16.mxu1 %v6922_v27  ;;  %v6959_v37 = vld [vmem:[%s10298_s3 + $0x108] ss:$16 sps:$4 sm:$0xff]  }
 0x182   :  { %v6962_v27 = vld [vmem:[%s10298_s3 + $0x2c8] ss:$16 sps:$4 sm:$0xff]  }
 0x184   :  { %3128 = vmatpush2.bf16.msra.mxu0 %v6917_v38  ;;  %3197 = vmatpush2.bf16.msra.mxu1 %v6920_v39  ;;  %v6970_v38 = vld [vmem:[%s10298_s3 + $0x4ec] ss:$16 sps:$4 sm:$0xff]   ;;  %v810_v39 = vmax.f32 %v605_v11, %v609_v34  ;;  %v7007_v34 = vld [vmem:[%s10298_s3 + $0x3c8] ss:$16 sps:$4 sm:$0xff]  }
 0x185   :  { %3129 = vmatprep.subr.bf16.mxu0 %v6925_v40  ;;  %3198 = vmatprep.subr.bf16.mxu1 %v6928_v50  ;;  %v812_v40 = vmax.f32 %v758_v14, %v762_v35  ;;  %v6967_v50 = vld [vmem:[%s10298_s3 + $0x2ac] ss:$16 sps:$4 sm:$0xff]   ;;  %v7010_v35 = vld [vmem:[%s10298_s3 + $0x408] ss:$16 sps:$4 sm:$0xff]  }
 0x186   :  { %v6991_v11 = vld [vmem:[%s10298_s3 + $0x22c] ss:$16 sps:$4 sm:$0xff]  }
 0x188   :  { %3130 = vmatpush2.bf16.msra.mxu0 %v6923_v51  ;;  %3199 = vmatpush2.bf16.msra.mxu1 %v6926_v55  ;;  %v6965_v51 = vld [vmem:[%s10298_s3 + $0x2a8] ss:$16 sps:$4 sm:$0xff]  }
 0x189   :  { %3131 = vmatprep.subr.bf16.mxu0 %v6931_v31  ;;  %3200 = vmatprep.subr.bf16.mxu1 %v6934_v32  ;;  %v6968_v55 = vld [vmem:[%s10298_s3 + $0x4e8] ss:$16 sps:$4 sm:$0xff]   ;;  %v836_v31 = vmax.f32 %v810_v39, %v812_v40  ;;  %v6973_v32 = vld [vmem:[%s10298_s3 + $0x28c] ss:$16 sps:$4 sm:$0xff]  }
 0x18a   :  { %v7021_v39 = vld [vmem:[%s10298_s3 + $0x38c] ss:$16 sps:$4 sm:$0xff]  }
 0x18b   :  { %v7024_v40 = vld [vmem:[%s10298_s3 + $0x5cc] ss:$16 sps:$4 sm:$0xff]  }
 0x18c   :  { %3132 = vmatpush2.bf16.msra.mxu0 %v6929_v42  ;;  %3201 = vmatpush2.bf16.msra.mxu1 %v6932_v45  ;;  %v6976_v42 = vld [vmem:[%s10298_s3 + $0x4cc] ss:$16 sps:$4 sm:$0xff]   ;;  %v809_v45 = vmax.f32 %v8624_v3, %v607_v23  ;;  %v6977_v3 = vld [vmem:[%s10298_s3 + $0x268] ss:$16 sps:$4 sm:$0xff]  }
 0x18d   :  { %3133 = vmatprep.subr.bf16.mxu0 %v6937_v57  ;;  %3202 = vmatprep.subr.bf16.mxu1 %v6940_v58  ;;  %v811_v57 = vmax.f32 %v8626_v4, %v760_v24  ;;  %v6971_v58 = vld [vmem:[%s10298_s3 + $0x288] ss:$16 sps:$4 sm:$0xff]   ;;  %v7003_v24 = vld [vmem:[%s10298_s3 + $0x3ec] ss:$16 sps:$4 sm:$0xff]  }
 0x18e   :  { %v6998_v23 = vld [vmem:[%s10298_s3 + $0x448] ss:$16 sps:$4 sm:$0xff]  }
 0x190   :  { %3134 = vmatpush2.bf16.msra.mxu0 %v6935_v60  ;;  %3203 = vmatpush2.bf16.msra.mxu1 %v6938_v61  ;;  %v6974_v60 = vld [vmem:[%s10298_s3 + $0x4c8] ss:$16 sps:$4 sm:$0xff]   ;;  %v6979_v61 = vld [vmem:[%s10298_s3 + $0x26c] ss:$16 sps:$4 sm:$0xff]  }
 0x191   :  { %3135 = vmatprep.subr.bf16.mxu0 %v6943_v62  ;;  %3204 = vmatprep.subr.bf16.mxu1 %v6946_v0  ;;  %v6982_v62 = vld [vmem:[%s10298_s3 + $0x4ac] ss:$16 sps:$4 sm:$0xff]   ;;  %v835_v0 = vmax.f32 %v809_v45, %v811_v57 }
 0x192   :  { %v7033_v45 = vld [vmem:[%s10298_s3 + $0x34c] ss:$16 sps:$4 sm:$0xff]  }
 0x193   :  { %v7036_v57 = vld [vmem:[%s10298_s3 + $0x58c] ss:$16 sps:$4 sm:$0xff]  }
 0x194   :  { %3136 = vmatpush2.bf16.msra.mxu0 %v6941_v1  ;;  %3205 = vmatpush2.bf16.msra.mxu1 %v6944_v2  ;;  %v6985_v1 = vld [vmem:[%s10298_s3 + $0x24c] ss:$16 sps:$4 sm:$0xff]  }
 0x195   :  { %3137 = vmatprep.subr.bf16.mxu0 %v6949_v6  ;;  %3206 = vmatprep.subr.bf16.mxu1 %v6952_v7  ;;  %v6988_v2 = vld [vmem:[%s10298_s3 + $0x48c] ss:$16 sps:$4 sm:$0xff]   ;;  %v871_v6 = vadd.f32 %v8140_v13, %v835_v0  ;;  %v6986_v7 = vld [vmem:[%s10298_s3 + $0x488] ss:$16 sps:$4 sm:$0xff]  }
 0x196   :  { %v6994_v13 = vld [vmem:[%s10298_s3 + $0x46c] ss:$16 sps:$4 sm:$0xff]   ;;  %v7040_v0 = vld [vmem:[%s10298_s3 + $0x568] ss:$16 sps:$4 sm:$0xff]  }
 0x197   :  { %v8742_v14 = vpack.c.bf16 %v871_v6, %v8529_v18  ;;  %v6995_v18 = vld [vmem:[%s10298_s3 + $0x208] ss:$16 sps:$4 sm:$0xff]   ;;  %v7051_v6 = vld [vmem:[%s10298_s3 + $0x52c] ss:$16 sps:$4 sm:$0xff]  }
 0x198   :  { %3138 = vmatpush2.bf16.msra.mxu0 %v6947_v15  ;;  %3207 = vmatpush2.bf16.msra.mxu1 %v6950_v36  ;;  %v6989_v15 = vld [vmem:[%s10298_s3 + $0x228] ss:$16 sps:$4 sm:$0xff]  }
 0x199   :  { %3208 = vmatprep.subr.bf16.mxu1 %v6955_v20  ;;  %3253 = vmatprep.subr.bf16.mxu0 %v6958_v22  ;;  %v6992_v36 = vld [vmem:[%s10298_s3 + $0x468] ss:$16 sps:$4 sm:$0xff]   ;;  %v6997_v20 = vld [vmem:[%s10298_s3 + $0x20c] ss:$16 sps:$4 sm:$0xff]  }
 0x19a   :  { %v7000_v22 = vld [vmem:[%s10298_s3 + $0x44c] ss:$16 sps:$4 sm:$0xff]  }
 0x19b   :  { %3140 = vmatmul.mubr.bf16.vlgmr.msra.gmra.mxu0 %v8270_v17 }
 0x19c   :  { %3149 = vmatprep.mubr.bf16.mxu0 %v8326_v12  ;;  %3209 = vmatpush2.bf16.msra.mxu1 %v6953_v26  ;;  %v7001_v26 = vld [vmem:[%s10298_s3 + $0x3e8] ss:$16 sps:$4 sm:$0xff]  }
 0x19d   :  { %3254 = vmatpush1.bf16.msra.mxu0 %v6956_v28  ;;  %3210 = vmatprep.subr.bf16.mxu1 %v6961_v30  ;;  %v7004_v28 = vld [vmem:[%s10298_s3 + $0x428] ss:$16 sps:$4 sm:$0xff]   ;;  %v7009_v30 = vld [vmem:[%s10298_s3 + $0x3cc] ss:$16 sps:$4 sm:$0xff]  }
 0x19e   :  { %3255 = vmatprep.subr.bf16.mxu0 %v6964_v33  ;;  %v7012_v33 = vld [vmem:[%s10298_s3 + $0x40c] ss:$16 sps:$4 sm:$0xff]  }
 0x1a0   :  { %3211 = vmatpush2.bf16.msra.mxu1 %v6959_v37  ;;  %v7015_v37 = vld [vmem:[%s10298_s3 + $0x3ac] ss:$16 sps:$4 sm:$0xff]  }
 0x1a1   :  { %3256 = vmatpush1.bf16.msra.mxu0 %v6962_v27  ;;  %3326 = vmatprep.subr.bf16.mxu1 %v6970_v38  ;;  %v7013_v27 = vld [vmem:[%s10298_s3 + $0x3a8] ss:$16 sps:$4 sm:$0xff]  }
 0x1a2   :  { %3257 = vmatprep.subr.bf16.mxu0 %v6967_v50  ;;  %v7016_v38 = vld [vmem:[%s10298_s3 + $0x5e8] ss:$16 sps:$4 sm:$0xff]  }
 0x1a3   :  { %3150 = vmatmul.mubr.bf16.gmra.mxu0 %v8334_v21  ;;  %3213 = vmatmul.mubr.bf16.vlgmr.msra.gmra.mxu1 %v8151_v29  ;;  %v872_v29 = vadd.f32 %v8137_v5, %v836_v31  ;;  %v6980_v5 = vld [vmem:[%s10298_s3 + $0x4a8] ss:$16 sps:$4 sm:$0xff]   ;;  %v7030_v31 = vld [vmem:[%s10298_s3 + $0x5ac] ss:$16 sps:$4 sm:$0xff]  }
 0x1a4   :  { %3159 = vmatprep.mubr.bf16.mxu0 %v8480_v59  ;;  %3222 = vmatprep.mubr.bf16.mxu1 %v8198_v16  ;;  %v7019_v50 = vld [vmem:[%s10298_s3 + $0x388] ss:$16 sps:$4 sm:$0xff]  }
 0x1a5   :  { %3258 = vmatpush1.bf16.msra.mxu0 %v6965_v51  ;;  %3327 = vmatpush1.bf16.msra.mxu1 %v6968_v55  ;;  %v8716_v4 = vpack.c.bf16 %v872_v29, %v8495_v41  ;;  %v6983_v41 = vld [vmem:[%s10298_s3 + $0x248] ss:$16 sps:$4 sm:$0xff]   ;;  %v7027_v55 = vld [vmem:[%s10298_s3 + $0x36c] ss:$16 sps:$4 sm:$0xff]  }
 0x1a6   :  { %3259 = vmatprep.subr.bf16.mxu0 %v6973_v32  ;;  %3328 = vmatprep.subr.bf16.mxu1 %v6976_v42  ;;  %v7022_v51 = vld [vmem:[%s10298_s3 + $0x5c8] ss:$16 sps:$4 sm:$0xff]   ;;  %v7039_v29 = vld [vmem:[%s10298_s3 + $0x32c] ss:$16 sps:$4 sm:$0xff]  }
 0x1a7   :  { %v7025_v32 = vld [vmem:[%s10298_s3 + $0x368] ss:$16 sps:$4 sm:$0xff]  }
 0x1a8   :  { %v7028_v42 = vld [vmem:[%s10298_s3 + $0x5a8] ss:$16 sps:$4 sm:$0xff]  }
 0x1a9   :  { %3260 = vmatpush1.bf16.msra.mxu0 %v6971_v58  ;;  %3329 = vmatpush1.bf16.msra.mxu1 %v6974_v60  ;;  %v7031_v58 = vld [vmem:[%s10298_s3 + $0x348] ss:$16 sps:$4 sm:$0xff]  }
 0x1aa   :  { %3261 = vmatprep.subr.bf16.mxu0 %v6979_v61  ;;  %3330 = vmatprep.subr.bf16.mxu1 %v6982_v62  ;;  %v7034_v60 = vld [vmem:[%s10298_s3 + $0x588] ss:$16 sps:$4 sm:$0xff]   ;;  %v7042_v61 = vld [vmem:[%s10298_s3 + $0x56c] ss:$16 sps:$4 sm:$0xff]  }
 0x1ab   :  { %3160 = vmatmul.mubr.bf16.gmra.mxu0 %v8514_v9  ;;  %3223 = vmatmul.mubr.bf16.gmra.mxu1 %v8206_v19  ;;  %v7037_v62 = vld [vmem:[%s10298_s3 + $0x328] ss:$16 sps:$4 sm:$0xff]  }
 0x1ac   :  { %3169 = vmatprep.mubr.bf16.mxu0 %v8716_v4  ;;  %3232 = vmatprep.mubr.bf16.mxu1 %v8262_v10 }
 0x1ad   :  { %3262 = vmatpush1.bf16.msra.mxu0 %v6977_v3  ;;  %3331 = vmatpush1.bf16.msra.mxu1 %v6980_v5  ;;  %v7045_v3 = vld [vmem:[%s10298_s3 + $0x30c] ss:$16 sps:$4 sm:$0xff]  }
 0x1ae   :  { %3263 = vmatprep.subr.bf16.mxu0 %v6985_v1  ;;  %3332 = vmatprep.subr.bf16.mxu1 %v6988_v2  ;;  %v7048_v5 = vld [vmem:[%s10298_s3 + $0x54c] ss:$16 sps:$4 sm:$0xff]   ;;  %v7043_v1 = vld [vmem:[%s10298_s3 + $0x308] ss:$16 sps:$4 sm:$0xff]  }
 0x1af   :  { %v7046_v2 = vld [vmem:[%s10298_s3 + $0x548] ss:$16 sps:$4 sm:$0xff]  }
 0x1b1   :  { %3264 = vmatpush1.bf16.msra.mxu0 %v6983_v41  ;;  %3333 = vmatpush1.bf16.msra.mxu1 %v6986_v7  ;;  %v7054_v41 = vld [vmem:[%s10298_s3 + $0x6ec] ss:$16 sps:$4 sm:$0xff]   ;;  %v7049_v7 = vld [vmem:[%s10298_s3 + $0x528] ss:$16 sps:$4 sm:$0xff]  }
 0x1b2   :  { %3265 = vmatprep.subr.bf16.mxu0 %v6991_v11  ;;  %3334 = vmatprep.subr.bf16.mxu1 %v6994_v13  ;;  %v7052_v11 = vld [vmem:[%s10298_s3 + $0x6e8] ss:$16 sps:$4 sm:$0xff]   ;;  %v7057_v13 = vld [vmem:[%s10298_s3 + $0x50c] ss:$16 sps:$4 sm:$0xff]  }
 0x1b3   :  { %3170 = vmatmul.mubr.bf16.gmra.mxu0 %v8742_v14  ;;  %3233 = vmatmul.mubr.bf16.gmra.mxu1 %v8270_v17 }
 0x1b4   :  { %3242 = vmatprep.mubr.bf16.mxu1 %v8326_v12  ;;  %3285 = vmatprep.mubr.bf16.mxu0 %v8166_v49  ;;  %v7006_v49 = vld [vmem:[%s10298_s3 + $0x42c] ss:$16 sps:$4 sm:$0xff]  }
 0x1b5   :  { %3266 = vmatpush1.bf16.msra.mxu0 %v6989_v15  ;;  %3335 = vmatpush1.bf16.msra.mxu1 %v6992_v36  ;;  %v7060_v15 = vld [vmem:[%s10298_s3 + $0x6cc] ss:$16 sps:$4 sm:$0xff]  }
 0x1b6   :  { %3267 = vmatprep.subr.bf16.mxu0 %v6997_v20  ;;  %3336 = vmatprep.subr.bf16.mxu1 %v7000_v22  ;;  %v7055_v20 = vld [vmem:[%s10298_s3 + $0x508] ss:$16 sps:$4 sm:$0xff]  }
 0x1b7   :  { %v7058_v22 = vld [vmem:[%s10298_s3 + $0x6c8] ss:$16 sps:$4 sm:$0xff]  }
 0x1b9   :  { %3268 = vmatpush1.bf16.msra.mxu0 %v6995_v18  ;;  %3337 = vmatpush1.bf16.msra.mxu1 %v6998_v23  ;;  %v7066_v18 = vld [vmem:[%s10298_s3 + $0x8ec] ss:$16 sps:$4 sm:$0xff]  }
 0x1ba   :  { %3269 = vmatprep.subr.bf16.mxu0 %v7003_v24  ;;  %3338 = vmatprep.subr.bf16.mxu1 %v7006_v49  ;;  %v7061_v24 = vld [vmem:[%s10298_s3 + $0x6a8] ss:$16 sps:$4 sm:$0xff]  }
 0x1bb   :  { %3243 = vmatmul.mubr.bf16.gmra.mxu1 %v8334_v21  ;;  %v7064_v49 = vld [vmem:[%s10298_s3 + $0x8e8] ss:$16 sps:$4 sm:$0xff]  }
 0x1bc   :  { %3358 = vmatprep.mubr.bf16.mxu1 %v8198_v16  ;;  %v7018_v16 = vld [vmem:[%s10298_s3 + $0x5ec] ss:$16 sps:$4 sm:$0xff]  }
 0x1bd   :  { %3270 = vmatpush2.bf16.msra.mxu0 %v7001_v26  ;;  %3339 = vmatpush1.bf16.msra.mxu1 %v7004_v28 }
 0x1be   :  { %3271 = vmatprep.subr.bf16.mxu0 %v7009_v30  ;;  %3340 = vmatprep.subr.bf16.mxu1 %v7012_v33  ;;  %v7069_v30 = vld [vmem:[%s10298_s3 + $0x68c] ss:$16 sps:$4 sm:$0xff]  }
 0x1bf   :  { %v7072_v33 = vld [vmem:[%s10298_s3 + $0x8cc] ss:$16 sps:$4 sm:$0xff]  }
 0x1c1   :  { %3272 = vmatpush2.bf16.msra.mxu0 %v7007_v34  ;;  %3341 = vmatpush1.bf16.msra.mxu1 %v7010_v35 }
 0x1c2   :  { %3273 = vmatprep.subr.bf16.mxu0 %v7015_v37  ;;  %3342 = vmatprep.subr.bf16.mxu1 %v7018_v16  ;;  %v7067_v16 = vld [vmem:[%s10298_s3 + $0x688] ss:$16 sps:$4 sm:$0xff]  }
 0x1c5   :  { %3274 = vmatpush2.bf16.msra.mxu0 %v7013_v27  ;;  %3343 = vmatpush2.bf16.msra.mxu1 %v7016_v38  ;;  %v7070_v27 = vld [vmem:[%s10298_s3 + $0x8c8] ss:$16 sps:$4 sm:$0xff]  }
 0x1c6   :  { %3275 = vmatprep.subr.bf16.mxu0 %v7021_v39  ;;  %3344 = vmatprep.subr.bf16.mxu1 %v7024_v40  ;;  %v7075_v39 = vld [vmem:[%s10298_s3 + $0x66c] ss:$16 sps:$4 sm:$0xff]  }
 0x1c7   :  { %v7078_v40 = vld [vmem:[%s10298_s3 + $0x8ac] ss:$16 sps:$4 sm:$0xff]  }
 0x1c9   :  { %3276 = vmatpush2.bf16.msra.mxu0 %v7019_v50  ;;  %3345 = vmatpush2.bf16.msra.mxu1 %v7022_v51 }
 0x1ca   :  { %3277 = vmatprep.subr.bf16.mxu0 %v7027_v55  ;;  %3346 = vmatprep.subr.bf16.mxu1 %v7030_v31  ;;  %v7073_v31 = vld [vmem:[%s10298_s3 + $0x668] ss:$16 sps:$4 sm:$0xff]  }
 0x1cd   :  { %3278 = vmatpush2.bf16.msra.mxu0 %v7025_v32  ;;  %3347 = vmatpush2.bf16.msra.mxu1 %v7028_v42  ;;  %v7076_v32 = vld [vmem:[%s10298_s3 + $0x8a8] ss:$16 sps:$4 sm:$0xff]   ;;  %v7081_v42 = vld [vmem:[%s10298_s3 + $0x64c] ss:$16 sps:$4 sm:$0xff]  }
 0x1ce   :  { %3279 = vmatprep.subr.bf16.mxu0 %v7033_v45  ;;  %3348 = vmatprep.subr.bf16.mxu1 %v7036_v57  ;;  %v7084_v45 = vld [vmem:[%s10298_s3 + $0x88c] ss:$16 sps:$4 sm:$0xff]  }
 0x1d1   :  { %3280 = vmatpush2.bf16.msra.mxu0 %v7031_v58  ;;  %3349 = vmatpush2.bf16.msra.mxu1 %v7034_v60  ;;  %v7079_v58 = vld [vmem:[%s10298_s3 + $0x648] ss:$16 sps:$4 sm:$0xff]  }
 0x1d2   :  { %3281 = vmatprep.subr.bf16.mxu0 %v7039_v29  ;;  %3350 = vmatprep.subr.bf16.mxu1 %v7042_v61  ;;  %v7082_v60 = vld [vmem:[%s10298_s3 + $0x888] ss:$16 sps:$4 sm:$0xff]   ;;  %v7087_v29 = vld [vmem:[%s10298_s3 + $0x62c] ss:$16 sps:$4 sm:$0xff]  }
 0x1d3   :  { %v7090_v61 = vld [vmem:[%s10298_s3 + $0x86c] ss:$16 sps:$4 sm:$0xff]  }
 0x1d5   :  { %3282 = vmatpush2.bf16.msra.mxu0 %v7037_v62  ;;  %3351 = vmatpush2.bf16.msra.mxu1 %v7040_v0  ;;  %v7085_v0 = vld [vmem:[%s10298_s3 + $0x628] ss:$16 sps:$4 sm:$0xff]  }
 0x1d6   :  { %3283 = vmatprep.subr.bf16.mxu0 %v7045_v3  ;;  %3352 = vmatprep.subr.bf16.mxu1 %v7048_v5  ;;  %v7088_v3 = vld [vmem:[%s10298_s3 + $0x868] ss:$16 sps:$4 sm:$0xff]  }
 0x1d9   :  { %3284 = vmatpush2.bf16.msra.mxu0 %v7043_v1  ;;  %3353 = vmatpush2.bf16.msra.mxu1 %v7046_v2  ;;  %v7093_v2 = vld [vmem:[%s10298_s3 + $0x60c] ss:$16 sps:$4 sm:$0xff]  }
 0x1da   :  { %3354 = vmatprep.subr.bf16.mxu1 %v7051_v6  ;;  %3399 = vmatprep.subr.bf16.mxu0 %v7054_v41  ;;  %v2849_v36 = vpop.f32.mrf.mxu0  ;;  %v7096_v6 = vld [vmem:[%s10298_s3 + $0x84c] ss:$16 sps:$4 sm:$0xff]  }
 0x1dc   :  { %3286 = vmatmul.mubr.bf16.vlgmr.msra.gmra.mxu0 %v8174_v52  ;;  %v7063_v52 = vld [vmem:[%s10298_s3 + $0x6ac] ss:$16 sps:$4 sm:$0xff]   ;;  %v2851_v23 = vpop.f32.mrf.mxu0 }
 0x1dd   :  { %3295 = vmatprep.mubr.bf16.mxu0 %v8230_v44  ;;  %3355 = vmatpush2.bf16.msra.mxu1 %v7049_v7 }
 0x1de   :  { %3400 = vmatpush1.bf16.msra.mxu0 %v7052_v11  ;;  %3356 = vmatprep.subr.bf16.mxu1 %v7057_v13  ;;  %v2853_v34 = vpop.f32.mrf.mxu0  ;;  %v7091_v13 = vld [vmem:[%s10298_s3 + $0x608] ss:$16 sps:$4 sm:$0xff]  }
 0x1df   :  { %3401 = vmatprep.subr.bf16.mxu0 %v7060_v15  ;;  %v7094_v15 = vld [vmem:[%s10298_s3 + $0x848] ss:$16 sps:$4 sm:$0xff]  }
 0x1e0   :  { %v2855_v50 = vpop.f32.mrf.mxu0 }
 0x1e1   :  { %3357 = vmatpush2.bf16.msra.mxu1 %v7055_v20 }
 0x1e2   :  { %3402 = vmatpush1.bf16.msra.mxu0 %v7058_v22  ;;  %3472 = vmatprep.subr.bf16.mxu1 %v7066_v18  ;;  %v2922_v26 = vpop.f32.mrf.mxu1  ;;  %v7102_v22 = vld [vmem:[%s10298_s3 + $0x82c] ss:$16 sps:$4 sm:$0xff]  }
 0x1e3   :  { %3403 = vmatprep.subr.bf16.mxu0 %v7063_v52  ;;  %v8902_v28 = vadd.f32 %v2922_v26, %v2849_v36  ;;  %v7105_v26 = vld [vmem:[%s10298_s3 + $0x7cc] ss:$16 sps:$4 sm:$0xff]  }
 0x1e4   :  { %3296 = vmatmul.mubr.bf16.gmra.mxu0 %v8238_v47  ;;  %3359 = vmatmul.mubr.bf16.vlgmr.msra.gmra.mxu1 %v8206_v19  ;;  %v2924_v35 = vpop.f32.mrf.mxu1 }
 0x1e5   :  { %3305 = vmatprep.mubr.bf16.mxu0 %v8294_v43  ;;  %3368 = vmatprep.mubr.bf16.mxu1 %v8262_v10  ;;  %v8914_v37 = vadd.f32 %v2924_v35, %v2851_v23  ;;  %v7106_v35 = vld [vmem:[%s10298_s3 + $0x808] ss:$16 sps:$4 sm:$0xff]  }
 0x1e6   :  { %3404 = vmatpush1.bf16.msra.mxu0 %v7061_v24  ;;  %3473 = vmatpush1.bf16.msra.mxu1 %v7064_v49  ;;  %v2926_v38 = vpop.f32.mrf.mxu1  ;;  %v7097_v24 = vld [vmem:[%s10298_s3 + $0x7e8] ss:$16 sps:$4 sm:$0xff]  }
 0x1e7   :  { %3405 = vmatprep.subr.bf16.mxu0 %v7069_v30  ;;  %3474 = vmatprep.subr.bf16.mxu1 %v7072_v33  ;;  %v8922_v19 = vadd.f32 %v2926_v38, %v2853_v34  ;;  %v7100_v49 = vld [vmem:[%s10298_s3 + $0x828] ss:$16 sps:$4 sm:$0xff]   ;;  %v7108_v30 = vld [vmem:[%s10298_s3 + $0x80c] ss:$16 sps:$4 sm:$0xff]  }
 0x1e8   :  { %v2928_v51 = vpop.f32.mrf.mxu1  ;;  %v7103_v34 = vld [vmem:[%s10298_s3 + $0x7c8] ss:$16 sps:$4 sm:$0xff]  }
 0x1e9   :  { %v8930_v55 = vadd.f32 %v2928_v51, %v2855_v50  ;;  %v7109_v38 = vld [vmem:[%s10298_s3 + $0x7a8] ss:$16 sps:$4 sm:$0xff]   ;;  %v7117_v51 = vld [vmem:[%s10298_s3 + $0x78c] ss:$16 sps:$4 sm:$0xff]  }
 0x1ea   :  { %3406 = vmatpush1.bf16.msra.mxu0 %v7067_v16  ;;  %3475 = vmatpush1.bf16.msra.mxu1 %v7070_v27  ;;  %v2859_v57 = vpop.f32.mrf.mxu0  ;;  %v7111_v16 = vld [vmem:[%s10298_s3 + $0x7ac] ss:$16 sps:$4 sm:$0xff]  }
 0x1eb   :  { %3407 = vmatprep.subr.bf16.mxu0 %v7075_v39  ;;  %3476 = vmatprep.subr.bf16.mxu1 %v7078_v40  ;;  %v7112_v39 = vld [vmem:[%s10298_s3 + $0x9e8] ss:$16 sps:$4 sm:$0xff]  }
 0x1ec   :  { %3306 = vmatmul.mubr.bf16.gmra.mxu0 %v8302_v48  ;;  %3369 = vmatmul.mubr.bf16.gmra.mxu1 %v8270_v17  ;;  %v2861_v62 = vpop.f32.mrf.mxu0 }
 0x1ed   :  { %3315 = vmatprep.mubr.bf16.mxu0 %v8376_v46  ;;  %3378 = vmatprep.mubr.bf16.mxu1 %v8326_v12 }
 0x1ee   :  { %3408 = vmatpush1.bf16.msra.mxu0 %v7073_v31  ;;  %3477 = vmatpush1.bf16.msra.mxu1 %v7076_v32  ;;  %v2863_v41 = vpop.f32.mrf.mxu0  ;;  %v7120_v31 = vld [vmem:[%s10298_s3 + $0x9cc] ss:$16 sps:$4 sm:$0xff]  }
 0x1ef   :  { %3409 = vmatprep.subr.bf16.mxu0 %v7081_v42  ;;  %3478 = vmatprep.subr.bf16.mxu1 %v7084_v45 }
 0x1f0   :  { %v2865_v18 = vpop.f32.mrf.mxu0 }
 0x1f2   :  { %3410 = vmatpush1.bf16.msra.mxu0 %v7079_v58  ;;  %3479 = vmatpush1.bf16.msra.mxu1 %v7082_v60  ;;  %v2932_v5 = vpop.f32.mrf.mxu1  ;;  %v7118_v58 = vld [vmem:[%s10298_s3 + $0x9c8] ss:$16 sps:$4 sm:$0xff]  }
 0x1f3   :  { %3411 = vmatprep.subr.bf16.mxu0 %v7087_v29  ;;  %3480 = vmatprep.subr.bf16.mxu1 %v7090_v61  ;;  %v8966_v1 = vadd.f32 %v2932_v5, %v2859_v57  ;;  %v7115_v57 = vld [vmem:[%s10298_s3 + $0x788] ss:$16 sps:$4 sm:$0xff]   ;;  %v7123_v61 = vld [vmem:[%s10298_s3 + $0x76c] ss:$16 sps:$4 sm:$0xff]  }
 0x1f4   :  { %3316 = vmatmul.mubr.bf16.gmra.mxu0 %v8385_v54  ;;  %3379 = vmatmul.mubr.bf16.gmra.mxu1 %v8334_v21  ;;  %v2934_v7 = vpop.f32.mrf.mxu1 }
 0x1f5   :  { %3388 = vmatprep.mubr.bf16.mxu1 %v8480_v59  ;;  %3431 = vmatprep.mubr.bf16.mxu0 %v8230_v44  ;;  %v8978_v11 = vadd.f32 %v2934_v7, %v2861_v62  ;;  %v7099_v44 = vld [vmem:[%s10298_s3 + $0x7ec] ss:$16 sps:$4 sm:$0xff]  }
 0x1f6   :  { %3412 = vmatpush1.bf16.msra.mxu0 %v7085_v0  ;;  %3481 = vmatpush1.bf16.msra.mxu1 %v7088_v3  ;;  %v2936_v36 = vpop.f32.mrf.mxu1  ;;  %v7126_v62 = vld [vmem:[%s10298_s3 + $0x9ac] ss:$16 sps:$4 sm:$0xff]  }
 0x1f7   :  { %3413 = vmatprep.subr.bf16.mxu0 %v7093_v2  ;;  %3482 = vmatprep.subr.bf16.mxu1 %v7096_v6  ;;  %v8986_v20 = vadd.f32 %v2936_v36, %v2863_v41  ;;  %v7121_v2 = vld [vmem:[%s10298_s3 + $0x768] ss:$16 sps:$4 sm:$0xff]   ;;  %v7129_v41 = vld [vmem:[%s10298_s3 + $0x74c] ss:$16 sps:$4 sm:$0xff]  }
 0x1f8   :  { %v2938_v52 = vpop.f32.mrf.mxu1  ;;  %v7124_v6 = vld [vmem:[%s10298_s3 + $0x9a8] ss:$16 sps:$4 sm:$0xff]   ;;  %v7132_v7 = vld [vmem:[%s10298_s3 + $0x98c] ss:$16 sps:$4 sm:$0xff]  }
 0x1f9   :  { %v8994_v23 = vadd.f32 %v2938_v52, %v2865_v18  ;;  %v7130_v36 = vld [vmem:[%s10298_s3 + $0x988] ss:$16 sps:$4 sm:$0xff]  }
 0x1fa   :  { %3414 = vmatpush1.bf16.msra.mxu0 %v7091_v13  ;;  %3483 = vmatpush1.bf16.msra.mxu1 %v7094_v15  ;;  %v2869_v33 = vpop.f32.mrf.mxu0  ;;  %v7127_v15 = vld [vmem:[%s10298_s3 + $0x748] ss:$16 sps:$4 sm:$0xff]  }
 0x1fb   :  { %3415 = vmatprep.subr.bf16.mxu0 %v7099_v44  ;;  %3484 = vmatprep.subr.bf16.mxu1 %v7102_v22  ;;  %v7135_v44 = vld [vmem:[%s10298_s3 + $0x72c] ss:$16 sps:$4 sm:$0xff]   ;;  %v7133_v52 = vld [vmem:[%s10298_s3 + $0x728] ss:$16 sps:$4 sm:$0xff]  }
 0x1fc   :  { %3389 = vmatmul.mubr.bf16.gmra.mxu1 %v8514_v9  ;;  %v2871_v27 = vpop.f32.mrf.mxu0  ;;  %v7138_v22 = vld [vmem:[%s10298_s3 + $0x96c] ss:$16 sps:$4 sm:$0xff]  }
 0x1fd   :  { %3504 = vmatprep.mubr.bf16.mxu1 %v8262_v10  ;;  %v7114_v10 = vld [vmem:[%s10298_s3 + $0x9ec] ss:$16 sps:$4 sm:$0xff]  }
 0x1fe   :  { %3416 = vmatpush2.bf16.msra.mxu0 %v7097_v24  ;;  %3485 = vmatpush1.bf16.msra.mxu1 %v7100_v49  ;;  %v2873_v32 = vpop.f32.mrf.mxu0  ;;  %v7136_v24 = vld [vmem:[%s10298_s3 + $0x968] ss:$16 sps:$4 sm:$0xff]  }
 0x1ff   :  { %3417 = vmatprep.subr.bf16.mxu0 %v7105_v26  ;;  %3486 = vmatprep.subr.bf16.mxu1 %v7108_v30  ;;  %v7141_v30 = vld [vmem:[%s10298_s3 + $0x70c] ss:$16 sps:$4 sm:$0xff]  }
 0x200   :  { %v2875_v0 = vpop.f32.mrf.mxu0 }
 0x202   :  { %3418 = vmatpush2.bf16.msra.mxu0 %v7103_v34  ;;  %3487 = vmatpush1.bf16.msra.mxu1 %v7106_v35  ;;  %v2942_v40 = vpop.f32.mrf.mxu1 }
 0x203   :  { %3419 = vmatprep.subr.bf16.mxu0 %v7111_v16  ;;  %3488 = vmatprep.subr.bf16.mxu1 %v7114_v10  ;;  %v9028_v50 = vadd.f32 %v2942_v40, %v2869_v33  ;;  %v7144_v33 = vld [vmem:[%s10298_s3 + $0x94c] ss:$16 sps:$4 sm:$0xff]   ;;  %v7139_v10 = vld [vmem:[%s10298_s3 + $0x708] ss:$16 sps:$4 sm:$0xff]  }
 0x204   :  { %v2944_v42 = vpop.f32.mrf.mxu1  ;;  %v7147_v40 = vld [vmem:[%s10298_s3 + $0x92c] ss:$16 sps:$4 sm:$0xff]  }
 0x205   :  { %v9036_v45 = vadd.f32 %v2944_v42, %v2871_v27  ;;  %v7142_v27 = vld [vmem:[%s10298_s3 + $0x948] ss:$16 sps:$4 sm:$0xff]  }
 0x206   :  { %3420 = vmatpush2.bf16.msra.mxu0 %v7109_v38  ;;  %3489 = vmatpush2.bf16.msra.mxu1 %v7112_v39  ;;  %v2946_v60 = vpop.f32.mrf.mxu1 }
 0x207   :  { %3421 = vmatprep.subr.bf16.mxu0 %v7117_v51  ;;  %3490 = vmatprep.subr.bf16.mxu1 %v7120_v31  ;;  %v9044_v29 = vadd.f32 %v2946_v60, %v2873_v32  ;;  %v7150_v60 = vld [vmem:[%s10298_s3 + $0x90c] ss:$16 sps:$4 sm:$0xff]  }
 0x208   :  { %v2948_v3 = vpop.f32.mrf.mxu1 }
 0x209   :  { %v9052_v5 = vadd.f32 %v2948_v3, %v2875_v0  ;;  %v7148_v3 = vld [vmem:[%s10298_s3 + $0x908] ss:$16 sps:$4 sm:$0xff]  }
 0x20a   :  { %3422 = vmatpush2.bf16.msra.mxu0 %v7115_v57  ;;  %3491 = vmatpush2.bf16.msra.mxu1 %v7118_v58  ;;  %v2879_v13 = vpop.f32.mrf.mxu0  ;;  %v7145_v57 = vld [vmem:[%s10298_s3 + $0x928] ss:$16 sps:$4 sm:$0xff]  }
 0x20b   :  { %3423 = vmatprep.subr.bf16.mxu0 %v7123_v61  ;;  %3492 = vmatprep.subr.bf16.mxu1 %v7126_v62 }
 0x20c   :  { %v2881_v18 = vpop.f32.mrf.mxu0 }
 0x20e   :  { %3424 = vmatpush2.bf16.msra.mxu0 %v7121_v2  ;;  %3493 = vmatpush2.bf16.msra.mxu1 %v7124_v6  ;;  %v2883_v34 = vpop.f32.mrf.mxu0 }
 0x20f   :  { %3425 = vmatprep.subr.bf16.mxu0 %v7129_v41  ;;  %3494 = vmatprep.subr.bf16.mxu1 %v7132_v7 }
 0x210   :  { %v2885_v51 = vpop.f32.mrf.mxu0 }
 0x212   :  { %3426 = vmatpush2.bf16.msra.mxu0 %v7127_v15  ;;  %3495 = vmatpush2.bf16.msra.mxu1 %v7130_v36  ;;  %v2952_v49 = vpop.f32.mrf.mxu1 }
 0x213   :  { %3427 = vmatprep.subr.bf16.mxu0 %v7135_v44  ;;  %3496 = vmatprep.subr.bf16.mxu1 %v7138_v22  ;;  %v9084_v26 = vadd.f32 %v2952_v49, %v2879_v13 }
 0x214   :  { %v2954_v35 = vpop.f32.mrf.mxu1 }
 0x215   :  { %v9092_v16 = vadd.f32 %v2954_v35, %v2881_v18 }
 0x216   :  { %3428 = vmatpush2.bf16.msra.mxu0 %v7133_v52  ;;  %3497 = vmatpush2.bf16.msra.mxu1 %v7136_v24  ;;  %v2956_v38 = vpop.f32.mrf.mxu1 }
 0x217   :  { %3429 = vmatprep.subr.bf16.mxu0 %v7141_v30  ;;  %3498 = vmatprep.subr.bf16.mxu1 %v7144_v33  ;;  %v9100_v39 = vadd.f32 %v2956_v38, %v2883_v34 }
 0x218   :  { %v2958_v31 = vpop.f32.mrf.mxu1 }
 0x219   :  { %v9105_v32 = vadd.f32 %v2958_v31, %v2885_v51 }
 0x21a   :  { %3430 = vmatpush2.bf16.msra.mxu0 %v7139_v10  ;;  %3499 = vmatpush2.bf16.msra.mxu1 %v7142_v27  ;;  %v2995_v42 = vpop.f32.mrf.mxu0 }
 0x21b   :  { %v2996_v58 = vadd.f32 %v2995_v42, %v8902_v28  ;;  %3500 = vmatprep.subr.bf16.mxu1 %v7147_v40 }
 0x21c   :  { %v2997_v61 = vpop.f32.mrf.mxu0 }
 0x21d   :  { %3432 = vmatmul.mubr.bf16.vlgmr.msra.gmra.mxu0 %v8238_v47  ;;  %v2998_v62 = vadd.f32 %v2997_v61, %v8914_v37 }
 0x21e   :  { %3441 = vmatprep.mubr.bf16.mxu0 %v8294_v43  ;;  %3501 = vmatpush2.bf16.msra.mxu1 %v7145_v57  ;;  %v2999_v0 = vpop.f32.mrf.mxu0 }
 0x21f   :  { %v3000_v28 = vadd.f32 %v2999_v0, %v8922_v19  ;;  %3502 = vmatprep.subr.bf16.mxu1 %v7150_v60 }
 0x220   :  { %v3001_v2 = vpop.f32.mrf.mxu0 }
 0x221   :  { %v3002_v6 = vadd.f32 %v3001_v2, %v8930_v55  ;;  %v7157_v2 = vld [vmem:[%s10300_s5 + $0xa0] ss:$16 sps:$4 sm:$0xff]  }
 0x222   :  { %3503 = vmatpush2.bf16.msra.mxu1 %v7148_v3  ;;  %v3005_v41 = vpop.f32.mrf.mxu0  ;;  %v3068_v7 = vpop.f32.mrf.mxu1  ;;  %v7159_v3 = vld [vmem:[%s10300_s5 + $0xa4] ss:$16 sps:$4 sm:$0xff]  }
 0x223   :  { %v3006_v47 = vadd.f32 %v3005_v41, %v8966_v1  ;;  %v9123_v37 = vadd.f32 %v3068_v7, %v2996_v58 }
 0x224   :  { %v3007_v43 = vpop.f32.mrf.mxu0  ;;  %v3070_v13 = vpop.f32.mrf.mxu1 }
 0x225   :  { %3442 = vmatmul.mubr.bf16.gmra.mxu0 %v8302_v48  ;;  %3505 = vmatmul.mubr.bf16.vlgmr.msra.gmra.mxu1 %v8270_v17  ;;  %v3008_v15 = vadd.f32 %v3007_v43, %v8978_v11  ;;  %v9128_v19 = vadd.f32 %v3070_v13, %v2998_v62  ;;  %v7168_v43 = vld [vmem:[%s10300_s5 + $0x2c4] ss:$16 sps:$4 sm:$0xff]  }
 0x226   :  { %3451 = vmatprep.mubr.bf16.mxu0 %v8376_v46  ;;  %3514 = vmatprep.mubr.bf16.mxu1 %v8326_v12  ;;  %v3009_v55 = vpop.f32.mrf.mxu0  ;;  %v3072_v36 = vpop.f32.mrf.mxu1 }
 0x227   :  { %v3010_v1 = vadd.f32 %v3009_v55, %v8986_v20  ;;  %v9133_v44 = vadd.f32 %v3072_v36, %v3000_v28  ;;  %v7166_v55 = vld [vmem:[%s10300_s5 + $0x2c0] ss:$16 sps:$4 sm:$0xff]  }
 0x228   :  { %v3011_v22 = vpop.f32.mrf.mxu0  ;;  %v3074_v18 = vpop.f32.mrf.mxu1  ;;  %v7169_v36 = vld [vmem:[%s10300_s5 + $0x60] ss:$16 sps:$4 sm:$0xff]  }
 0x229   :  { %v3012_v48 = vadd.f32 %v3011_v22, %v8994_v23  ;;  %v9136_v52 = vadd.f32 %v3074_v18, %v3002_v6  ;;  %v7160_v6 = vld [vmem:[%s10300_s5 + $0x2e0] ss:$16 sps:$4 sm:$0xff]   ;;  %v7174_v18 = vld [vmem:[%s10300_s5 + $0x2a4] ss:$16 sps:$4 sm:$0xff]  }
 0x22a   :  { %v3015_v17 = vpop.f32.mrf.mxu0  ;;  %v3078_v11 = vpop.f32.mrf.mxu1  ;;  %v7172_v22 = vld [vmem:[%s10300_s5 + $0x2a0] ss:$16 sps:$4 sm:$0xff]  }
 0x22b   :  { %v3016_v24 = vadd.f32 %v3015_v17, %v9028_v50  ;;  %v9139_v49 = vadd.f32 %v3078_v11, %v3006_v47  ;;  %v7180_v17 = vld [vmem:[%s10300_s5 + $0x284] ss:$16 sps:$4 sm:$0xff]   ;;  %v7175_v11 = vld [vmem:[%s10300_s5 + $0x40] ss:$16 sps:$4 sm:$0xff]  }
 0x22c   :  { %v3017_v46 = vpop.f32.mrf.mxu0  ;;  %v3080_v12 = vpop.f32.mrf.mxu1 }
 0x22d   :  { %3452 = vmatmul.mubr.bf16.gmra.mxu0 %v8385_v54  ;;  %3515 = vmatmul.mubr.bf16.gmra.mxu1 %v8334_v21  ;;  %v3018_v20 = vadd.f32 %v3017_v46, %v9036_v45  ;;  %v9144_v30 = vadd.f32 %v3080_v12, %v3008_v15  ;;  %v7163_v15 = vld [vmem:[%s10300_s5 + $0x80] ss:$16 sps:$4 sm:$0xff]   ;;  %v7183_v46 = vld [vmem:[%s10300_s5 + $0x24] ss:$16 sps:$4 sm:$0xff]  }
 0x22e   :  { %3461 = vmatprep.mubr.bf16.mxu0 %v8511_v8  ;;  %3524 = vmatprep.mubr.bf16.mxu1 %v8480_v59  ;;  %v3019_v23 = vpop.f32.mrf.mxu0  ;;  %v3082_v33 = vpop.f32.mrf.mxu1  ;;  %v7186_v12 = vld [vmem:[%s10300_s5 + $0x264] ss:$16 sps:$4 sm:$0xff]  }
 0x22f   :  { %v3020_v50 = vadd.f32 %v3019_v23, %v9044_v29  ;;  %v9149_v34 = vadd.f32 %v3082_v33, %v3010_v1  ;;  %v7153_v29 = vld [vmem:[%s10300_s5 + $0xe4] ss:$16 sps:$4 sm:$0xff]   ;;  %v7184_v23 = vld [vmem:[%s10300_s5 + $0x260] ss:$16 sps:$4 sm:$0xff]  }
 0x230   :  { %v3021_v35 = vpop.f32.mrf.mxu0  ;;  %v3084_v10 = vpop.f32.mrf.mxu1  ;;  %5155 = vmatprep.subr.bf16.mxu0 %v7153_v29  ;;  %v7171_v1 = vld [vmem:[%s10300_s5 + $0x64] ss:$16 sps:$4 sm:$0xff]   ;;  %v7199_v29 = vld [vmem:[%s10300_s5 + $0x1c0] ss:$16 sps:$4 sm:$0xff]  }
 0x231   :  { %v3022_v54 = vadd.f32 %v3021_v35, %v9052_v5  ;;  %v9152_v27 = vadd.f32 %v3084_v10, %v3012_v48  ;;  %v7177_v48 = vld [vmem:[%s10300_s5 + $0x44] ss:$16 sps:$4 sm:$0xff]   ;;  %v7187_v35 = vld [vmem:[%s10300_s5] ss:$16 sps:$4 sm:$0xff]  }
 0x232   :  { %v3025_v21 = vpop.f32.mrf.mxu0  ;;  %v3088_v45 = vpop.f32.mrf.mxu1  ;;  %v7189_v33 = vld [vmem:[%s10300_s5 + $0x4] ss:$16 sps:$4 sm:$0xff]   ;;  %v7190_v10 = vld [vmem:[%s10300_s5 + $0x240] ss:$16 sps:$4 sm:$0xff]  }
 0x233   :  { %v3026_v38 = vadd.f32 %v3025_v21, %v9084_v26  ;;  %v9155_v40 = vadd.f32 %v3088_v45, %v3016_v24  ;;  %v7151_v26 = vld [vmem:[%s10300_s5 + $0xe0] ss:$16 sps:$4 sm:$0xff]   ;;  %v7198_v21 = vld [vmem:[%s10300_s5 + $0x224] ss:$16 sps:$4 sm:$0xff]  }
 0x234   :  { %v3027_v8 = vpop.f32.mrf.mxu0  ;;  %v3090_v59 = vpop.f32.mrf.mxu1  ;;  %5156 = vmatpush1.bf16.msra.mxu0 %v7151_v26  ;;  %v7178_v24 = vld [vmem:[%s10300_s5 + $0x280] ss:$16 sps:$4 sm:$0xff]  }
 0x235   :  { %3462 = vmatmul.mubr.bf16.gmra.mxu0 %v8548_v25  ;;  %3525 = vmatmul.mubr.bf16.gmra.mxu1 %v8514_v9  ;;  %v3028_v5 = vadd.f32 %v3027_v8, %v9092_v16  ;;  %v9163_v51 = vadd.f32 %v3090_v59, %v3018_v20  ;;  %v7156_v16 = vld [vmem:[%s10300_s5 + $0xc4] ss:$16 sps:$4 sm:$0xff]   ;;  %v7181_v20 = vld [vmem:[%s10300_s5 + $0x20] ss:$16 sps:$4 sm:$0xff]  }
 0x236   :  { %3534 = vmatprep.mubr.bf16.mxu1 %v8716_v4  ;;  %v3029_v31 = vpop.f32.mrf.mxu0  ;;  %v3092_v42 = vpop.f32.mrf.mxu1  ;;  %v7154_v4 = vld [vmem:[%s10300_s5 + $0xc0] ss:$16 sps:$4 sm:$0xff]   ;;  %5157 = vmatprep.subr.bf16.mxu0 %v7156_v16  ;;  %v7201_v8 = vld [vmem:[%s10300_s5 + $0x1c4] ss:$16 sps:$4 sm:$0xff]  }
 0x237   :  { %v3030_v57 = vadd.f32 %v3029_v31, %v9100_v39  ;;  %v9170_v58 = vadd.f32 %v3092_v42, %v3020_v50  ;;  %v7192_v50 = vld [vmem:[%s10300_s5 + $0x244] ss:$16 sps:$4 sm:$0xff]   ;;  %v7193_v45 = vld [vmem:[%s10300_s5 + $0x1e0] ss:$16 sps:$4 sm:$0xff]  }
 0x238   :  { %v3031_v25 = vpop.f32.mrf.mxu0  ;;  %v3094_v9 = vpop.f32.mrf.mxu1  ;;  %5158 = vmatpush1.bf16.msra.mxu0 %v7154_v4  ;;  %v7204_v59 = vld [vmem:[%s10300_s5 + $0x204] ss:$16 sps:$4 sm:$0xff]   ;;  %v7208_v16 = vld [vmem:[%s10300_s5 + $0x3e0] ss:$16 sps:$4 sm:$0xff]  }
 0x239   :  { %v3032_v60 = vadd.f32 %v3031_v25, %v9105_v32  ;;  %v9176_v61 = vadd.f32 %v3094_v9, %v3022_v54  ;;  %v7162_v32 = vld [vmem:[%s10300_s5 + $0x2e4] ss:$16 sps:$4 sm:$0xff]   ;;  %5159 = vmatprep.subr.bf16.mxu0 %v7159_v3  ;;  %v7205_v9 = vld [vmem:[%s10300_s5 + $0x1a0] ss:$16 sps:$4 sm:$0xff]  }
 0x23a   :  { %v3098_v62 = vpop.f32.mrf.mxu1  ;;  %5196 = vmatprep.subr.bf16.mxu1 %v7162_v32  ;;  %v7195_v54 = vld [vmem:[%s10300_s5 + $0x1e4] ss:$16 sps:$4 sm:$0xff]   ;;  %v7214_v32 = vld [vmem:[%s10300_s5 + $0x3c0] ss:$16 sps:$4 sm:$0xff]  }
 0x23b   :  { %v9181_v39 = vadd.f32 %v3098_v62, %v3026_v38  ;;  %5197 = vmatpush1.bf16.msra.mxu1 %v7160_v6  ;;  %v7196_v38 = vld [vmem:[%s10300_s5 + $0x220] ss:$16 sps:$4 sm:$0xff]   ;;  %v7207_v42 = vld [vmem:[%s10300_s5 + $0x1a4] ss:$16 sps:$4 sm:$0xff]  }
 0x23c   :  { %v3100_v0 = vpop.f32.mrf.mxu1  ;;  %5160 = vmatpush1.bf16.msra.mxu0 %v7157_v2  ;;  %5198 = vmatprep.subr.bf16.mxu1 %v7168_v43  ;;  %v7213_v62 = vld [vmem:[%s10300_s5 + $0x184] ss:$16 sps:$4 sm:$0xff]  }
 0x23d   :  { %3535 = vmatmul.mubr.bf16.gmra.mxu1 %v8742_v14  ;;  %v9190_v28 = vadd.f32 %v3100_v0, %v3028_v5  ;;  %v7165_v14 = vld [vmem:[%s10300_s5 + $0x84] ss:$16 sps:$4 sm:$0xff]   ;;  %v7202_v5 = vld [vmem:[%s10300_s5 + $0x200] ss:$16 sps:$4 sm:$0xff]  }
 0x23e   :  { %v3102_v41 = vpop.f32.mrf.mxu1  ;;  %5161 = vmatprep.subr.bf16.mxu0 %v7165_v14  ;;  %v7216_v0 = vld [vmem:[%s10300_s5 + $0x3c4] ss:$16 sps:$4 sm:$0xff]  }
 0x23f   :  { %v9198_v7 = vadd.f32 %v3102_v41, %v3030_v57  ;;  %5199 = vmatpush1.bf16.msra.mxu1 %v7166_v55  ;;  %v7210_v57 = vld [vmem:[%s10300_s5 + $0x3e4] ss:$16 sps:$4 sm:$0xff]   ;;  %v7220_v55 = vld [vmem:[%s10300_s5 + $0x3a0] ss:$16 sps:$4 sm:$0xff]  }
 0x240   :  { %v3104_v47 = vpop.f32.mrf.mxu1  ;;  %5162 = vmatpush1.bf16.msra.mxu0 %v7163_v15  ;;  %5200 = vmatprep.subr.bf16.mxu1 %v7174_v18  ;;  %v7219_v14 = vld [vmem:[%s10300_s5 + $0x164] ss:$16 sps:$4 sm:$0xff]   ;;  %v7217_v15 = vld [vmem:[%s10300_s5 + $0x160] ss:$16 sps:$4 sm:$0xff]  }
 0x241   :  { %v9206_v13 = vadd.f32 %v3104_v47, %v3032_v60  ;;  %5163 = vmatprep.subr.bf16.mxu0 %v7171_v1  ;;  %v7225_v18 = vld [vmem:[%s10300_s5 + $0x144] ss:$16 sps:$4 sm:$0xff]  }
 0x243   :  { %5201 = vmatpush1.bf16.msra.mxu1 %v7172_v22 }
 0x244   :  { %5164 = vmatpush1.bf16.msra.mxu0 %v7169_v36  ;;  %5202 = vmatprep.subr.bf16.mxu1 %v7180_v17 }
 0x245   :  { %5165 = vmatprep.subr.bf16.mxu0 %v7177_v48  ;;  %v7228_v48 = vld [vmem:[%s10300_s5 + $0x384] ss:$16 sps:$4 sm:$0xff]  }
 0x247   :  { %5203 = vmatpush1.bf16.msra.mxu1 %v7178_v24 }
 0x248   :  { %5166 = vmatpush1.bf16.msra.mxu0 %v7175_v11  ;;  %5204 = vmatprep.subr.bf16.mxu1 %v7186_v12  ;;  %v7226_v11 = vld [vmem:[%s10300_s5 + $0x380] ss:$16 sps:$4 sm:$0xff]  }
 0x249   :  { %5167 = vmatprep.subr.bf16.mxu0 %v7183_v46 }
 0x24b   :  { %5205 = vmatpush1.bf16.msra.mxu1 %v7184_v23 }
 0x24c   :  { %5168 = vmatpush1.bf16.msra.mxu0 %v7181_v20  ;;  %5206 = vmatprep.subr.bf16.mxu1 %v7192_v50 }
 0x24d   :  { %5169 = vmatprep.subr.bf16.mxu0 %v7189_v33  ;;  %v7231_v33 = vld [vmem:[%s10300_s5 + $0x124] ss:$16 sps:$4 sm:$0xff]  }
 0x24f   :  { %5207 = vmatpush1.bf16.msra.mxu1 %v7190_v10  ;;  %v7232_v10 = vld [vmem:[%s10300_s5 + $0x360] ss:$16 sps:$4 sm:$0xff]  }
 0x250   :  { %5170 = vmatpush1.bf16.msra.mxu0 %v7187_v35  ;;  %5208 = vmatprep.subr.bf16.mxu1 %v7198_v21  ;;  %v7229_v35 = vld [vmem:[%s10300_s5 + $0x120] ss:$16 sps:$4 sm:$0xff]  }
 0x251   :  { %5171 = vmatprep.subr.bf16.mxu0 %v7195_v54 }
 0x253   :  { %5209 = vmatpush1.bf16.msra.mxu1 %v7196_v38  ;;  %v7237_v38 = vld [vmem:[%s10300_s5 + $0x104] ss:$16 sps:$4 sm:$0xff]  }
 0x254   :  { %5172 = vmatpush2.bf16.msra.mxu0 %v7193_v45  ;;  %5210 = vmatprep.subr.bf16.mxu1 %v7204_v59 }
 0x255   :  { %5173 = vmatprep.subr.bf16.mxu0 %v7201_v8  ;;  %v7240_v8 = vld [vmem:[%s10300_s5 + $0x344] ss:$16 sps:$4 sm:$0xff]  }
 0x257   :  { %5211 = vmatpush1.bf16.msra.mxu1 %v7202_v5 }
 0x258   :  { %5174 = vmatpush2.bf16.msra.mxu0 %v7199_v29  ;;  %5212 = vmatprep.subr.bf16.mxu1 %v7210_v57  ;;  %v7238_v29 = vld [vmem:[%s10300_s5 + $0x340] ss:$16 sps:$4 sm:$0xff]  }
 0x259   :  { %5175 = vmatprep.subr.bf16.mxu0 %v7207_v42 }
 0x25b   :  { %v3141_v26 = vpop.f32.mrf.mxu0  ;;  %5213 = vmatpush2.bf16.msra.mxu1 %v7208_v16 }
 0x25c   :  { %v9287_v31 = vadd.f32 %v3141_v26, %v9123_v37  ;;  %5176 = vmatpush2.bf16.msra.mxu0 %v7205_v9  ;;  %5214 = vmatprep.subr.bf16.mxu1 %v7216_v0  ;;  %v7243_v9 = vld [vmem:[%s10300_s5 + $0x324] ss:$16 sps:$4 sm:$0xff]  }
 0x25d   :  { %v3143_v25 = vpop.f32.mrf.mxu0  ;;  %5177 = vmatprep.subr.bf16.mxu0 %v7213_v62 }
 0x25e   :  { %v9302_v37 = vadd.f32 %v3143_v25, %v9128_v19  ;;  %v7211_v19 = vld [vmem:[%s10300_s5 + $0x180] ss:$16 sps:$4 sm:$0xff]  }
 0x25f   :  { %v3145_v60 = vpop.f32.mrf.mxu0  ;;  %5215 = vmatpush2.bf16.msra.mxu1 %v7214_v32  ;;  %v7249_v32 = vld [vmem:[%s10300_s5 + $0x304] ss:$16 sps:$4 sm:$0xff]  }
 0x260   :  { %v9305_v4 = vadd.f32 %v3145_v60, %v9133_v44  ;;  %5178 = vmatpush2.bf16.msra.mxu0 %v7211_v19  ;;  %v7241_v60 = vld [vmem:[%s10300_s5 + $0x320] ss:$16 sps:$4 sm:$0xff]  }
 0x261   :  { %v3147_v3 = vpop.f32.mrf.mxu0  ;;  %5179 = vmatprep.subr.bf16.mxu0 %v7219_v14 }
 0x262   :  { %v9322_v2 = vadd.f32 %v3147_v3, %v9136_v52  ;;  %v7222_v52 = vld [vmem:[%s10300_s5 + $0x3a4] ss:$16 sps:$4 sm:$0xff]  }
 0x263   :  { %v3151_v6 = vpop.f32.mrf.mxu0  ;;  %v9341_v36 = vpop.f32.mrf.mxu1  ;;  %5216 = vmatprep.subr.bf16.mxu1 %v7222_v52  ;;  %v7247_v52 = vld [vmem:[%s10300_s5 + $0x300] ss:$16 sps:$4 sm:$0xff]  }
 0x264   :  { %v9327_v47 = vadd.f32 %v3151_v6, %v9139_v49  ;;  %5180 = vmatpush2.bf16.msra.mxu0 %v7217_v15  ;;  %5217 = vmatpush2.bf16.msra.mxu1 %v7220_v55 }
 0x265   :  { %v3153_v43 = vpop.f32.mrf.mxu0  ;;  %v9361_v24 = vpop.f32.mrf.mxu1  ;;  %5181 = vmatprep.subr.bf16.mxu0 %v7225_v18  ;;  %5218 = vmatprep.subr.bf16.mxu1 %v7228_v48 }
 0x266   :  { %v9344_v49 = vadd.f32 %v3153_v43, %v9144_v30  ;;  %v7223_v30 = vld [vmem:[%s10300_s5 + $0x140] ss:$16 sps:$4 sm:$0xff]   ;;  %v7258_v43 = vld [vmem:[%s10300_s5 + $0x6e4] ss:$16 sps:$4 sm:$0xff]  }
 0x267   :  { %v3155_v1 = vpop.f32.mrf.mxu0  ;;  %v9385_v54 = vpop.f32.mrf.mxu1 }
 0x268   :  { %v9347_v22 = vadd.f32 %v3155_v1, %v9149_v34  ;;  %5182 = vmatpush2.bf16.msra.mxu0 %v7223_v30  ;;  %5219 = vmatpush2.bf16.msra.mxu1 %v7226_v11 }
 0x269   :  { %v3157_v17 = vpop.f32.mrf.mxu0  ;;  %5183 = vmatprep.subr.bf16.mxu0 %v7231_v33  ;;  %v9405_v5 = vpop.f32.mrf.mxu1 }
 0x26a   :  { %v9366_v46 = vadd.f32 %v3157_v17, %v9152_v27  ;;  %v7234_v27 = vld [vmem:[%s10300_s5 + $0x364] ss:$16 sps:$4 sm:$0xff]  }
 0x26b   :  { %v3161_v12 = vpop.f32.mrf.mxu0  ;;  %5220 = vmatprep.subr.bf16.mxu1 %v7234_v27  ;;  %v9426_v62 = vpop.f32.mrf.mxu1 }
 0x26c   :  { %v9371_v23 = vadd.f32 %v3161_v12, %v9155_v40  ;;  %5184 = vmatpush2.bf16.msra.mxu0 %v7229_v35  ;;  %5221 = vmatpush2.bf16.msra.mxu1 %v7232_v10 }
 0x26d   :  { %v3163_v50 = vpop.f32.mrf.mxu0  ;;  %5185 = vmatprep.subr.bf16.mxu0 %v7237_v38  ;;  %5222 = vmatprep.subr.bf16.mxu1 %v7240_v8  ;;  %v9437_v6 = vpop.f32.mrf.mxu1 }
 0x26e   :  { %10317 = vst [vmem:[#allocation3_spill] sm:$0xff] %v9371_v23  ;;  %v9388_v40 = vadd.f32 %v3163_v50, %v9163_v51  ;;  %v7235_v51 = vld [vmem:[%s10300_s5 + $0x100] ss:$16 sps:$4 sm:$0xff]  }
 0x26f   :  { %v3165_v21 = vpop.f32.mrf.mxu0  ;;  %v9452_v15 = vpop.f32.mrf.mxu1 }
 0x270   :  { %10318 = vst [vmem:[#allocation4_spill] sm:$0xff] %v9388_v40  ;;  %v9391_v45 = vadd.f32 %v3165_v21, %v9170_v58  ;;  %5186 = vmatpush2.bf16.msra.mxu0 %v7235_v51  ;;  %5223 = vmatpush2.bf16.msra.mxu1 %v7238_v29 }
 0x271   :  { %v3167_v59 = vpop.f32.mrf.mxu0  ;;  %5224 = vmatprep.subr.bf16.mxu1 %v7243_v9  ;;  %v9454_v55 = vpop.f32.mrf.mxu1 }
 0x272   :  { %10319 = vst [vmem:[#allocation5_spill] sm:$0xff] %v9391_v45  ;;  %v9410_v26 = vadd.f32 %v3167_v59, %v9176_v61  ;;  %v7246_v61 = vld [vmem:[%s10300_s5 + $0x4e4] ss:$16 sps:$4 sm:$0xff]  }
 0x273   :  { %v3171_v42 = vpop.f32.mrf.mxu0  ;;  %5237 = vmatprep.subr.bf16.mxu0 %v7246_v61 }
 0x274   :  { %10320 = vst [vmem:[#allocation6_spill] sm:$0xff] %v9410_v26  ;;  %v9415_v25 = vadd.f32 %v3171_v42, %v9181_v39  ;;  %5225 = vmatpush2.bf16.msra.mxu1 %v7241_v60 }
 0x275   :  { %v3173_v16 = vpop.f32.mrf.mxu0  ;;  %5226 = vmatprep.subr.bf16.mxu1 %v7249_v32 }
 0x276   :  { %10321 = vst [vmem:[#allocation7_spill] sm:$0xff] %v9415_v25  ;;  %v9429_v0 = vadd.f32 %v3173_v16, %v9190_v28 }
 0x277   :  { %v3175_v39 = vpop.f32.mrf.mxu0 }
 0x278   :  { %10322 = vst [vmem:[#allocation8_spill] sm:$0xff] %v9429_v0  ;;  %v9432_v3 = vadd.f32 %v3175_v39, %v9198_v7  ;;  %5227 = vmatpush2.bf16.msra.mxu1 %v7247_v52 }
 0x279   :  { %v3177_v19 = vpop.f32.mrf.mxu0  ;;  %5278 = vmatprep.subr.bf16.mxu1 %v7258_v43 }
 0x27a   :  { %10323 = vst [vmem:[#allocation9_spill] sm:$0xff] %v9432_v3  ;;  %v9442_v28 = vadd.f32 %v3177_v19, %v9206_v13  ;;  %v3234_v13 = vpop.f32.mrf.mxu1 }
 0x27c   :  { %10324 = vst [vmem:[#allocation10_spill] sm:$0xff] %v9442_v28  ;;  %v9456_v1 = vpop.f32.mrf.mxu1 }
 0x27e   :  { %v3238_v18 = vpop.f32.mrf.mxu1 }
 0x280   :  { %v9458_v48 = vpop.f32.mrf.mxu1 }
 0x282   :  { %v3244_v17 = vpop.f32.mrf.mxu1 }
 0x284   :  { %v9460_v30 = vpop.f32.mrf.mxu1 }
 0x286   :  { %v3248_v12 = vpop.f32.mrf.mxu1 }
 0x288   :  { %v9462_v50 = vpop.f32.mrf.mxu1 }
 0x289   :  { %10325 = vst [vmem:[#allocation11_spill] sm:$0xff] %v9462_v50 }
 0x29c   :  { %v3287_v11 = vpop.f32.mrf.mxu0 }
 0x29e   :  { %v3289_v33 = vpop.f32.mrf.mxu0 }
 0x2a0   :  { %v3291_v27 = vpop.f32.mrf.mxu0 }
 0x2a2   :  { %v3293_v35 = vpop.f32.mrf.mxu0 }
 0x2a3   :  { %v3294_v40 = vadd.f32 %v3293_v35, %v9405_v5 }
 0x2a4   :  { %v3297_v10 = vpop.f32.mrf.mxu0  ;;  %v3360_v21 = vpop.f32.mrf.mxu1 }
 0x2a5   :  { %v3298_v5 = vadd.f32 %v3297_v10, %v9426_v62 }
 0x2a6   :  { %v9464_v38 = vpop.f32.mrf.mxu0  ;;  %v3362_v8 = vpop.f32.mrf.mxu1 }
 0x2a8   :  { %v3301_v59 = vpop.f32.mrf.mxu0  ;;  %v3364_v51 = vpop.f32.mrf.mxu1 }
 0x2a9   :  { %v3302_v35 = vadd.f32 %v3301_v59, %v9452_v15 }
 0x2aa   :  { %v9466_v29 = vpop.f32.mrf.mxu0  ;;  %v3366_v42 = vpop.f32.mrf.mxu1 }
 0x2ab   :  { %v3367_v45 = vadd.f32 %v3366_v42, %v3294_v40 }
 0x2ac   :  { %v3307_v9 = vpop.f32.mrf.mxu0  ;;  %v9468_v61 = vpop.f32.mrf.mxu1 }
 0x2ad   :  { %v3308_v16 = vadd.f32 %v3307_v9, %v3234_v13  ;;  %v3371_v10 = vadd.f32 %v9468_v61, %v3298_v5 }
 0x2ae   :  { %v9470_v60 = vpop.f32.mrf.mxu0  ;;  %v9472_v39 = vpop.f32.mrf.mxu1 }
 0x2b0   :  { %v3311_v19 = vpop.f32.mrf.mxu0  ;;  %v3374_v32 = vpop.f32.mrf.mxu1 }
 0x2b1   :  { %v3312_v52 = vadd.f32 %v3311_v19, %v3238_v18  ;;  %v3375_v15 = vadd.f32 %v3374_v32, %v3302_v35 }
 0x2b2   :  { %v9474_v43 = vpop.f32.mrf.mxu0  ;;  %v9476_v7 = vpop.f32.mrf.mxu1 }
 0x2b4   :  { %v3317_v14 = vpop.f32.mrf.mxu0  ;;  %v3380_v57 = vpop.f32.mrf.mxu1 }
 0x2b5   :  { %v3318_v58 = vadd.f32 %v3317_v14, %v3244_v17  ;;  %v9478_v20 = vadd.f32 %v3380_v57, %v3308_v16 }
 0x2b6   :  { %v9480_v34 = vpop.f32.mrf.mxu0  ;;  %v9482_v41 = vpop.f32.mrf.mxu1 }
 0x2b7   :  { %10326 = vst [vmem:[#allocation12_spill] sm:$0xff] %v9480_v34 }
 0x2b8   :  { %v3321_v13 = vpop.f32.mrf.mxu0  ;;  %v3384_v9 = vpop.f32.mrf.mxu1 }
 0x2b9   :  { %v3322_v44 = vadd.f32 %v3321_v13, %v3248_v12  ;;  %v9484_v53 = vadd.f32 %v3384_v9, %v3312_v52  ;;  %v3288_v52 = vadd.f32 %v3287_v11, %v9341_v36  ;;  %v3292_v13 = vadd.f32 %v3291_v27, %v9385_v54 }
 0x2ba   :  { %v9486_v28 = vpop.f32.mrf.mxu1  ;;  %v9494_v57 = vpop.f32.mrf.mxu0 }
 0x2bb   :  { %10330 = vst [vmem:[#allocation16_spill] sm:$0xff] %v9494_v57 }
 0x2bc   :  { %v3390_v18 = vpop.f32.mrf.mxu1 }
 0x2bd   :  { %v9488_v19 = vadd.f32 %v3390_v18, %v3318_v58  ;;  %v3290_v18 = vadd.f32 %v3289_v33, %v9361_v24  ;;  %v3569_v24 = vld [vmem:[%s10301_s4] sm:$0x3] }
 0x2be   :  { %v9490_v0 = vpop.f32.mrf.mxu1  ;;  %v9515_v62 = vrot.slane %v3569_v24, %v8128_v56 }
 0x2bf   :  { %10327 = vst [vmem:[#allocation13_spill] sm:$0xff] %v9488_v19  ;;  %10328 = vst [vmem:[#allocation14_spill] sm:$0xff] %v9490_v0  ;;  %v3363_v0 = vadd.f32 %v3362_v8, %v3290_v18 }
 0x2c0   :  { %v3394_v3 = vpop.f32.mrf.mxu1 }
 0x2c1   :  { %v9492_v14 = vadd.f32 %v3394_v3, %v3322_v44  ;;  %v3361_v44 = vadd.f32 %v3360_v21, %v3288_v52  ;;  %v3365_v3 = vadd.f32 %v3364_v51, %v3292_v13 }
 0x2c2   :  { %v9496_v26 = vpop.f32.mrf.mxu1 }
 0x2c3   :  { %10329 = vst [vmem:[#allocation15_spill] sm:$0xff] %v9492_v14  ;;  %10331 = vst [vmem:[#allocation17_spill] sm:$0xff] %v9496_v26 }
 0x2dd   :  { %v3433_v17 = vpop.f32.mrf.mxu0 }
 0x2de   :  { %v3434_v23 = vadd.f32 %v3433_v17, %v3361_v44 }
 0x2df   :  { %v3435_v16 = vpop.f32.mrf.mxu0 }
 0x2e0   :  { %v3436_v34 = vadd.f32 %v3435_v16, %v3363_v0 }
 0x2e1   :  { %v3437_v25 = vpop.f32.mrf.mxu0 }
 0x2e2   :  { %v3438_v57 = vadd.f32 %v3437_v25, %v3365_v3  ;;  %v3300_v25 = vadd.f32 %v9464_v38, %v9437_v6 }
 0x2e3   :  { %v3439_v12 = vpop.f32.mrf.mxu0 }
 0x2e4   :  { %v3440_v36 = vadd.f32 %v3439_v12, %v3367_v45  ;;  %v9512_v45 = vrot.slane %v3569_v24, %v8131_v63  ;;  %v3373_v6 = vadd.f32 %v9472_v39, %v3300_v25 }
 0x2e5   :  { %v3443_v9 = vpop.f32.mrf.mxu0  ;;  %v3506_v58 = vpop.f32.mrf.mxu1 }
 0x2e6   :  { %v3507_v11 = vadd.f32 %v3506_v58, %v3434_v23  ;;  %v3304_v23 = vadd.f32 %v9466_v29, %v9454_v55  ;;  %v3444_v42 = vadd.f32 %v3443_v9, %v3371_v10 }
 0x2e7   :  { %v3445_v14 = vpop.f32.mrf.mxu0  ;;  %v3508_v19 = vpop.f32.mrf.mxu1 }
 0x2e8   :  { %v3509_v21 = vadd.f32 %v3508_v19, %v3436_v34  ;;  %v10332_v34 = vmax.f32 %v9287_v31, %v9305_v4  ;;  %v3377_v29 = vadd.f32 %v9476_v7, %v3304_v23  ;;  %v3446_v16 = vadd.f32 %v3445_v14, %v3373_v6  ;;  %v10337_v6 = vld [vmem:[#allocation11_spill] sm:$0xff] }
 0x2e9   :  { %v3447_v26 = vpop.f32.mrf.mxu0  ;;  %v3510_v50 = vpop.f32.mrf.mxu1 }
 0x2ea   :  { %v3511_v54 = vadd.f32 %v3510_v50, %v3438_v57  ;;  %v3448_v19 = vadd.f32 %v3447_v26, %v3375_v15  ;;  %v10333_v57 = vmax.f32 %v9302_v37, %v9322_v2  ;;  %v7244_v37 = vld [vmem:[%s10300_s5 + $0x4e0] ss:$16 sps:$4 sm:$0xff]   ;;  %v3310_v2 = vadd.f32 %v9470_v60, %v9456_v1 }
 0x2eb   :  { %v3449_v33 = vpop.f32.mrf.mxu0  ;;  %v3512_v27 = vpop.f32.mrf.mxu1  ;;  %v7253_v15 = vld [vmem:[%s10300_s5 + $0x4a0] ss:$16 sps:$4 sm:$0xff]  }
 0x2ec   :  { %v3547_v40 = vmax.f32 %v3507_v11, %v3511_v54  ;;  %v3513_v8 = vadd.f32 %v3512_v27, %v3440_v36  ;;  %v3450_v31 = vadd.f32 %v3449_v33, %v3377_v29  ;;  %v7252_v36 = vld [vmem:[%s10300_s5 + $0x4c4] ss:$16 sps:$4 sm:$0xff]   ;;  %v3314_v11 = vadd.f32 %v9474_v43, %v9458_v48 }
 0x2ed   :  { %v3453_v0 = vpop.f32.mrf.mxu0  ;;  %v3516_v50 = vpop.f32.mrf.mxu1  ;;  %v10334_v54 = vmax.f32 %v9327_v47, %v9347_v22  ;;  %v3383_v1 = vadd.f32 %v9482_v41, %v3310_v2  ;;  %v10335_v48 = vmax.f32 %v9344_v49, %v9366_v46  ;;  %v7250_v22 = vld [vmem:[%s10300_s5 + $0x4c0] ss:$16 sps:$4 sm:$0xff]  }
 0x2ee   :  { %v3561_v59 = vmax.f32 %v10332_v34, %v3547_v40  ;;  %v3548_v51 = vmax.f32 %v3509_v21, %v3513_v8  ;;  %v3517_v4 = vadd.f32 %v3516_v50, %v3444_v42  ;;  %v3387_v27 = vadd.f32 %v9486_v28, %v3314_v11  ;;  %v7256_v34 = vld [vmem:[%s10300_s5 + $0x6e0] ss:$16 sps:$4 sm:$0xff]  }
 0x2ef   :  { %v3455_v38 = vpop.f32.mrf.mxu0  ;;  %v3518_v55 = vpop.f32.mrf.mxu1  ;;  %v3454_v35 = vadd.f32 %v3453_v0, %v9478_v20  ;;  %v7255_v20 = vld [vmem:[%s10300_s5 + $0x4a4] ss:$16 sps:$4 sm:$0xff]  }
 0x2f0   :  { %v3562_v17 = vmax.f32 %v10333_v57, %v3548_v51  ;;  %v3581_v61 = vadd.f32 %v9512_v45, %v3561_v59  ;;  %v3519_v18 = vadd.f32 %v3518_v55, %v3446_v16  ;;  %v3456_v41 = vadd.f32 %v3455_v38, %v3383_v1  ;;  %v10336_v59 = vld [vmem:[#allocation12_spill] sm:$0xff]  ;;  %v10340_v16 = vld [vmem:[#allocation5_spill] sm:$0xff] }
 0x2f1   :  { %v3457_v32 = vpop.f32.mrf.mxu0  ;;  %v3520_v12 = vpop.f32.mrf.mxu1  ;;  %v3320_v51 = vadd.f32 %v10336_v59, %v9460_v30  ;;  %v10338_v38 = vld [vmem:[#allocation16_spill] sm:$0xff] }
 0x2f2   :  { %v3521_v52 = vadd.f32 %v3520_v12, %v3448_v19  ;;  %v3582_v39 = vadd.f32 %v9515_v62, %v3562_v17  ;;  %v9535_v14 = vpack.c.bf16 %v3581_v61, %v3581_v61  ;;  %v3458_v21 = vadd.f32 %v3457_v32, %v9484_v53  ;;  %v7261_v19 = vld [vmem:[%s10300_s5 + $0x484] ss:$16 sps:$4 sm:$0xff]   ;;  %v10339_v17 = vld [vmem:[#allocation3_spill] sm:$0xff] }
 0x2f3   :  { %v3459_v13 = vpop.f32.mrf.mxu0  ;;  %v3522_v58 = vpop.f32.mrf.mxu1  ;;  %v3324_v55 = vadd.f32 %v10338_v38, %v10337_v6  ;;  %v7264_v57 = vld [vmem:[%s10300_s5 + $0x6c4] ss:$16 sps:$4 sm:$0xff]   ;;  %v10341_v61 = vmax.f32 %v10339_v17, %v10340_v16  ;;  %v7274_v6 = vld [vmem:[%s10300_s5 + $0x680] ss:$16 sps:$4 sm:$0xff]  }
 0x2f4   :  { %v3551_v7 = vmax.f32 %v3517_v4, %v3521_v52  ;;  %v3523_v9 = vadd.f32 %v3522_v58, %v3450_v31  ;;  %v9528_v26 = vpack.c.bf16 %v3582_v39, %v3582_v39  ;;  %v3460_v28 = vadd.f32 %v3459_v13, %v3387_v27  ;;  %v10342_v12 = vld [vmem:[#allocation14_spill] sm:$0xff]  ;;  %v10343_v4 = vld [vmem:[#allocation17_spill] sm:$0xff]  ;;  %v10346_v2 = vld [vmem:[#allocation4_spill] sm:$0xff] }
 0x2f5   :  { %v3463_v44 = vpop.f32.mrf.mxu0  ;;  %v3526_v3 = vpop.f32.mrf.mxu1  ;;  %v3393_v31 = vadd.f32 %v10342_v12, %v3320_v51  ;;  %v3397_v52 = vadd.f32 %v10343_v4, %v3324_v55  ;;  %v10344_v39 = vld [vmem:[#allocation13_spill] sm:$0xff]  ;;  %v7267_v1 = vld [vmem:[%s10300_s5 + $0x464] ss:$16 sps:$4 sm:$0xff]   ;;  %v7271_v51 = vld [vmem:[%s10300_s5 + $0x440] ss:$16 sps:$4 sm:$0xff]  }
 0x2f6   :  { %v3563_v24 = vmax.f32 %v10334_v54, %v3551_v7  ;;  %v3552_v5 = vmax.f32 %v3519_v18, %v3523_v9  ;;  %5187 = vmatprep.mubr.bf16.mxu0 %v9528_v26  ;;  %v3527_v53 = vadd.f32 %v3526_v3, %v3454_v35  ;;  %v3464_v13 = vadd.f32 %v3463_v44, %v10344_v39  ;;  %v10345_v7 = vld [vmem:[#allocation15_spill] sm:$0xff]  ;;  %v10347_v3 = vld [vmem:[#allocation6_spill] sm:$0xff] }
 0x2f7   :  { %v3465_v60 = vpop.f32.mrf.mxu0  ;;  %v3528_v33 = vpop.f32.mrf.mxu1  ;;  %5188 = vmatmul.mubr.bf16.vlgmr.msra.gmra.mxu0 %v9535_v14  ;;  %v7259_v54 = vld [vmem:[%s10300_s5 + $0x480] ss:$16 sps:$4 sm:$0xff]   ;;  %v7282_v38 = vld [vmem:[%s10300_s5 + $0x664] ss:$16 sps:$4 sm:$0xff]  }
 0x2f8   :  { %v3564_v47 = vmax.f32 %v10335_v48, %v3552_v5  ;;  %5238 = vmatpush1.bf16.msra.mxu0 %v7244_v37  ;;  %v3583_v43 = vadd.f32 %v9512_v45, %v3563_v24  ;;  %v3529_v23 = vadd.f32 %v3528_v33, %v3456_v41  ;;  %v7262_v44 = vld [vmem:[%s10300_s5 + $0x6c0] ss:$16 sps:$4 sm:$0xff]   ;;  %v3466_v24 = vadd.f32 %v3465_v60, %v3393_v31  ;;  %v7270_v33 = vld [vmem:[%s10300_s5 + $0x6a4] ss:$16 sps:$4 sm:$0xff]  }
 0x2f9   :  { %v3530_v40 = vpop.f32.mrf.mxu1  ;;  %5239 = vmatprep.subr.bf16.mxu0 %v7252_v36  ;;  %v3467_v46 = vpop.f32.mrf.mxu0  ;;  %v10348_v36 = vmax.f32 %v10346_v2, %v10347_v3  ;;  %v7285_v17 = vld [vmem:[%s10300_s5 + $0x404] ss:$16 sps:$4 sm:$0xff]   ;;  %v7283_v16 = vld [vmem:[%s10300_s5 + $0x400] ss:$16 sps:$4 sm:$0xff]  }
 0x2fa   :  { %v3531_v8 = vadd.f32 %v3530_v40, %v3458_v21  ;;  %v3584_v49 = vadd.f32 %v9515_v62, %v3564_v47  ;;  %v9574_v29 = vpack.c.bf16 %v3583_v43, %v3583_v43  ;;  %v3468_v9 = vadd.f32 %v3467_v46, %v10345_v7  ;;  %v7265_v43 = vld [vmem:[%s10300_s5 + $0x460] ss:$16 sps:$4 sm:$0xff]   ;;  %v7297_v4 = vld [vmem:[%s10300_s5 + $0x5c4] ss:$16 sps:$4 sm:$0xff]  }
 0x2fb   :  { %v3532_v25 = vpop.f32.mrf.mxu1  ;;  %v3469_v58 = vpop.f32.mrf.mxu0  ;;  %v7289_v12 = vld [vmem:[%s10300_s5 + $0x5e0] ss:$16 sps:$4 sm:$0xff]   ;;  %v7309_v2 = vld [vmem:[%s10300_s5 + $0x584] ss:$16 sps:$4 sm:$0xff]  }
 0x2fc   :  { %v3555_v0 = vmax.f32 %v3527_v53, %v3531_v8  ;;  %v3533_v50 = vadd.f32 %v3532_v25, %v3460_v28  ;;  %5240 = vmatpush1.bf16.msra.mxu0 %v7250_v22  ;;  %v9562_v10 = vpack.c.bf16 %v3584_v49, %v3584_v49  ;;  %v3470_v27 = vadd.f32 %v3469_v58, %v3397_v52  ;;  %v7273_v28 = vld [vmem:[%s10300_s5 + $0x444] ss:$16 sps:$4 sm:$0xff]   ;;  %v10349_v8 = vld [vmem:[#allocation7_spill] sm:$0xff]  ;;  %v10350_v49 = vld [vmem:[#allocation9_spill] sm:$0xff] }
 0x2fd   :  { %v3536_v42 = vpop.f32.mrf.mxu1  ;;  %5241 = vmatprep.subr.bf16.mxu0 %v7255_v20  ;;  %v7268_v20 = vld [vmem:[%s10300_s5 + $0x6a0] ss:$16 sps:$4 sm:$0xff]   ;;  %v7276_v53 = vld [vmem:[%s10300_s5 + $0x684] ss:$16 sps:$4 sm:$0xff]   ;;  %v10351_v46 = vmax.f32 %v10349_v8, %v10350_v49  ;;  %v7340_v49 = vld [vmem:[%s10300_s5 + $0xe8] ss:$16 sps:$4 sm:$0xff]  }
 0x2fe   :  { %v3565_v32 = vmax.f32 %v10341_v61, %v3555_v0  ;;  %v3556_v30 = vmax.f32 %v3529_v23, %v3533_v50  ;;  %5228 = vmatprep.mubr.bf16.mxu1 %v9562_v10  ;;  %v3537_v35 = vadd.f32 %v3536_v42, %v3464_v13  ;;  %v10352_v50 = vld [vmem:[#allocation8_spill] sm:$0xff] }
 0x2ff   :  { %v3538_v18 = vpop.f32.mrf.mxu1  ;;  %5229 = vmatmul.mubr.bf16.vlgmr.msra.gmra.mxu1 %v9574_v29  ;;  %v7277_v42 = vld [vmem:[%s10300_s5 + $0x420] ss:$16 sps:$4 sm:$0xff]   ;;  %v7300_v52 = vld [vmem:[%s10300_s5 + $0x604] ss:$16 sps:$4 sm:$0xff]  }
 0x300   :  { %v9592_v37 = vadd.f32 %v9512_v45, %v3565_v32  ;;  %v3566_v11 = vmax.f32 %v10348_v36, %v3556_v30  ;;  %5242 = vmatpush1.bf16.msra.mxu0 %v7253_v15  ;;  %5279 = vmatpush1.bf16.msra.mxu1 %v7256_v34  ;;  %v3539_v47 = vadd.f32 %v3538_v18, %v3466_v24  ;;  %v10353_v15 = vld [vmem:[#allocation10_spill] sm:$0xff] }
 0x301   :  { %v3540_v5 = vpop.f32.mrf.mxu1  ;;  %5243 = vmatprep.subr.bf16.mxu0 %v7261_v19  ;;  %5280 = vmatprep.subr.bf16.mxu1 %v7264_v57  ;;  %v10354_v34 = vmax.f32 %v10352_v50, %v10353_v15  ;;  %v7280_v19 = vld [vmem:[%s10300_s5 + $0x660] ss:$16 sps:$4 sm:$0xff]   ;;  %v7291_v32 = vld [vmem:[%s10300_s5 + $0x5e4] ss:$16 sps:$4 sm:$0xff]   ;;  %v7351_v15 = vld [vmem:[%s10300_s5 + $0xac] ss:$16 sps:$4 sm:$0xff]  }
 0x302   :  { %v3541_v21 = vadd.f32 %v3540_v5, %v3468_v9  ;;  %v3586_v48 = vadd.f32 %v9515_v62, %v3566_v11  ;;  %v7286_v61 = vld [vmem:[%s10300_s5 + $0x640] ss:$16 sps:$4 sm:$0xff]   ;;  %v7294_v30 = vld [vmem:[%s10300_s5 + $0x624] ss:$16 sps:$4 sm:$0xff]  }
 0x303   :  { %v3542_v22 = vpop.f32.mrf.mxu1  ;;  %v7292_v31 = vld [vmem:[%s10300_s5 + $0x620] ss:$16 sps:$4 sm:$0xff]   ;;  %v7303_v58 = vld [vmem:[%s10300_s5 + $0x5a4] ss:$16 sps:$4 sm:$0xff]  }
 0x304   :  { %v3559_v41 = vmax.f32 %v3537_v35, %v3541_v21  ;;  %v3543_v60 = vadd.f32 %v3542_v22, %v3470_v27  ;;  %5244 = vmatpush1.bf16.msra.mxu0 %v7259_v54  ;;  %5281 = vmatpush1.bf16.msra.mxu1 %v7262_v44  ;;  %v9613_v40 = vpack.c.bf16 %v3586_v48, %v3586_v48  ;;  %v7295_v39 = vld [vmem:[%s10300_s5 + $0x5c0] ss:$16 sps:$4 sm:$0xff]   ;;  %v7306_v18 = vld [vmem:[%s10300_s5 + $0x7e4] ss:$16 sps:$4 sm:$0xff]  }
 0x305   :  { %5245 = vmatprep.subr.bf16.mxu0 %v7267_v1  ;;  %5282 = vmatprep.subr.bf16.mxu1 %v7270_v33  ;;  %v7298_v13 = vld [vmem:[%s10300_s5 + $0x600] ss:$16 sps:$4 sm:$0xff]   ;;  %v7312_v3 = vld [vmem:[%s10300_s5 + $0x7c4] ss:$16 sps:$4 sm:$0xff]  }
 0x306   :  { %v3567_v25 = vmax.f32 %v10351_v46, %v3559_v41  ;;  %v3560_v23 = vmax.f32 %v3539_v47, %v3543_v60  ;;  %5269 = vmatprep.mubr.bf16.mxu0 %v9613_v40  ;;  %v7301_v7 = vld [vmem:[%s10300_s5 + $0x5a0] ss:$16 sps:$4 sm:$0xff]   ;;  %v7315_v54 = vld [vmem:[%s10300_s5 + $0x564] ss:$16 sps:$4 sm:$0xff]   ;;  %v9778_v46 = vpack.c.bf16 %v9592_v37, %v9592_v37  ;;  %v7346_v37 = vld [vmem:[%s10300_s5 + $0xc8] ss:$16 sps:$4 sm:$0xff]  }
 0x307   :  { %v7304_v9 = vld [vmem:[%s10300_s5 + $0x7e0] ss:$16 sps:$4 sm:$0xff]   ;;  %v7318_v44 = vld [vmem:[%s10300_s5 + $0x7a4] ss:$16 sps:$4 sm:$0xff]  }
 0x308   :  { %v9629_v0 = vadd.f32 %v9512_v45, %v3567_v25  ;;  %v3568_v59 = vmax.f32 %v10354_v34, %v3560_v23  ;;  %5246 = vmatpush1.bf16.msra.mxu0 %v7265_v43  ;;  %5283 = vmatpush1.bf16.msra.mxu1 %v7268_v20  ;;  %v7279_v45 = vld [vmem:[%s10300_s5 + $0x424] ss:$16 sps:$4 sm:$0xff]   ;;  %v7307_v36 = vld [vmem:[%s10300_s5 + $0x580] ss:$16 sps:$4 sm:$0xff]   ;;  %v7348_v23 = vld [vmem:[%s10300_s5 + $0xcc] ss:$16 sps:$4 sm:$0xff]  }
 0x309   :  { %5247 = vmatprep.subr.bf16.mxu0 %v7273_v28  ;;  %5284 = vmatprep.subr.bf16.mxu1 %v7276_v53  ;;  %v7310_v11 = vld [vmem:[%s10300_s5 + $0x7c0] ss:$16 sps:$4 sm:$0xff]   ;;  %v7321_v1 = vld [vmem:[%s10300_s5 + $0x544] ss:$16 sps:$4 sm:$0xff]   ;;  %v7342_v53 = vld [vmem:[%s10300_s5 + $0xec] ss:$16 sps:$4 sm:$0xff]  }
 0x30a   :  { %v3588_v55 = vadd.f32 %v9515_v62, %v3568_v59  ;;  %v7288_v62 = vld [vmem:[%s10300_s5 + $0x644] ss:$16 sps:$4 sm:$0xff]   ;;  %v7313_v24 = vld [vmem:[%s10300_s5 + $0x560] ss:$16 sps:$4 sm:$0xff]   ;;  %v7354_v34 = vld [vmem:[%s10300_s5 + $0x2ec] ss:$16 sps:$4 sm:$0xff]  }
 0x30b   :  { %v7316_v5 = vld [vmem:[%s10300_s5 + $0x7a0] ss:$16 sps:$4 sm:$0xff]   ;;  %v7324_v33 = vld [vmem:[%s10300_s5 + $0x784] ss:$16 sps:$4 sm:$0xff]   ;;  %v7349_v59 = vld [vmem:[%s10300_s5 + $0xa8] ss:$16 sps:$4 sm:$0xff]  }
 0x30c   :  { %5248 = vmatpush1.bf16.msra.mxu0 %v7271_v51  ;;  %5285 = vmatpush1.bf16.msra.mxu1 %v7274_v6  ;;  %v9653_v57 = vpack.c.bf16 %v3588_v55, %v3588_v55  ;;  %v7319_v27 = vld [vmem:[%s10300_s5 + $0x540] ss:$16 sps:$4 sm:$0xff]   ;;  %v7327_v21 = vld [vmem:[%s10300_s5 + $0x524] ss:$16 sps:$4 sm:$0xff]   ;;  %v9808_v51 = vpack.c.bf16 %v9629_v0, %v9629_v0  ;;  %v7357_v6 = vld [vmem:[%s10300_s5 + $0x8c] ss:$16 sps:$4 sm:$0xff]  }
 0x30d   :  { %5249 = vmatprep.subr.bf16.mxu0 %v7279_v45  ;;  %5286 = vmatprep.subr.bf16.mxu1 %v7282_v38  ;;  %v7322_v35 = vld [vmem:[%s10300_s5 + $0x780] ss:$16 sps:$4 sm:$0xff]   ;;  %v7330_v48 = vld [vmem:[%s10300_s5 + $0x764] ss:$16 sps:$4 sm:$0xff]   ;;  %v7360_v45 = vld [vmem:[%s10300_s5 + $0x2cc] ss:$16 sps:$4 sm:$0xff]  }
 0x30e   :  { %5310 = vmatprep.mubr.bf16.mxu1 %v9653_v57  ;;  %v7325_v47 = vld [vmem:[%s10300_s5 + $0x520] ss:$16 sps:$4 sm:$0xff]   ;;  %v7333_v41 = vld [vmem:[%s10300_s5 + $0x504] ss:$16 sps:$4 sm:$0xff]   ;;  %v7355_v38 = vld [vmem:[%s10300_s5 + $0x88] ss:$16 sps:$4 sm:$0xff]  }
 0x30f   :  { %v7328_v22 = vld [vmem:[%s10300_s5 + $0x760] ss:$16 sps:$4 sm:$0xff]   ;;  %v7336_v60 = vld [vmem:[%s10300_s5 + $0x744] ss:$16 sps:$4 sm:$0xff]   ;;  %v7358_v0 = vld [vmem:[%s10300_s5 + $0x2c8] ss:$16 sps:$4 sm:$0xff]  }
 0x310   :  { %5250 = vmatpush1.bf16.msra.mxu0 %v7277_v42  ;;  %5287 = vmatpush1.bf16.msra.mxu1 %v7280_v19  ;;  %v7331_v43 = vld [vmem:[%s10300_s5 + $0x500] ss:$16 sps:$4 sm:$0xff]   ;;  %v7339_v28 = vld [vmem:[%s10300_s5 + $0x724] ss:$16 sps:$4 sm:$0xff]   ;;  %v7363_v55 = vld [vmem:[%s10300_s5 + $0x6c] ss:$16 sps:$4 sm:$0xff]  }
 0x311   :  { %5251 = vmatprep.subr.bf16.mxu0 %v7285_v17  ;;  %5288 = vmatprep.subr.bf16.mxu1 %v7288_v62  ;;  %v7334_v20 = vld [vmem:[%s10300_s5 + $0x740] ss:$16 sps:$4 sm:$0xff]   ;;  %v7345_v25 = vld [vmem:[%s10300_s5 + $0x704] ss:$16 sps:$4 sm:$0xff]   ;;  %v7366_v42 = vld [vmem:[%s10300_s5 + $0x2ac] ss:$16 sps:$4 sm:$0xff]  }
 0x312   :  { %v7337_v8 = vld [vmem:[%s10300_s5 + $0x720] ss:$16 sps:$4 sm:$0xff]   ;;  %v7361_v19 = vld [vmem:[%s10300_s5 + $0x68] ss:$16 sps:$4 sm:$0xff]   ;;  %v7369_v17 = vld [vmem:[%s10300_s5 + $0x4c] ss:$16 sps:$4 sm:$0xff]  }
 0x313   :  { %v7343_v50 = vld [vmem:[%s10300_s5 + $0x700] ss:$16 sps:$4 sm:$0xff]   ;;  %v7372_v62 = vld [vmem:[%s10300_s5 + $0x28c] ss:$16 sps:$4 sm:$0xff]  }
 0x314   :  { %5252 = vmatpush1.bf16.msra.mxu0 %v7283_v16  ;;  %5289 = vmatpush1.bf16.msra.mxu1 %v7286_v61  ;;  %v7367_v16 = vld [vmem:[%s10300_s5 + $0x48] ss:$16 sps:$4 sm:$0xff]  }
 0x315   :  { %5253 = vmatprep.subr.bf16.mxu0 %v7291_v32  ;;  %5290 = vmatprep.subr.bf16.mxu1 %v7294_v30  ;;  %v7370_v61 = vld [vmem:[%s10300_s5 + $0x288] ss:$16 sps:$4 sm:$0xff]   ;;  %v7375_v32 = vld [vmem:[%s10300_s5 + $0x2c] ss:$16 sps:$4 sm:$0xff]  }
 0x316   :  { %v7378_v30 = vld [vmem:[%s10300_s5 + $0x26c] ss:$16 sps:$4 sm:$0xff]  }
 0x318   :  { %5254 = vmatpush2.bf16.msra.mxu0 %v7289_v12  ;;  %5291 = vmatpush1.bf16.msra.mxu1 %v7292_v31  ;;  %v7373_v12 = vld [vmem:[%s10300_s5 + $0x28] ss:$16 sps:$4 sm:$0xff]  }
 0x319   :  { %5255 = vmatprep.subr.bf16.mxu0 %v7297_v4  ;;  %5292 = vmatprep.subr.bf16.mxu1 %v7300_v52  ;;  %v7376_v31 = vld [vmem:[%s10300_s5 + $0x268] ss:$16 sps:$4 sm:$0xff]   ;;  %v7381_v4 = vld [vmem:[%s10300_s5 + $0xc] ss:$16 sps:$4 sm:$0xff]  }
 0x31a   :  { %v7384_v52 = vld [vmem:[%s10300_s5 + $0x24c] ss:$16 sps:$4 sm:$0xff]  }
 0x31c   :  { %5256 = vmatpush2.bf16.msra.mxu0 %v7295_v39  ;;  %5293 = vmatpush1.bf16.msra.mxu1 %v7298_v13  ;;  %v7379_v39 = vld [vmem:[%s10300_s5 + $0x8] ss:$16 sps:$4 sm:$0xff]  }
 0x31d   :  { %5257 = vmatprep.subr.bf16.mxu0 %v7303_v58  ;;  %5294 = vmatprep.subr.bf16.mxu1 %v7306_v18  ;;  %v7382_v13 = vld [vmem:[%s10300_s5 + $0x248] ss:$16 sps:$4 sm:$0xff]   ;;  %v7387_v58 = vld [vmem:[%s10300_s5 + $0x1ec] ss:$16 sps:$4 sm:$0xff]  }
 0x31e   :  { %v7390_v18 = vld [vmem:[%s10300_s5 + $0x22c] ss:$16 sps:$4 sm:$0xff]  }
 0x320   :  { %5258 = vmatpush2.bf16.msra.mxu0 %v7301_v7  ;;  %5295 = vmatpush2.bf16.msra.mxu1 %v7304_v9  ;;  %v7385_v7 = vld [vmem:[%s10300_s5 + $0x1e8] ss:$16 sps:$4 sm:$0xff]  }
 0x321   :  { %5259 = vmatprep.subr.bf16.mxu0 %v7309_v2  ;;  %5296 = vmatprep.subr.bf16.mxu1 %v7312_v3  ;;  %v7388_v9 = vld [vmem:[%s10300_s5 + $0x228] ss:$16 sps:$4 sm:$0xff]   ;;  %v7393_v2 = vld [vmem:[%s10300_s5 + $0x1cc] ss:$16 sps:$4 sm:$0xff]  }
 0x322   :  { %v7396_v3 = vld [vmem:[%s10300_s5 + $0x20c] ss:$16 sps:$4 sm:$0xff]  }
 0x324   :  { %5260 = vmatpush2.bf16.msra.mxu0 %v7307_v36  ;;  %5297 = vmatpush2.bf16.msra.mxu1 %v7310_v11  ;;  %v7391_v36 = vld [vmem:[%s10300_s5 + $0x1c8] ss:$16 sps:$4 sm:$0xff]  }
 0x325   :  { %5261 = vmatprep.subr.bf16.mxu0 %v7315_v54  ;;  %5298 = vmatprep.subr.bf16.mxu1 %v7318_v44  ;;  %v7394_v11 = vld [vmem:[%s10300_s5 + $0x208] ss:$16 sps:$4 sm:$0xff]   ;;  %v7399_v54 = vld [vmem:[%s10300_s5 + $0x1ac] ss:$16 sps:$4 sm:$0xff]  }
 0x326   :  { %v7402_v44 = vld [vmem:[%s10300_s5 + $0x3ec] ss:$16 sps:$4 sm:$0xff]  }
 0x328   :  { %5262 = vmatpush2.bf16.msra.mxu0 %v7313_v24  ;;  %5299 = vmatpush2.bf16.msra.mxu1 %v7316_v5  ;;  %v7397_v24 = vld [vmem:[%s10300_s5 + $0x1a8] ss:$16 sps:$4 sm:$0xff]  }
 0x329   :  { %5263 = vmatprep.subr.bf16.mxu0 %v7321_v1  ;;  %5300 = vmatprep.subr.bf16.mxu1 %v7324_v33  ;;  %v7400_v5 = vld [vmem:[%s10300_s5 + $0x3e8] ss:$16 sps:$4 sm:$0xff]   ;;  %v7405_v1 = vld [vmem:[%s10300_s5 + $0x18c] ss:$16 sps:$4 sm:$0xff]  }
 0x32a   :  { %v7408_v33 = vld [vmem:[%s10300_s5 + $0x3cc] ss:$16 sps:$4 sm:$0xff]  }
 0x32c   :  { %5264 = vmatpush2.bf16.msra.mxu0 %v7319_v27  ;;  %5301 = vmatpush2.bf16.msra.mxu1 %v7322_v35  ;;  %v7403_v27 = vld [vmem:[%s10300_s5 + $0x188] ss:$16 sps:$4 sm:$0xff]  }
 0x32d   :  { %5265 = vmatprep.subr.bf16.mxu0 %v7327_v21  ;;  %5302 = vmatprep.subr.bf16.mxu1 %v7330_v48  ;;  %v7406_v35 = vld [vmem:[%s10300_s5 + $0x3c8] ss:$16 sps:$4 sm:$0xff]   ;;  %v7411_v21 = vld [vmem:[%s10300_s5 + $0x16c] ss:$16 sps:$4 sm:$0xff]  }
 0x32e   :  { %v7414_v48 = vld [vmem:[%s10300_s5 + $0x3ac] ss:$16 sps:$4 sm:$0xff]  }
 0x330   :  { %5266 = vmatpush2.bf16.msra.mxu0 %v7325_v47  ;;  %5303 = vmatpush2.bf16.msra.mxu1 %v7328_v22  ;;  %v7409_v47 = vld [vmem:[%s10300_s5 + $0x168] ss:$16 sps:$4 sm:$0xff]  }
 0x331   :  { %5267 = vmatprep.subr.bf16.mxu0 %v7333_v41  ;;  %5304 = vmatprep.subr.bf16.mxu1 %v7336_v60  ;;  %v7412_v22 = vld [vmem:[%s10300_s5 + $0x3a8] ss:$16 sps:$4 sm:$0xff]   ;;  %v7417_v41 = vld [vmem:[%s10300_s5 + $0x14c] ss:$16 sps:$4 sm:$0xff]  }
 0x332   :  { %v7420_v60 = vld [vmem:[%s10300_s5 + $0x38c] ss:$16 sps:$4 sm:$0xff]  }
 0x334   :  { %5268 = vmatpush2.bf16.msra.mxu0 %v7331_v43  ;;  %5305 = vmatpush2.bf16.msra.mxu1 %v7334_v20  ;;  %v7415_v43 = vld [vmem:[%s10300_s5 + $0x148] ss:$16 sps:$4 sm:$0xff]  }
 0x335   :  { %5306 = vmatprep.subr.bf16.mxu1 %v7339_v28  ;;  %5319 = vmatprep.subr.bf16.mxu0 %v7342_v53  ;;  %v7418_v20 = vld [vmem:[%s10300_s5 + $0x388] ss:$16 sps:$4 sm:$0xff]   ;;  %v7423_v28 = vld [vmem:[%s10300_s5 + $0x12c] ss:$16 sps:$4 sm:$0xff]  }
 0x336   :  { %v7426_v53 = vld [vmem:[%s10300_s5 + $0x36c] ss:$16 sps:$4 sm:$0xff]  }
 0x337   :  { %5270 = vmatmul.mubr.bf16.vlgmr.msra.gmra.mxu0 %v9778_v46 }
 0x338   :  { %5307 = vmatpush2.bf16.msra.mxu1 %v7337_v8  ;;  %5320 = vmatpush1.bf16.msra.mxu0 %v7340_v49  ;;  %v7421_v8 = vld [vmem:[%s10300_s5 + $0x128] ss:$16 sps:$4 sm:$0xff]  }
 0x339   :  { %5351 = vmatprep.mubr.bf16.mxu0 %v9528_v26  ;;  %5308 = vmatprep.subr.bf16.mxu1 %v7345_v25  ;;  %v7352_v26 = vld [vmem:[%s10300_s5 + $0x2e8] ss:$16 sps:$4 sm:$0xff]   ;;  %v7429_v25 = vld [vmem:[%s10300_s5 + $0x10c] ss:$16 sps:$4 sm:$0xff]  }
 0x33a   :  { %5321 = vmatprep.subr.bf16.mxu0 %v7348_v23  ;;  %v7424_v49 = vld [vmem:[%s10300_s5 + $0x368] ss:$16 sps:$4 sm:$0xff]   ;;  %v7432_v23 = vld [vmem:[%s10300_s5 + $0x34c] ss:$16 sps:$4 sm:$0xff]  }
 0x33c   :  { %5309 = vmatpush2.bf16.msra.mxu1 %v7343_v50  ;;  %5322 = vmatpush1.bf16.msra.mxu0 %v7346_v37  ;;  %v7427_v50 = vld [vmem:[%s10300_s5 + $0x108] ss:$16 sps:$4 sm:$0xff]  }
 0x33d   :  { %5323 = vmatprep.subr.bf16.mxu0 %v7351_v15  ;;  %5360 = vmatprep.subr.bf16.mxu1 %v7354_v34  ;;  %v7430_v37 = vld [vmem:[%s10300_s5 + $0x348] ss:$16 sps:$4 sm:$0xff]   ;;  %v7435_v15 = vld [vmem:[%s10300_s5 + $0x32c] ss:$16 sps:$4 sm:$0xff]  }
 0x33e   :  { %v7438_v34 = vld [vmem:[%s10300_s5 + $0x4ec] ss:$16 sps:$4 sm:$0xff]  }
 0x33f   :  { %5311 = vmatmul.mubr.bf16.vlgmr.msra.gmra.mxu1 %v9808_v51 }
 0x340   :  { %5324 = vmatpush1.bf16.msra.mxu0 %v7349_v59  ;;  %5361 = vmatpush1.bf16.msra.mxu1 %v7352_v26  ;;  %v7433_v59 = vld [vmem:[%s10300_s5 + $0x328] ss:$16 sps:$4 sm:$0xff]  }
 0x341   :  { %5392 = vmatprep.mubr.bf16.mxu1 %v9562_v10  ;;  %5325 = vmatprep.subr.bf16.mxu0 %v7357_v6  ;;  %v7364_v10 = vld [vmem:[%s10300_s5 + $0x2a8] ss:$16 sps:$4 sm:$0xff]   ;;  %v7441_v6 = vld [vmem:[%s10300_s5 + $0x30c] ss:$16 sps:$4 sm:$0xff]  }
 0x342   :  { %5362 = vmatprep.subr.bf16.mxu1 %v7360_v45  ;;  %v7436_v26 = vld [vmem:[%s10300_s5 + $0x4e8] ss:$16 sps:$4 sm:$0xff]   ;;  %v7444_v45 = vld [vmem:[%s10300_s5 + $0x4cc] ss:$16 sps:$4 sm:$0xff]  }
 0x344   :  { %5326 = vmatpush1.bf16.msra.mxu0 %v7355_v38  ;;  %5363 = vmatpush1.bf16.msra.mxu1 %v7358_v0  ;;  %v7439_v38 = vld [vmem:[%s10300_s5 + $0x308] ss:$16 sps:$4 sm:$0xff]  }
 0x345   :  { %5327 = vmatprep.subr.bf16.mxu0 %v7363_v55  ;;  %5364 = vmatprep.subr.bf16.mxu1 %v7366_v42  ;;  %v7442_v0 = vld [vmem:[%s10300_s5 + $0x4c8] ss:$16 sps:$4 sm:$0xff]   ;;  %v7447_v55 = vld [vmem:[%s10300_s5 + $0x4ac] ss:$16 sps:$4 sm:$0xff]  }
 0x346   :  { %v7445_v42 = vld [vmem:[%s10300_s5 + $0x4a8] ss:$16 sps:$4 sm:$0xff]  }
 0x348   :  { %5328 = vmatpush1.bf16.msra.mxu0 %v7361_v19  ;;  %5365 = vmatpush1.bf16.msra.mxu1 %v7364_v10  ;;  %v7453_v19 = vld [vmem:[%s10300_s5 + $0x48c] ss:$16 sps:$4 sm:$0xff]  }
 0x349   :  { %5329 = vmatprep.subr.bf16.mxu0 %v7369_v17  ;;  %5366 = vmatprep.subr.bf16.mxu1 %v7372_v62  ;;  %v7456_v10 = vld [vmem:[%s10300_s5 + $0x6cc] ss:$16 sps:$4 sm:$0xff]   ;;  %v7451_v17 = vld [vmem:[%s10300_s5 + $0x488] ss:$16 sps:$4 sm:$0xff]  }
 0x34a   :  { %v7454_v62 = vld [vmem:[%s10300_s5 + $0x6c8] ss:$16 sps:$4 sm:$0xff]  }
 0x34c   :  { %5330 = vmatpush1.bf16.msra.mxu0 %v7367_v16  ;;  %5367 = vmatpush1.bf16.msra.mxu1 %v7370_v61  ;;  %v7459_v16 = vld [vmem:[%s10300_s5 + $0x46c] ss:$16 sps:$4 sm:$0xff]   ;;  %v7457_v61 = vld [vmem:[%s10300_s5 + $0x468] ss:$16 sps:$4 sm:$0xff]  }
 0x34d   :  { %5331 = vmatprep.subr.bf16.mxu0 %v7375_v32  ;;  %5368 = vmatprep.subr.bf16.mxu1 %v7378_v30  ;;  %v7465_v32 = vld [vmem:[%s10300_s5 + $0x44c] ss:$16 sps:$4 sm:$0xff]  }
 0x34e   :  { %v7468_v30 = vld [vmem:[%s10300_s5 + $0x68c] ss:$16 sps:$4 sm:$0xff]  }
 0x350   :  { %5332 = vmatpush1.bf16.msra.mxu0 %v7373_v12  ;;  %5369 = vmatpush1.bf16.msra.mxu1 %v7376_v31  ;;  %v7463_v12 = vld [vmem:[%s10300_s5 + $0x448] ss:$16 sps:$4 sm:$0xff]  }
 0x351   :  { %5333 = vmatprep.subr.bf16.mxu0 %v7381_v4  ;;  %5370 = vmatprep.subr.bf16.mxu1 %v7384_v52  ;;  %v7466_v31 = vld [vmem:[%s10300_s5 + $0x688] ss:$16 sps:$4 sm:$0xff]   ;;  %v7471_v4 = vld [vmem:[%s10300_s5 + $0x42c] ss:$16 sps:$4 sm:$0xff]  }
 0x352   :  { %v7474_v52 = vld [vmem:[%s10300_s5 + $0x66c] ss:$16 sps:$4 sm:$0xff]  }
 0x354   :  { %5334 = vmatpush1.bf16.msra.mxu0 %v7379_v39  ;;  %5371 = vmatpush1.bf16.msra.mxu1 %v7382_v13  ;;  %v7469_v39 = vld [vmem:[%s10300_s5 + $0x428] ss:$16 sps:$4 sm:$0xff]  }
 0x355   :  { %5335 = vmatprep.subr.bf16.mxu0 %v7387_v58  ;;  %5372 = vmatprep.subr.bf16.mxu1 %v7390_v18  ;;  %v7472_v13 = vld [vmem:[%s10300_s5 + $0x668] ss:$16 sps:$4 sm:$0xff]   ;;  %v7477_v58 = vld [vmem:[%s10300_s5 + $0x40c] ss:$16 sps:$4 sm:$0xff]  }
 0x356   :  { %v7480_v18 = vld [vmem:[%s10300_s5 + $0x64c] ss:$16 sps:$4 sm:$0xff]  }
 0x358   :  { %5336 = vmatpush2.bf16.msra.mxu0 %v7385_v7  ;;  %5373 = vmatpush1.bf16.msra.mxu1 %v7388_v9  ;;  %v7475_v7 = vld [vmem:[%s10300_s5 + $0x408] ss:$16 sps:$4 sm:$0xff]  }
 0x359   :  { %5337 = vmatprep.subr.bf16.mxu0 %v7393_v2  ;;  %5374 = vmatprep.subr.bf16.mxu1 %v7396_v3  ;;  %v7478_v9 = vld [vmem:[%s10300_s5 + $0x648] ss:$16 sps:$4 sm:$0xff]   ;;  %v7483_v2 = vld [vmem:[%s10300_s5 + $0x5ec] ss:$16 sps:$4 sm:$0xff]  }
 0x35a   :  { %v7486_v3 = vld [vmem:[%s10300_s5 + $0x62c] ss:$16 sps:$4 sm:$0xff]  }
 0x35c   :  { %5338 = vmatpush2.bf16.msra.mxu0 %v7391_v36  ;;  %5375 = vmatpush1.bf16.msra.mxu1 %v7394_v11  ;;  %v7481_v36 = vld [vmem:[%s10300_s5 + $0x5e8] ss:$16 sps:$4 sm:$0xff]  }
 0x35d   :  { %5339 = vmatprep.subr.bf16.mxu0 %v7399_v54  ;;  %5376 = vmatprep.subr.bf16.mxu1 %v7402_v44  ;;  %v7484_v11 = vld [vmem:[%s10300_s5 + $0x628] ss:$16 sps:$4 sm:$0xff]   ;;  %v7489_v54 = vld [vmem:[%s10300_s5 + $0x5cc] ss:$16 sps:$4 sm:$0xff]  }
 0x35e   :  { %v7492_v44 = vld [vmem:[%s10300_s5 + $0x60c] ss:$16 sps:$4 sm:$0xff]  }
 0x360   :  { %5340 = vmatpush2.bf16.msra.mxu0 %v7397_v24  ;;  %5377 = vmatpush2.bf16.msra.mxu1 %v7400_v5  ;;  %v7487_v24 = vld [vmem:[%s10300_s5 + $0x5c8] ss:$16 sps:$4 sm:$0xff]  }
 0x361   :  { %5341 = vmatprep.subr.bf16.mxu0 %v7405_v1  ;;  %5378 = vmatprep.subr.bf16.mxu1 %v7408_v33  ;;  %v7490_v5 = vld [vmem:[%s10300_s5 + $0x608] ss:$16 sps:$4 sm:$0xff]   ;;  %v7495_v1 = vld [vmem:[%s10300_s5 + $0x5ac] ss:$16 sps:$4 sm:$0xff]  }
 0x362   :  { %v7498_v33 = vld [vmem:[%s10300_s5 + $0x7ec] ss:$16 sps:$4 sm:$0xff]  }
 0x364   :  { %5342 = vmatpush2.bf16.msra.mxu0 %v7403_v27  ;;  %5379 = vmatpush2.bf16.msra.mxu1 %v7406_v35  ;;  %v7493_v27 = vld [vmem:[%s10300_s5 + $0x5a8] ss:$16 sps:$4 sm:$0xff]  }
 0x365   :  { %5343 = vmatprep.subr.bf16.mxu0 %v7411_v21  ;;  %5380 = vmatprep.subr.bf16.mxu1 %v7414_v48  ;;  %v7496_v35 = vld [vmem:[%s10300_s5 + $0x7e8] ss:$16 sps:$4 sm:$0xff]   ;;  %v7501_v21 = vld [vmem:[%s10300_s5 + $0x58c] ss:$16 sps:$4 sm:$0xff]  }
 0x366   :  { %v7504_v48 = vld [vmem:[%s10300_s5 + $0x7cc] ss:$16 sps:$4 sm:$0xff]  }
 0x368   :  { %5344 = vmatpush2.bf16.msra.mxu0 %v7409_v47  ;;  %5381 = vmatpush2.bf16.msra.mxu1 %v7412_v22  ;;  %v7499_v47 = vld [vmem:[%s10300_s5 + $0x588] ss:$16 sps:$4 sm:$0xff]  }
 0x369   :  { %5345 = vmatprep.subr.bf16.mxu0 %v7417_v41  ;;  %5382 = vmatprep.subr.bf16.mxu1 %v7420_v60  ;;  %v7502_v22 = vld [vmem:[%s10300_s5 + $0x7c8] ss:$16 sps:$4 sm:$0xff]   ;;  %v7507_v41 = vld [vmem:[%s10300_s5 + $0x56c] ss:$16 sps:$4 sm:$0xff]  }
 0x36a   :  { %v7510_v60 = vld [vmem:[%s10300_s5 + $0x7ac] ss:$16 sps:$4 sm:$0xff]  }
 0x36c   :  { %5346 = vmatpush2.bf16.msra.mxu0 %v7415_v43  ;;  %5383 = vmatpush2.bf16.msra.mxu1 %v7418_v20  ;;  %v7505_v43 = vld [vmem:[%s10300_s5 + $0x568] ss:$16 sps:$4 sm:$0xff]  }
 0x36d   :  { %5347 = vmatprep.subr.bf16.mxu0 %v7423_v28  ;;  %5384 = vmatprep.subr.bf16.mxu1 %v7426_v53  ;;  %v7508_v20 = vld [vmem:[%s10300_s5 + $0x7a8] ss:$16 sps:$4 sm:$0xff]   ;;  %v7513_v28 = vld [vmem:[%s10300_s5 + $0x54c] ss:$16 sps:$4 sm:$0xff]  }
 0x36e   :  { %v7516_v53 = vld [vmem:[%s10300_s5 + $0x78c] ss:$16 sps:$4 sm:$0xff]  }
 0x370   :  { %5348 = vmatpush2.bf16.msra.mxu0 %v7421_v8  ;;  %5385 = vmatpush2.bf16.msra.mxu1 %v7424_v49  ;;  %v7511_v8 = vld [vmem:[%s10300_s5 + $0x548] ss:$16 sps:$4 sm:$0xff]  }
 0x371   :  { %5349 = vmatprep.subr.bf16.mxu0 %v7429_v25  ;;  %5386 = vmatprep.subr.bf16.mxu1 %v7432_v23  ;;  %v7514_v49 = vld [vmem:[%s10300_s5 + $0x788] ss:$16 sps:$4 sm:$0xff]   ;;  %v7519_v25 = vld [vmem:[%s10300_s5 + $0x52c] ss:$16 sps:$4 sm:$0xff]  }
 0x372   :  { %v7522_v23 = vld [vmem:[%s10300_s5 + $0x76c] ss:$16 sps:$4 sm:$0xff]  }
 0x374   :  { %5350 = vmatpush2.bf16.msra.mxu0 %v7427_v50  ;;  %5387 = vmatpush2.bf16.msra.mxu1 %v7430_v37  ;;  %v7517_v50 = vld [vmem:[%s10300_s5 + $0x528] ss:$16 sps:$4 sm:$0xff]  }
 0x375   :  { %5388 = vmatprep.subr.bf16.mxu1 %v7435_v15  ;;  %5401 = vmatprep.subr.bf16.mxu0 %v7438_v34  ;;  %v7520_v37 = vld [vmem:[%s10300_s5 + $0x768] ss:$16 sps:$4 sm:$0xff]   ;;  %v7525_v15 = vld [vmem:[%s10300_s5 + $0x50c] ss:$16 sps:$4 sm:$0xff]  }
 0x376   :  { %v7528_v34 = vld [vmem:[%s10300_s5 + $0x74c] ss:$16 sps:$4 sm:$0xff]  }
 0x377   :  { %5352 = vmatmul.mubr.bf16.vlgmr.msra.gmra.mxu0 %v9535_v14  ;;  %v7450_v14 = vld [vmem:[%s10300_s5 + $0x6ec] ss:$16 sps:$4 sm:$0xff]  }
 0x378   :  { %5389 = vmatpush2.bf16.msra.mxu1 %v7433_v59  ;;  %5402 = vmatpush1.bf16.msra.mxu0 %v7436_v26  ;;  %v7523_v59 = vld [vmem:[%s10300_s5 + $0x508] ss:$16 sps:$4 sm:$0xff]  }
 0x379   :  { %5433 = vmatprep.mubr.bf16.mxu0 %v9613_v40  ;;  %5390 = vmatprep.subr.bf16.mxu1 %v7441_v6  ;;  %v7448_v40 = vld [vmem:[%s10300_s5 + $0x6e8] ss:$16 sps:$4 sm:$0xff]   ;;  %v7531_v6 = vld [vmem:[%s10300_s5 + $0x72c] ss:$16 sps:$4 sm:$0xff]  }
 0x37a   :  { %5403 = vmatprep.subr.bf16.mxu0 %v7444_v45  ;;  %v7526_v26 = vld [vmem:[%s10300_s5 + $0x748] ss:$16 sps:$4 sm:$0xff]  }
 0x37b   :  { %v7535_v45 = vld [vmem:[%s10302_s7 + $0x78] sm:$0xff]  }
 0x37c   :  { %5391 = vmatpush2.bf16.msra.mxu1 %v7439_v38  ;;  %5404 = vmatpush1.bf16.msra.mxu0 %v7442_v0  ;;  %v7529_v38 = vld [vmem:[%s10300_s5 + $0x728] ss:$16 sps:$4 sm:$0xff]  }
 0x37d   :  { %5405 = vmatprep.subr.bf16.mxu0 %v7447_v55  ;;  %5442 = vmatprep.subr.bf16.mxu1 %v7450_v14  ;;  %v7536_v0 = vld [vmem:[%s10302_s7 + $0x38] sm:$0xff]   ;;  %v7537_v14 = vld [vmem:[%s10302_s7 + $0x70] sm:$0xff]  }
 0x37e   :  { %v7534_v55 = vld [vmem:[%s10300_s5 + $0x70c] ss:$16 sps:$4 sm:$0xff]  }
 0x37f   :  { %5393 = vmatmul.mubr.bf16.vlgmr.msra.gmra.mxu1 %v9574_v29  ;;  %v7462_v29 = vld [vmem:[%s10300_s5 + $0x6ac] ss:$16 sps:$4 sm:$0xff]  }
 0x380   :  { %5406 = vmatpush1.bf16.msra.mxu0 %v7445_v42  ;;  %5443 = vmatpush1.bf16.msra.mxu1 %v7448_v40  ;;  %v7532_v40 = vld [vmem:[%s10300_s5 + $0x708] ss:$16 sps:$4 sm:$0xff]  }
 0x381   :  { %5474 = vmatprep.mubr.bf16.mxu1 %v9653_v57  ;;  %5407 = vmatprep.subr.bf16.mxu0 %v7453_v19  ;;  %v7460_v57 = vld [vmem:[%s10300_s5 + $0x6a8] ss:$16 sps:$4 sm:$0xff]   ;;  %v7538_v19 = vld [vmem:[%s10302_s7 + $0x30] sm:$0xff]  }
 0x382   :  { %5444 = vmatprep.subr.bf16.mxu1 %v7456_v10 }
 0x384   :  { %5408 = vmatpush1.bf16.msra.mxu0 %v7451_v17  ;;  %5445 = vmatpush1.bf16.msra.mxu1 %v7454_v62  ;;  %v7540_v62 = vld [vmem:[%s10302_s7 + $0x28] sm:$0xff]  }
 0x385   :  { %5409 = vmatprep.subr.bf16.mxu0 %v7459_v16  ;;  %5446 = vmatprep.subr.bf16.mxu1 %v7462_v29  ;;  %v7541_v29 = vld [vmem:[%s10302_s7 + $0x60] sm:$0xff]  }
 0x388   :  { %5410 = vmatpush1.bf16.msra.mxu0 %v7457_v61  ;;  %5447 = vmatpush1.bf16.msra.mxu1 %v7460_v57  ;;  %v7542_v57 = vld [vmem:[%s10302_s7 + $0x20] sm:$0xff]  }
 0x389   :  { %5411 = vmatprep.subr.bf16.mxu0 %v7465_v32  ;;  %5448 = vmatprep.subr.bf16.mxu1 %v7468_v30  ;;  %v7543_v30 = vld [vmem:[%s10302_s7 + $0x58] sm:$0xff]  }
 0x38c   :  { %5412 = vmatpush1.bf16.msra.mxu0 %v7463_v12  ;;  %5449 = vmatpush1.bf16.msra.mxu1 %v7466_v31  ;;  %v7544_v31 = vld [vmem:[%s10302_s7 + $0x18] sm:$0xff]  }
 0x38d   :  { %5413 = vmatprep.subr.bf16.mxu0 %v7471_v4  ;;  %5450 = vmatprep.subr.bf16.mxu1 %v7474_v52  ;;  %v7551_v52 = vld [vmem:[%s10302_s7 + $0xf8] ss:$0 sps:$4 sm:$0x33]  }
 0x390   :  { %5414 = vmatpush1.bf16.msra.mxu0 %v7469_v39  ;;  %5451 = vmatpush1.bf16.msra.mxu1 %v7472_v13  ;;  %v7552_v39 = vld [vmem:[%s10302_s7 + $0xb8] sm:$0xff]   ;;  %v7553_v13 = vld [vmem:[%s10302_s7 + $0xf0] sm:$0xff]  }
 0x391   :  { %5415 = vmatprep.subr.bf16.mxu0 %v7477_v58  ;;  %5452 = vmatprep.subr.bf16.mxu1 %v7480_v18  ;;  %v7546_v58 = vld [vmem:[%s10302_s7 + $0x10] sm:$0xff]  }
 0x392   :  { %v7554_v18 = vld [vmem:[%s10302_s7 + $0xb0] sm:$0xff]  }
 0x394   :  { %5416 = vmatpush1.bf16.msra.mxu0 %v7475_v7  ;;  %5453 = vmatpush1.bf16.msra.mxu1 %v7478_v9  ;;  %v7547_v7 = vld [vmem:[%s10302_s7 + $0x48] sm:$0xff]  }
 0x395   :  { %5417 = vmatprep.subr.bf16.mxu0 %v7483_v2  ;;  %5454 = vmatprep.subr.bf16.mxu1 %v7486_v3  ;;  %v7555_v9 = vld [vmem:[%s10302_s7 + $0xe8] sm:$0xff]  }
 0x396   :  { %v7548_v2 = vld [vmem:[%s10302_s7 + $0x8] sm:$0xff]  }
 0x397   :  { %v7556_v3 = vld [vmem:[%s10302_s7 + $0xa8] sm:$0xff]  }
 0x398   :  { %5418 = vmatpush2.bf16.msra.mxu0 %v7481_v36  ;;  %5455 = vmatpush1.bf16.msra.mxu1 %v7484_v11  ;;  %v7549_v36 = vld [vmem:[%s10302_s7 + $0x40] sm:$0xff]  }
 0x399   :  { %5419 = vmatprep.subr.bf16.mxu0 %v7489_v54  ;;  %5456 = vmatprep.subr.bf16.mxu1 %v7492_v44  ;;  %v7557_v11 = vld [vmem:[%s10302_s7 + $0xe0] sm:$0xff]  }
 0x39a   :  { %v7550_v54 = vld [vmem:[%s10302_s7] sm:$0xff]  }
 0x39b   :  { %v7558_v44 = vld [vmem:[%s10302_s7 + $0xa0] sm:$0xff]  }
 0x39c   :  { %5420 = vmatpush2.bf16.msra.mxu0 %v7487_v24  ;;  %5457 = vmatpush1.bf16.msra.mxu1 %v7490_v5  ;;  %v3853_v24 = vld [vmem:[%s10303_s6] sm:$0xf] }
 0x39d   :  { %5421 = vmatprep.subr.bf16.mxu0 %v7495_v1  ;;  %5458 = vmatprep.subr.bf16.mxu1 %v7498_v33  ;;  %v3858_v5 = vrot.slane %v3853_v24, %v8131_v63  ;;  %v3862_v33 = vrot.slane %v3853_v24, %v8128_v56  ;;  %v7561_v56 = vld [vmem:[%s10302_s7 + $0xd0] sm:$0xff]  }
 0x3a0   :  { %5422 = vmatpush2.bf16.msra.mxu0 %v7493_v27  ;;  %5459 = vmatpush2.bf16.msra.mxu1 %v7496_v35  ;;  %v7559_v27 = vld [vmem:[%s10302_s7 + $0xd8] sm:$0xff]  }
 0x3a1   :  { %5423 = vmatprep.subr.bf16.mxu0 %v7501_v21  ;;  %5460 = vmatprep.subr.bf16.mxu1 %v7504_v48  ;;  %v7560_v21 = vld [vmem:[%s10302_s7 + $0x98] sm:$0xff]  }
 0x3a4   :  { %5424 = vmatpush2.bf16.msra.mxu0 %v7499_v47  ;;  %5461 = vmatpush2.bf16.msra.mxu1 %v7502_v22 }
 0x3a5   :  { %5425 = vmatprep.subr.bf16.mxu0 %v7507_v41  ;;  %5462 = vmatprep.subr.bf16.mxu1 %v7510_v60  ;;  %v7562_v60 = vld [vmem:[%s10302_s7 + $0x90] sm:$0xff]  }
 0x3a8   :  { %5426 = vmatpush2.bf16.msra.mxu0 %v7505_v43  ;;  %5463 = vmatpush2.bf16.msra.mxu1 %v7508_v20 }
 0x3a9   :  { %5427 = vmatprep.subr.bf16.mxu0 %v7513_v28  ;;  %5464 = vmatprep.subr.bf16.mxu1 %v7516_v53 }
 0x3ac   :  { %5428 = vmatpush2.bf16.msra.mxu0 %v7511_v8  ;;  %5465 = vmatpush2.bf16.msra.mxu1 %v7514_v49  ;;  %v7563_v49 = vld [vmem:[%s10302_s7 + $0xc8] sm:$0xff]  }
 0x3ad   :  { %5429 = vmatprep.subr.bf16.mxu0 %v7519_v25  ;;  %5466 = vmatprep.subr.bf16.mxu1 %v7522_v23  ;;  %v7564_v23 = vld [vmem:[%s10302_s7 + $0x88] sm:$0xff]  }
 0x3b0   :  { %5430 = vmatpush2.bf16.msra.mxu0 %v7517_v50  ;;  %5467 = vmatpush2.bf16.msra.mxu1 %v7520_v37 }
 0x3b1   :  { %5431 = vmatprep.subr.bf16.mxu0 %v7525_v15  ;;  %5468 = vmatprep.subr.bf16.mxu1 %v7528_v34 }
 0x3b4   :  { %5432 = vmatpush2.bf16.msra.mxu0 %v7523_v59  ;;  %5469 = vmatpush2.bf16.msra.mxu1 %v7526_v26  ;;  %v7565_v59 = vld [vmem:[%s10302_s7 + $0xc0] sm:$0xff]  }
 0x3b5   :  { %5470 = vmatprep.subr.bf16.mxu1 %v7531_v6  ;;  %6530 = vmatprep.subr.bf16.mxu0 %v7535_v45  ;;  %v7566_v6 = vld [vmem:[%s10302_s7 + $0x80] sm:$0xff]  }
 0x3b7   :  { %5434 = vmatmul.mubr.bf16.vlgmr.msra.gmra.mxu0 %v9778_v46  ;;  %v10183_v42 = vpop.f32.mrf.mxu0  ;;  %v7539_v46 = vld [vmem:[%s10302_s7 + $0x68] sm:$0xff]  }
 0x3b8   :  { %5471 = vmatpush2.bf16.msra.mxu1 %v7529_v38  ;;  %6531 = vmatpush3.bf16.msra.mxu0 %v7536_v0  ;;  %v5190_v48 = vadd.f32 %v10183_v42, %v3858_v5 }
 0x3b9   :  { %v10191_v10 = vpop.f32.mrf.mxu0  ;;  %5472 = vmatprep.subr.bf16.mxu1 %v7534_v55  ;;  %6532 = vmatprep.subr.bf16.mxu0 %v7537_v14 }
 0x3ba   :  { %v5192_v22 = vadd.f32 %v10191_v10, %v3862_v33 }
 0x3bb   :  { %v5193_v17 = vpop.f32.mrf.mxu0 }
 0x3bc   :  { %5473 = vmatpush2.bf16.msra.mxu1 %v7532_v40  ;;  %6533 = vmatpush3.bf16.msra.mxu0 %v7538_v19  ;;  %v10355_v17 = vld [vmem:[#allocation2_spill] sm:$0xff] }
 0x3bd   :  { %v5194_v16 = vpop.f32.mrf.mxu0  ;;  %6534 = vmatprep.subr.bf16.mxu0 %v7539_v46  ;;  %6574 = vmatprep.subr.msk.bf16.mxu1 %vm5754_vm0, %v7551_v52 }
 0x3be   :  { %v3869_v16 = vsub.s32 3, %v10355_v17 }
 0x3bf   :  { %5475 = vmatmul.mubr.bf16.vlgmr.msra.gmra.mxu1 %v9808_v51  ;;  %v5230_v61 = vpop.f32.mrf.mxu1  ;;  %v7545_v51 = vld [vmem:[%s10302_s7 + $0x50] sm:$0xff]  }
 0x3c0   :  { %6535 = vmatpush3.bf16.msra.mxu0 %v7540_v62  ;;  %6553 = vmatpush3.bf16.msra.mxu1 %v7552_v39  ;;  %v5231_v63 = vadd.f32 %v5230_v61, %v5190_v48  ;;  %v3865_v62 = vsub.s32 2, %v10355_v17 }
 0x3c1   :  { %v5232_v32 = vpop.f32.mrf.mxu1  ;;  %6536 = vmatprep.subr.bf16.mxu0 %v7541_v29  ;;  %6554 = vmatprep.subr.bf16.mxu1 %v7553_v13 }
 0x3c2   :  { %v5233_v43 = vadd.f32 %v5232_v32, %v5192_v22  ;;  %v3866_v29 = vrot.slane %v3853_v24, %v3865_v62 }
 0x3c3   :  { %v5234_v12 = vpop.f32.mrf.mxu1 }
 0x3c4   :  { %6537 = vmatpush3.bf16.msra.mxu0 %v7542_v57  ;;  %6555 = vmatpush3.bf16.msra.mxu1 %v7554_v18  ;;  %v3870_v57 = vrot.slane %v3853_v24, %v3869_v16 }
 0x3c5   :  { %v5235_v4 = vpop.f32.mrf.mxu1  ;;  %6538 = vmatprep.subr.bf16.mxu0 %v7543_v30  ;;  %6556 = vmatprep.subr.bf16.mxu1 %v7555_v9 }
 0x3c8   :  { %6539 = vmatpush3.bf16.msra.mxu0 %v7544_v31  ;;  %6557 = vmatpush3.bf16.msra.mxu1 %v7556_v3 }
 0x3c9   :  { %6540 = vmatprep.subr.bf16.mxu0 %v7545_v51  ;;  %6558 = vmatprep.subr.bf16.mxu1 %v7557_v11 }
 0x3cc   :  { %6541 = vmatpush3.bf16.msra.mxu0 %v7546_v58  ;;  %6559 = vmatpush3.bf16.msra.mxu1 %v7558_v44 }
 0x3cd   :  { %6542 = vmatprep.subr.bf16.mxu0 %v7547_v7  ;;  %6560 = vmatprep.subr.bf16.mxu1 %v7559_v27 }
 0x3d0   :  { %6543 = vmatpush3.bf16.msra.mxu0 %v7548_v2  ;;  %6561 = vmatpush3.bf16.msra.mxu1 %v7560_v21 }
 0x3d1   :  { %6544 = vmatprep.subr.bf16.mxu0 %v7549_v36  ;;  %6562 = vmatprep.subr.bf16.mxu1 %v7561_v56 }
 0x3d4   :  { %6545 = vmatpush3.bf16.msra.mxu0 %v7550_v54  ;;  %6563 = vmatpush3.bf16.msra.mxu1 %v7562_v60 }
 0x3d5   :  { %6564 = vmatprep.subr.bf16.mxu1 %v7563_v49 }
 0x3d8   :  { %6565 = vmatpush3.bf16.msra.mxu1 %v7564_v23 }
 0x3d9   :  { %6566 = vmatprep.subr.bf16.mxu1 %v7565_v59 }
 0x3dc   :  { %6567 = vmatpush3.bf16.msra.mxu1 %v7566_v6 }
 0x3f7   :  { %v5271_v1 = vpop.f32.mrf.mxu0 }
 0x3f8   :  { %v5272_v20 = vadd.f32 %v5271_v1, %v5231_v63 }
 0x3f9   :  { %v5273_v35 = vpop.f32.mrf.mxu0 }
 0x3fa   :  { %v5274_v53 = vadd.f32 %v5273_v35, %v5233_v43  ;;  %v6496_v35 = vld [vmem:[%s10304_s8] ss:$0 sm:$0xff] }
 0x3fb   :  { %v5275_v47 = vpop.f32.mrf.mxu0 }
 0x3fd   :  { %v5276_v41 = vpop.f32.mrf.mxu0 }
 0x3ff   :  { %v5312_v28 = vpop.f32.mrf.mxu1 }
 0x400   :  { %v5313_v8 = vadd.f32 %v5312_v28, %v5272_v20 }
 0x401   :  { %v5314_v25 = vpop.f32.mrf.mxu1 }
 0x402   :  { %v5315_v50 = vadd.f32 %v5314_v25, %v5274_v53  ;;  %v5483_v37 = vmax.f32 %v5313_v8, 0.0 }
 0x403   :  { %v5316_v15 = vpop.f32.mrf.mxu1 }
 0x404   :  { %v5484_v34 = vmax.f32 %v5315_v50, 0.0  ;;  %v5487_v38 = vpack.c.bf16 %v5483_v37, %v5483_v37 }
 0x405   :  { %v5317_v26 = vpop.f32.mrf.mxu1 }
 0x406   :  { %v5488_v45 = vpack.c.bf16 %v5484_v34, %v5484_v34 }
 0x408   :  { %5790 = vmatprep.mubr.bf16.mxu0 %v5488_v45 }
 0x409   :  { %5791 = vmatmul.mubr.bf16.vlgmr.msra.gmra.mxu0 %v5487_v38 }
 0x437   :  { %v5353_v0 = vpop.f32.mrf.mxu0 }
 0x438   :  { %v5354_v30 = vadd.f32 %v5353_v0, %v3866_v29 }
 0x439   :  { %v5355_v55 = vpop.f32.mrf.mxu0 }
 0x43a   :  { %v5356_v31 = vadd.f32 %v5355_v55, %v3870_v57 }
 0x43b   :  { %v5357_v14 = vpop.f32.mrf.mxu0 }
 0x43d   :  { %v5358_v42 = vpop.f32.mrf.mxu0 }
 0x43f   :  { %v5394_v40 = vpop.f32.mrf.mxu1 }
 0x440   :  { %v5395_v51 = vadd.f32 %v5394_v40, %v5354_v30 }
 0x441   :  { %v5396_v19 = vpop.f32.mrf.mxu1 }
 0x442   :  { %v5397_v52 = vadd.f32 %v5396_v19, %v5356_v31 }
 0x443   :  { %v5398_v10 = vpop.f32.mrf.mxu1 }
 0x445   :  { %v5399_v46 = vpop.f32.mrf.mxu1 }
 0x477   :  { %v5435_v61 = vpop.f32.mrf.mxu0 }
 0x478   :  { %v5436_v39 = vadd.f32 %v5435_v61, %v5395_v51 }
 0x479   :  { %v5437_v32 = vpop.f32.mrf.mxu0 }
 0x47a   :  { %v5438_v58 = vadd.f32 %v5437_v32, %v5397_v52 }
 0x47b   :  { %v5439_v12 = vpop.f32.mrf.mxu0 }
 0x47d   :  { %v5440_v4 = vpop.f32.mrf.mxu0 }
 0x47f   :  { %v5476_v13 = vpop.f32.mrf.mxu1 }
 0x480   :  { %v5477_v18 = vadd.f32 %v5476_v13, %v5436_v39 }
 0x481   :  { %v5478_v7 = vpop.f32.mrf.mxu1 }
 0x482   :  { %v5479_v9 = vadd.f32 %v5478_v7, %v5438_v58  ;;  %v5485_v2 = vmax.f32 %v5477_v18, 0.0 }
 0x483   :  { %v5480_v3 = vpop.f32.mrf.mxu1 }
 0x484   :  { %v5486_v36 = vmax.f32 %v5479_v9, 0.0  ;;  %v5489_v44 = vpack.c.bf16 %v5485_v2, %v5485_v2 }
 0x485   :  { %v5481_v11 = vpop.f32.mrf.mxu1 }
 0x486   :  { %v5490_v54 = vpack.c.bf16 %v5486_v36, %v5486_v36 }
 0x488   :  { %6529 = vmatprep.mubr.msk.bf16.mxu1 %vm5750_vm1, %v5490_v54 }
 0x489   :  { %5831 = vmatmul.mubr.bf16.vlgmr.msra.gmra.mxu1 %v5489_v44 }
 0x4c9   :  { %v6546_v24 = vpop.f32.mrf.mxu0 }
 0x4cb   :  { %v6547_v5 = vpop.f32.mrf.mxu0 }
 0x4cc   :  { %v6548_v1 = vadd.f32 %v6547_v5, %v6546_v24 }
 0x4cd   :  { %v6549_v33 = vpop.f32.mrf.mxu0 }
 0x4ce   :  { %v5793_v47 = vadd.f32 %v6548_v1, %v6496_v35 }
 0x4cf   :  { %v6550_v27 = vpop.f32.mrf.mxu0 }
 0x549   :  { %v6568_v21 = vpop.f32.mrf.mxu1 }
 0x54b   :  { %v6569_v48 = vpop.f32.mrf.mxu1 }
 0x54c   :  { %v6570_v22 = vadd.f32 %v6569_v48, %v6568_v21 }
 0x54d   :  { %v6571_v63 = vpop.f32.mrf.mxu1 }
 0x54e   :  { %v5833_v56 = vadd.f32 %v6570_v22, %v5793_v47 }
 0x54f   :  { %v6572_v41 = vpop.f32.mrf.mxu1 }
 0x550   :  { %v5839_v60 = vsel %vm5838_vm2, %v5833_v56, -inf }
 0x551   :  { %5840 = vmax.xlane.f32.xlu0 %v5839_v60 }
 0x5da   :  { %v5841_v43 = vpop.xlane.xlu0 %5840 }
 0x5db   :  { %v5842_v20 = vsub.f32 %v5833_v56, %v5841_v43 }
 0x5dd   :  { %v5843_v28 = vmul.f32 1.442695, %v5842_v20 }
 0x5df   :  { %7567 = vpow2.f32 %v5843_v28 }
 0x5ec   :  { %v7568_v53 = vpop.eup %7567 }
 0x5ed   :  { %v5845_v8 = vsel %vm5838_vm2, %v7568_v53, 0.0 }
 0x5ee   :  { %5846 = vadd.xlane.f32.xlu0 %v5845_v8 }
 0x677   :  { %v5847_v49 = vpop.xlane.xlu0 %5846 }
 0x678   :  { %7569 = vlog2.f32 %v5847_v49 }
 0x685   :  { %v7570_v25 = vpop.eup %7569 }
 0x686   :  { %v5849_v23 = vmul.f32 0.6931472, %v7570_v25 }
 0x688   :  { %v5850_v50 = vsub.f32 %v5842_v20, %v5849_v23 }
 0x68a   :  { %5851 = vst.msk [vmem:[%s10305_s9] sm:$0xff] %vm5838_vm2, %v5850_v50 }

</bundles_post_ra>
